<compile_context>
chip_gen: v6e
topology: v6e:2x2x1
jax: 0.10.0
libtpu: 0.0.40
codegen_flags: <defaults>
</compile_context>

<pallas_src>
import functools

import jax
import jax.numpy as jnp
import numpy as np
from jax.experimental import pallas as pl
from jax.experimental.pallas import tpu as pltpu

NEG_SLOPE = 0.01   # nn.LeakyReLU() default
EPS = 1e-5         # calc_mean_std eps


def _round_up(v, m):
    return (v + m - 1) // m * m


# ---------------------------------------------------------------------------
# Fused kernel: one grid step == one batch element.
# ---------------------------------------------------------------------------
def _style_block_kernel(aff_ref, x_ref, w1_ref, w2_ref, o_ref, canvas_ref, *,
                        H0, W0, WP, Cin, Cout):
    H, W = 2 * H0, 2 * W0
    HP = H + 2
    HW = H * W
    WR = WP - (W + 1)          # right border + sublane-alignment columns
    cdt = canvas_ref.dtype

    # --- zero the 1-pixel border (and alignment columns) of the canvas.
    # Done every step (cheap: O(H+W) not O(H*W)) so correctness does not
    # depend on scratch persistence when the batch axis is sharded across
    # TensorCores.  The interior is fully overwritten below.
    canvas_ref[pl.ds(0, 1), :, :] = jnp.zeros((1, WP, Cin), cdt)
    canvas_ref[pl.ds(H + 1, 1), :, :] = jnp.zeros((1, WP, Cin), cdt)
    canvas_ref[:, pl.ds(0, 1), :] = jnp.zeros((HP, 1, Cin), cdt)
    canvas_ref[:, pl.ds(W + 1, WR), :] = jnp.zeros((HP, WR, Cin), cdt)

    # --- per-sample modulation params (AffineNet computed in the wrapper) ---
    aff = aff_ref[0]                                   # (1, 2Cin+2Cout), f32
    m1 = aff[:, 0:Cin]
    s1 = aff[:, Cin:2 * Cin]
    m2 = aff[:, 2 * Cin:2 * Cin + Cout]
    s2 = aff[:, 2 * Cin + Cout:2 * Cin + 2 * Cout]

    def conv3x3(w_ref, c_out):
        # 3x3 conv (pad=1) as 9 shifted (HW, Cin) x (Cin, c_out) matmuls
        # accumulated in f32 -- no materialized im2col buffer.
        acc = jnp.zeros((HW, c_out), jnp.float32)
        for t in range(9):
            dy, dx = t // 3, t % 3
            tap = canvas_ref[dy:dy + H, dx:dx + W, :].reshape(HW, Cin)
            acc = acc + jnp.dot(tap, w_ref[t],
                                preferred_element_type=jnp.float32)
        return acc

    def inst_norm_mod(feat, s, m):
        # Instance norm (unbiased ddof=1 variance, eps on variance) folded
        # with the style modulation into one scale/shift FMA over `feat`.
        mean = jnp.mean(feat, axis=0, keepdims=True)                 # (1, C)
        cen = feat - mean
        var = jnp.sum(cen * cen, axis=0, keepdims=True) * (1.0 / (HW - 1))
        scale = jax.lax.rsqrt(var + EPS) * s                         # (1, C)
        shift = m - mean * scale                                     # (1, C)
        return feat * scale + shift

    # --- nearest-2x upsample via broadcast/reshape, stored into the canvas
    # interior (border stays zero => conv padding for free). ---
    x = x_ref[0]                                                     # (H0,W0,Cin)
    xw = jnp.broadcast_to(x[:, :, None, :], (H0, W0, 2, Cin)).reshape(H0, W, Cin)
    xup = jnp.broadcast_to(xw[:, None, :, :], (H0, 2, W, Cin)).reshape(H, W, Cin)
    canvas_ref[pl.ds(1, H), pl.ds(1, W), :] = xup.astype(cdt)

    # --- conv1 + IN + modulation (conv bias omitted: cancelled by IN) ---
    y1 = inst_norm_mod(conv3x3(w1_ref, Cin), s1, m1)                 # (HW, Cin)

    # --- pad y1 into the SAME canvas (interior overwrite; border stays 0).
    # y1 data-depends on all conv1 tap reads, so this cannot be reordered
    # above conv1. ---
    canvas_ref[pl.ds(1, H), pl.ds(1, W), :] = y1.reshape(H, W, Cin).astype(cdt)

    # --- conv2 + IN + modulation ---
    y2 = inst_norm_mod(conv3x3(w2_ref, Cout), s2, m2)                # (HW, Cout)

    o_ref[0, :, :] = y2.astype(o_ref.dtype)


# ---------------------------------------------------------------------------
# StyleBlock forward (wrapper).  Accepts / returns NCHW like the PyTorch module.
# ---------------------------------------------------------------------------
def style_block_forward(params, x_nchw, w, *, compute_dtype=jnp.float32):
    N, Cin, H0, W0 = x_nchw.shape
    Cout = params["conv2_w"].shape[3]
    H, W = 2 * H0, 2 * W0
    HP = H + 2
    WP = _round_up(W + 2, 8)          # canvas width aligned to sublanes
    HW = H * W
    Ctot = 2 * Cin + 2 * Cout

    # --- AffineNet heads: one batched matmul + LeakyReLU outside the kernel ---
    aff_w = jnp.concatenate([params["A1_mean_w"], params["A1_std_w"],
                             params["A2_mean_w"], params["A2_std_w"]], axis=1)
    aff_b = jnp.concatenate([params["A1_mean_b"], params["A1_std_b"],
                             params["A2_mean_b"], params["A2_std_b"]], axis=1)
    aff = w @ aff_w + aff_b                       # (N, Ctot)
    aff = jnp.where(aff >= 0.0, aff, NEG_SLOPE * aff)
    aff3 = aff.reshape(N, 1, Ctot).astype(jnp.float32)

    # Conv weights as 9 per-tap (Cin, Cout) slabs (HWIO -> (9, Cin, Cout)).
    w1r = params["conv1_w"].reshape(9, Cin, Cin).astype(compute_dtype)
    w2r = params["conv2_w"].reshape(9, Cin, Cout).astype(compute_dtype)

    x_nhwc = jnp.transpose(x_nchw, (0, 2, 3, 1))  # (N, H0, W0, Cin)

    # VMEM budget: per-step blocks + canvas + temporaries, with headroom;
    # capped at 64 MiB so the same launch stays within v7x's physical VMEM.
    item = jnp.dtype(compute_dtype).itemsize
    est = (HP * WP * Cin * item                            # canvas scratch
           + 2 * (H0 * W0 * Cin + HW * Cout) * 4           # double-buffered I/O
           + (9 * Cin * Cin + 9 * Cin * Cout) * item       # weights
           + Ctot * 4
           + (3 * HW * Cin + 2 * HW * Cout) * 4)           # taps / acc / y1 / y2
    vmem_limit = int(min(max(4 * est + (4 << 20), 32 << 20), 64 << 20))

    kernel = functools.partial(_style_block_kernel, H0=H0, W0=W0, WP=WP,
                               Cin=Cin, Cout=Cout)
    out_flat = pl.pallas_call(
        kernel,
        out_shape=jax.ShapeDtypeStruct((N, HW, Cout), jnp.float32),
        grid_spec=pltpu.PrefetchScalarGridSpec(
            num_scalar_prefetch=0,
            grid=(N,),
            in_specs=[
                pl.BlockSpec((1, 1, Ctot), lambda i: (i, 0, 0)),         # aff row
                pl.BlockSpec((1, H0, W0, Cin), lambda i: (i, 0, 0, 0)),  # x NHWC
                pl.BlockSpec((9, Cin, Cin), lambda i: (0, 0, 0)),        # conv1 W taps
                pl.BlockSpec((9, Cin, Cout), lambda i: (0, 0, 0)),       # conv2 W taps
            ],
            out_specs=pl.BlockSpec((1, HW, Cout), lambda i: (i, 0, 0)),
            scratch_shapes=[pltpu.VMEM((HP, WP, Cin), compute_dtype)],
        ),
        compiler_params=pltpu.CompilerParams(
            dimension_semantics=("parallel",),
            vmem_limit_bytes=vmem_limit),
    )(aff3, x_nhwc, w1r, w2r)

    # (N, H*W, Cout) -> NCHW (wrapper glue).
    return jnp.transpose(out_flat.reshape(N, H, W, Cout), (0, 3, 1, 2))


# ---------------------------------------------------------------------------
# Pure-JAX reference (NCHW, mirrors the PyTorch module exactly, incl. biases)
# ---------------------------------------------------------------------------
def _ref_forward(params, x, w):
    def lin(W, b):
        y = w @ W + b[0]
        return jnp.where(y >= 0.0, y, NEG_SLOPE * y)

    m1, s1 = lin(params["A1_mean_w"], params["A1_mean_b"]), lin(params["A1_std_w"], params["A1_std_b"])
    m2, s2 = lin(params["A2_mean_w"], params["A2_mean_b"]), lin(params["A2_std_w"], params["A2_std_b"])

    def conv(xc, W_hwio, b):
        W_oihw = jnp.transpose(W_hwio, (3, 2, 0, 1))
        y = jax.lax.conv_general_dilated(
            xc, W_oihw, (1, 1), ((1, 1), (1, 1)),
            dimension_numbers=("NCHW", "OIHW", "NCHW"))
        return y + b.reshape(1, -1, 1, 1)

    def ins_nor(f):
        N, C = f.shape[:2]
        flat = f.reshape(N, C, -1)
        mean = flat.mean(axis=2).reshape(N, C, 1, 1)
        var = flat.var(axis=2, ddof=1).reshape(N, C, 1, 1) + EPS
        return (f - mean) / jnp.sqrt(var)

    x = jnp.repeat(jnp.repeat(x, 2, axis=2), 2, axis=3)
    x = conv(x, params["conv1_w"], params["conv1_b"])
    x = ins_nor(x) * s1[:, :, None, None] + m1[:, :, None, None]
    x = conv(x, params["conv2_w"], params["conv2_b"])
    x = ins_nor(x) * s2[:, :, None, None] + m2[:, :, None, None]
    return x


# ---------------------------------------------------------------------------
# Deterministic parameter init + run
# ---------------------------------------------------------------------------
def make_params(key, cin, cout, w_dim):
    ks = jax.random.split(key, 12)
    p = {
        # AffineNet weights stored as (in, out); biases as (1, out)
        "A1_mean_w": jax.random.normal(ks[0], (w_dim, cin), jnp.float32) * 0.2,
        "A1_mean_b": jax.random.normal(ks[1], (1, cin), jnp.float32) * 0.1,
        "A1_std_w":  jax.random.normal(ks[2], (w_dim, cin), jnp.float32) * 0.2,
        "A1_std_b":  jax.random.normal(ks[3], (1, cin), jnp.float32) * 0.1 + 1.0,
        "A2_mean_w": jax.random.normal(ks[4], (w_dim, cout), jnp.float32) * 0.2,
        "A2_mean_b": jax.random.normal(ks[5], (1, cout), jnp.float32) * 0.1,
        "A2_std_w":  jax.random.normal(ks[6], (w_dim, cout), jnp.float32) * 0.2,
        "A2_std_b":  jax.random.normal(ks[7], (1, cout), jnp.float32) * 0.1 + 1.0,
        # Conv weights stored as HWIO (3, 3, Cin, Cout); biases as (1, Cout)
        "conv1_w": jax.random.normal(ks[8], (3, 3, cin, cin), jnp.float32) * 0.15,
        "conv1_b": jax.random.normal(ks[9], (1, cin), jnp.float32) * 0.05,
        "conv2_w": jax.random.normal(ks[10], (3, 3, cin, cout), jnp.float32) * 0.15,
        "conv2_b": jax.random.normal(ks[11], (1, cout), jnp.float32) * 0.05,
    }
    return p


if __name__ == "__main__":
    N, Cin, Cout, w_dim = 2, 4, 8, 16
    H = W = 8  # pre-upsample spatial size (becomes 16x16 after upsample)

    key = jax.random.PRNGKey(0)
    kx, kw, kp = jax.random.split(key, 3)
    x = jax.random.normal(kx, (N, Cin, H, W), jnp.float32)   # NCHW input
    w = jax.random.normal(kw, (N, w_dim), jnp.float32)
    params = make_params(kp, Cin, Cout, w_dim)

    out = style_block_forward(params, x, w)
    out = jax.block_until_ready(out)

    ref = jax.block_until_ready(_ref_forward(params, x, w))

    assert out.shape == (N, Cout, 2 * H, 2 * W), out.shape
    np.testing.assert_allclose(np.asarray(out), np.asarray(ref),
                               rtol=1e-4, atol=1e-4)
    print("KERNEL_OK")
</pallas_src>

<mosaic_0001>
module attributes {stable_mosaic.version = 11 : i64} {
  func.func @_style_block_kernel(%arg0: i32, %arg1: memref<1x1x24xf32, #tpu.memory_space<vmem>>, %arg2: memref<1x8x8x4xf32, #tpu.memory_space<vmem>>, %arg3: memref<9x4x4xf32, #tpu.memory_space<vmem>>, %arg4: memref<9x4x8xf32, #tpu.memory_space<vmem>>, %arg5: memref<1x256x8xf32, #tpu.memory_space<vmem>>, %arg6: memref<18x24x4xf32, #tpu.memory_space<vmem>>) attributes {dimension_semantics = [#tpu.dimension_semantics<parallel>], iteration_bounds = array<i64: 2>, scalar_prefetch = 0 : i64, scratch_operands = 1 : i64, tpu.core_type = #tpu.core_type<tc>, window_params = [{transform_indices = @transform_0, window_bounds = array<i64: 1, 1, 24>}, {transform_indices = @transform_1, window_bounds = array<i64: 1, 8, 8, 4>}, {pipeline_mode = #tpu.pipeline_mode<synchronous>, transform_indices = @transform_2, window_bounds = array<i64: 9, 4, 4>}, {pipeline_mode = #tpu.pipeline_mode<synchronous>, transform_indices = @transform_3, window_bounds = array<i64: 9, 4, 8>}, {transform_indices = @transform_4, window_bounds = array<i64: 1, 256, 8>}]} {
    %cst = arith.constant 0.000000e+00 : f32
    %0 = vector.broadcast %cst : f32 to vector<1x24x4xf32>
    %c0 = arith.constant 0 : index
    %c0_0 = arith.constant 0 : index
    %c0_1 = arith.constant 0 : index
    %1 = vector.load %arg6[%c0, %c0_0, %c0_1] : memref<18x24x4xf32, #tpu.memory_space<vmem>>, vector<1x24x4xf32>
    tpu.vector_store %arg6[%c0, %c0_0, %c0_1], %0 {strides = array<i32>} : memref<18x24x4xf32, #tpu.memory_space<vmem>>, vector<1x24x4xf32>,
    %cst_2 = arith.constant 0.000000e+00 : f32
    %2 = vector.broadcast %cst_2 : f32 to vector<1x24x4xf32>
    %c17 = arith.constant 17 : index
    %c0_3 = arith.constant 0 : index
    %c0_4 = arith.constant 0 : index
    %3 = vector.load %arg6[%c17, %c0_3, %c0_4] : memref<18x24x4xf32, #tpu.memory_space<vmem>>, vector<1x24x4xf32>
    tpu.vector_store %arg6[%c17, %c0_3, %c0_4], %2 {strides = array<i32>} : memref<18x24x4xf32, #tpu.memory_space<vmem>>, vector<1x24x4xf32>,
    %cst_5 = arith.constant 0.000000e+00 : f32
    %4 = vector.broadcast %cst_5 : f32 to vector<18x1x4xf32>
    %c0_6 = arith.constant 0 : index
    %c0_7 = arith.constant 0 : index
    %c0_8 = arith.constant 0 : index
    %5 = vector.load %arg6[%c0_6, %c0_7, %c0_8] : memref<18x24x4xf32, #tpu.memory_space<vmem>>, vector<18x1x4xf32>
    tpu.vector_store %arg6[%c0_6, %c0_7, %c0_8], %4 {strides = array<i32>} : memref<18x24x4xf32, #tpu.memory_space<vmem>>, vector<18x1x4xf32>,
    %cst_9 = arith.constant 0.000000e+00 : f32
    %6 = vector.broadcast %cst_9 : f32 to vector<18x7x4xf32>
    %c0_10 = arith.constant 0 : index
    %c17_11 = arith.constant 17 : index
    %c0_12 = arith.constant 0 : index
    %7 = vector.load %arg6[%c0_10, %c17_11, %c0_12] : memref<18x24x4xf32, #tpu.memory_space<vmem>>, vector<18x7x4xf32>
    tpu.vector_store %arg6[%c0_10, %c17_11, %c0_12], %6 {strides = array<i32>} : memref<18x24x4xf32, #tpu.memory_space<vmem>>, vector<18x7x4xf32>,
    %c0_13 = arith.constant 0 : index
    %c0_14 = arith.constant 0 : index
    %c0_15 = arith.constant 0 : index
    %8 = vector.load %arg1[%c0_13, %c0_14, %c0_15] : memref<1x1x24xf32, #tpu.memory_space<vmem>>, vector<1x1x24xf32>
    %9 = vector.shape_cast %8 : vector<1x1x24xf32> to vector<1x24xf32>
    %10 = vector.extract_strided_slice %9 {offsets = [0, 0], sizes = [1, 4], strides = [1, 1]} : vector<1x24xf32> to vector<1x4xf32>
    %11 = vector.extract_strided_slice %9 {offsets = [0, 4], sizes = [1, 4], strides = [1, 1]} : vector<1x24xf32> to vector<1x4xf32>
    %12 = vector.extract_strided_slice %9 {offsets = [0, 8], sizes = [1, 8], strides = [1, 1]} : vector<1x24xf32> to vector<1x8xf32>
    %13 = vector.extract_strided_slice %9 {offsets = [0, 16], sizes = [1, 8], strides = [1, 1]} : vector<1x24xf32> to vector<1x8xf32>
    %c0_16 = arith.constant 0 : index
    %c0_17 = arith.constant 0 : index
    %c0_18 = arith.constant 0 : index
    %c0_19 = arith.constant 0 : index
    %14 = vector.load %arg2[%c0_16, %c0_17, %c0_18, %c0_19] : memref<1x8x8x4xf32, #tpu.memory_space<vmem>>, vector<1x8x8x4xf32>
    %15 = vector.shape_cast %14 : vector<1x8x8x4xf32> to vector<8x8x4xf32>
    %16 = vector.shape_cast %15 : vector<8x8x4xf32> to vector<8x8x1x4xf32>
    %17 = vector.shape_cast %16 : vector<8x8x1x4xf32> to vector<8x8x1x4xf32>
    %18 = vector.broadcast %17 : vector<8x8x1x4xf32> to vector<8x8x2x4xf32>
    %19 = vector.shape_cast %18 : vector<8x8x2x4xf32> to vector<8x16x4xf32>
    %20 = vector.shape_cast %19 : vector<8x16x4xf32> to vector<8x1x16x4xf32>
    %21 = vector.shape_cast %20 : vector<8x1x16x4xf32> to vector<8x1x16x4xf32>
    %22 = vector.broadcast %21 : vector<8x1x16x4xf32> to vector<8x2x16x4xf32>
    %23 = vector.shape_cast %22 : vector<8x2x16x4xf32> to vector<16x16x4xf32>
    %c1 = arith.constant 1 : index
    %c1_20 = arith.constant 1 : index
    %c0_21 = arith.constant 0 : index
    %24 = vector.load %arg6[%c1, %c1_20, %c0_21] : memref<18x24x4xf32, #tpu.memory_space<vmem>>, vector<16x16x4xf32>
    tpu.vector_store %arg6[%c1, %c1_20, %c0_21], %23 {strides = array<i32>} : memref<18x24x4xf32, #tpu.memory_space<vmem>>, vector<16x16x4xf32>,
    %cst_22 = arith.constant 0.000000e+00 : f32
    %25 = vector.broadcast %cst_22 : f32 to vector<256x4xf32>
    %c0_23 = arith.constant 0 : index
    %c0_24 = arith.constant 0 : index
    %c0_25 = arith.constant 0 : index
    %26 = vector.load %arg6[%c0_23, %c0_24, %c0_25] : memref<18x24x4xf32, #tpu.memory_space<vmem>>, vector<16x16x4xf32>
    %27 = vector.shape_cast %26 : vector<16x16x4xf32> to vector<256x4xf32>
    %c0_26 = arith.constant 0 : index
    %c0_27 = arith.constant 0 : index
    %c0_28 = arith.constant 0 : index
    %28 = vector.load %arg3[%c0_26, %c0_27, %c0_28] : memref<9x4x4xf32, #tpu.memory_space<vmem>>, vector<1x4x4xf32>
    %29 = vector.shape_cast %28 : vector<1x4x4xf32> to vector<4x4xf32>
    %cst_29 = arith.constant dense<0.000000e+00> : vector<256x4xf32>
    %30 = tpu.matmul %27, %29, %cst_29 {dimension_numbers = #tpu.dot_dimension_numbers<[1], [0], [0], [1], [0, 0, 1, 1], [], []>} : vector<256x4xf32>, vector<4x4xf32>, vector<256x4xf32> -> vector<256x4xf32>
    %31 = arith.addf %25, %30 : vector<256x4xf32>
    %c0_30 = arith.constant 0 : index
    %c1_31 = arith.constant 1 : index
    %c0_32 = arith.constant 0 : index
    %32 = vector.load %arg6[%c0_30, %c1_31, %c0_32] : memref<18x24x4xf32, #tpu.memory_space<vmem>>, vector<16x16x4xf32>
    %33 = vector.shape_cast %32 : vector<16x16x4xf32> to vector<256x4xf32>
    %c1_33 = arith.constant 1 : index
    %c0_34 = arith.constant 0 : index
    %c0_35 = arith.constant 0 : index
    %34 = vector.load %arg3[%c1_33, %c0_34, %c0_35] : memref<9x4x4xf32, #tpu.memory_space<vmem>>, vector<1x4x4xf32>
    %35 = vector.shape_cast %34 : vector<1x4x4xf32> to vector<4x4xf32>
    %cst_36 = arith.constant dense<0.000000e+00> : vector<256x4xf32>
    %36 = tpu.matmul %33, %35, %cst_36 {dimension_numbers = #tpu.dot_dimension_numbers<[1], [0], [0], [1], [0, 0, 1, 1], [], []>} : vector<256x4xf32>, vector<4x4xf32>, vector<256x4xf32> -> vector<256x4xf32>
    %37 = arith.addf %31, %36 : vector<256x4xf32>
    %c0_37 = arith.constant 0 : index
    %c2 = arith.constant 2 : index
    %c0_38 = arith.constant 0 : index
    %38 = vector.load %arg6[%c0_37, %c2, %c0_38] : memref<18x24x4xf32, #tpu.memory_space<vmem>>, vector<16x16x4xf32>
    %39 = vector.shape_cast %38 : vector<16x16x4xf32> to vector<256x4xf32>
    %c2_39 = arith.constant 2 : index
    %c0_40 = arith.constant 0 : index
    %c0_41 = arith.constant 0 : index
    %40 = vector.load %arg3[%c2_39, %c0_40, %c0_41] : memref<9x4x4xf32, #tpu.memory_space<vmem>>, vector<1x4x4xf32>
    %41 = vector.shape_cast %40 : vector<1x4x4xf32> to vector<4x4xf32>
    %cst_42 = arith.constant dense<0.000000e+00> : vector<256x4xf32>
    %42 = tpu.matmul %39, %41, %cst_42 {dimension_numbers = #tpu.dot_dimension_numbers<[1], [0], [0], [1], [0, 0, 1, 1], [], []>} : vector<256x4xf32>, vector<4x4xf32>, vector<256x4xf32> -> vector<256x4xf32>
    %43 = arith.addf %37, %42 : vector<256x4xf32>
    %c1_43 = arith.constant 1 : index
    %c0_44 = arith.constant 0 : index
    %c0_45 = arith.constant 0 : index
    %44 = vector.load %arg6[%c1_43, %c0_44, %c0_45] : memref<18x24x4xf32, #tpu.memory_space<vmem>>, vector<16x16x4xf32>
    %45 = vector.shape_cast %44 : vector<16x16x4xf32> to vector<256x4xf32>
    %c3 = arith.constant 3 : index
    %c0_46 = arith.constant 0 : index
    %c0_47 = arith.constant 0 : index
    %46 = vector.load %arg3[%c3, %c0_46, %c0_47] : memref<9x4x4xf32, #tpu.memory_space<vmem>>, vector<1x4x4xf32>
    %47 = vector.shape_cast %46 : vector<1x4x4xf32> to vector<4x4xf32>
    %cst_48 = arith.constant dense<0.000000e+00> : vector<256x4xf32>
    %48 = tpu.matmul %45, %47, %cst_48 {dimension_numbers = #tpu.dot_dimension_numbers<[1], [0], [0], [1], [0, 0, 1, 1], [], []>} : vector<256x4xf32>, vector<4x4xf32>, vector<256x4xf32> -> vector<256x4xf32>
    %49 = arith.addf %43, %48 : vector<256x4xf32>
    %c1_49 = arith.constant 1 : index
    %c1_50 = arith.constant 1 : index
    %c0_51 = arith.constant 0 : index
    %50 = vector.load %arg6[%c1_49, %c1_50, %c0_51] : memref<18x24x4xf32, #tpu.memory_space<vmem>>, vector<16x16x4xf32>
    %51 = vector.shape_cast %50 : vector<16x16x4xf32> to vector<256x4xf32>
    %c4 = arith.constant 4 : index
    %c0_52 = arith.constant 0 : index
    %c0_53 = arith.constant 0 : index
    %52 = vector.load %arg3[%c4, %c0_52, %c0_53] : memref<9x4x4xf32, #tpu.memory_space<vmem>>, vector<1x4x4xf32>
    %53 = vector.shape_cast %52 : vector<1x4x4xf32> to vector<4x4xf32>
    %cst_54 = arith.constant dense<0.000000e+00> : vector<256x4xf32>
    %54 = tpu.matmul %51, %53, %cst_54 {dimension_numbers = #tpu.dot_dimension_numbers<[1], [0], [0], [1], [0, 0, 1, 1], [], []>} : vector<256x4xf32>, vector<4x4xf32>, vector<256x4xf32> -> vector<256x4xf32>
    %55 = arith.addf %49, %54 : vector<256x4xf32>
    %c1_55 = arith.constant 1 : index
    %c2_56 = arith.constant 2 : index
    %c0_57 = arith.constant 0 : index
    %56 = vector.load %arg6[%c1_55, %c2_56, %c0_57] : memref<18x24x4xf32, #tpu.memory_space<vmem>>, vector<16x16x4xf32>
    %57 = vector.shape_cast %56 : vector<16x16x4xf32> to vector<256x4xf32>
    %c5 = arith.constant 5 : index
    %c0_58 = arith.constant 0 : index
    %c0_59 = arith.constant 0 : index
    %58 = vector.load %arg3[%c5, %c0_58, %c0_59] : memref<9x4x4xf32, #tpu.memory_space<vmem>>, vector<1x4x4xf32>
    %59 = vector.shape_cast %58 : vector<1x4x4xf32> to vector<4x4xf32>
    %cst_60 = arith.constant dense<0.000000e+00> : vector<256x4xf32>
    %60 = tpu.matmul %57, %59, %cst_60 {dimension_numbers = #tpu.dot_dimension_numbers<[1], [0], [0], [1], [0, 0, 1, 1], [], []>} : vector<256x4xf32>, vector<4x4xf32>, vector<256x4xf32> -> vector<256x4xf32>
    %61 = arith.addf %55, %60 : vector<256x4xf32>
    %c2_61 = arith.constant 2 : index
    %c0_62 = arith.constant 0 : index
    %c0_63 = arith.constant 0 : index
    %62 = vector.load %arg6[%c2_61, %c0_62, %c0_63] : memref<18x24x4xf32, #tpu.memory_space<vmem>>, vector<16x16x4xf32>
    %63 = vector.shape_cast %62 : vector<16x16x4xf32> to vector<256x4xf32>
    %c6 = arith.constant 6 : index
    %c0_64 = arith.constant 0 : index
    %c0_65 = arith.constant 0 : index
    %64 = vector.load %arg3[%c6, %c0_64, %c0_65] : memref<9x4x4xf32, #tpu.memory_space<vmem>>, vector<1x4x4xf32>
    %65 = vector.shape_cast %64 : vector<1x4x4xf32> to vector<4x4xf32>
    %cst_66 = arith.constant dense<0.000000e+00> : vector<256x4xf32>
    %66 = tpu.matmul %63, %65, %cst_66 {dimension_numbers = #tpu.dot_dimension_numbers<[1], [0], [0], [1], [0, 0, 1, 1], [], []>} : vector<256x4xf32>, vector<4x4xf32>, vector<256x4xf32> -> vector<256x4xf32>
    %67 = arith.addf %61, %66 : vector<256x4xf32>
    %c2_67 = arith.constant 2 : index
    %c1_68 = arith.constant 1 : index
    %c0_69 = arith.constant 0 : index
    %68 = vector.load %arg6[%c2_67, %c1_68, %c0_69] : memref<18x24x4xf32, #tpu.memory_space<vmem>>, vector<16x16x4xf32>
    %69 = vector.shape_cast %68 : vector<16x16x4xf32> to vector<256x4xf32>
    %c7 = arith.constant 7 : index
    %c0_70 = arith.constant 0 : index
    %c0_71 = arith.constant 0 : index
    %70 = vector.load %arg3[%c7, %c0_70, %c0_71] : memref<9x4x4xf32, #tpu.memory_space<vmem>>, vector<1x4x4xf32>
    %71 = vector.shape_cast %70 : vector<1x4x4xf32> to vector<4x4xf32>
    %cst_72 = arith.constant dense<0.000000e+00> : vector<256x4xf32>
    %72 = tpu.matmul %69, %71, %cst_72 {dimension_numbers = #tpu.dot_dimension_numbers<[1], [0], [0], [1], [0, 0, 1, 1], [], []>} : vector<256x4xf32>, vector<4x4xf32>, vector<256x4xf32> -> vector<256x4xf32>
    %73 = arith.addf %67, %72 : vector<256x4xf32>
    %c2_73 = arith.constant 2 : index
    %c2_74 = arith.constant 2 : index
    %c0_75 = arith.constant 0 : index
    %74 = vector.load %arg6[%c2_73, %c2_74, %c0_75] : memref<18x24x4xf32, #tpu.memory_space<vmem>>, vector<16x16x4xf32>
    %75 = vector.shape_cast %74 : vector<16x16x4xf32> to vector<256x4xf32>
    %c8 = arith.constant 8 : index
    %c0_76 = arith.constant 0 : index
    %c0_77 = arith.constant 0 : index
    %76 = vector.load %arg3[%c8, %c0_76, %c0_77] : memref<9x4x4xf32, #tpu.memory_space<vmem>>, vector<1x4x4xf32>
    %77 = vector.shape_cast %76 : vector<1x4x4xf32> to vector<4x4xf32>
    %cst_78 = arith.constant dense<0.000000e+00> : vector<256x4xf32>
    %78 = tpu.matmul %75, %77, %cst_78 {dimension_numbers = #tpu.dot_dimension_numbers<[1], [0], [0], [1], [0, 0, 1, 1], [], []>} : vector<256x4xf32>, vector<4x4xf32>, vector<256x4xf32> -> vector<256x4xf32>
    %79 = arith.addf %73, %78 : vector<256x4xf32>
    %cst_79 = arith.constant dense<0.000000e+00> : vector<4xf32>
    %80 = vector.multi_reduction <add>, %79, %cst_79 [0] : vector<256x4xf32> to vector<4xf32>
    %81 = vector.shape_cast %80 : vector<4xf32> to vector<1x4xf32>
    %cst_80 = arith.constant 2.560000e+02 : f32
    %82 = vector.broadcast %cst_80 : f32 to vector<1x4xf32>
    %83 = arith.divf %81, %82 : vector<1x4xf32>
    %84 = vector.broadcast %83 : vector<1x4xf32> to vector<256x4xf32>
    %85 = arith.subf %79, %84 : vector<256x4xf32>
    %86 = arith.mulf %85, %85 : vector<256x4xf32>
    %cst_81 = arith.constant dense<0.000000e+00> : vector<4xf32>
    %87 = vector.multi_reduction <add>, %86, %cst_81 [0] : vector<256x4xf32> to vector<4xf32>
    %88 = vector.shape_cast %87 : vector<4xf32> to vector<1x4xf32>
    %cst_82 = arith.constant 0.00392156886 : f32
    %89 = vector.broadcast %cst_82 : f32 to vector<1x4xf32>
    %90 = arith.mulf %88, %89 : vector<1x4xf32>
    %cst_83 = arith.constant 9.99999974E-6 : f32
    %91 = vector.broadcast %cst_83 : f32 to vector<1x4xf32>
    %92 = arith.addf %90, %91 : vector<1x4xf32>
    %93 = math.rsqrt %92 : vector<1x4xf32>
    %94 = arith.mulf %93, %11 : vector<1x4xf32>
    %95 = arith.mulf %83, %94 : vector<1x4xf32>
    %96 = arith.subf %10, %95 : vector<1x4xf32>
    %97 = vector.broadcast %94 : vector<1x4xf32> to vector<256x4xf32>
    %98 = arith.mulf %79, %97 : vector<256x4xf32>
    %99 = vector.broadcast %96 : vector<1x4xf32> to vector<256x4xf32>
    %100 = arith.addf %98, %99 : vector<256x4xf32>
    %101 = vector.shape_cast %100 : vector<256x4xf32> to vector<16x16x4xf32>
    %c1_84 = arith.constant 1 : index
    %c1_85 = arith.constant 1 : index
    %c0_86 = arith.constant 0 : index
    %102 = vector.load %arg6[%c1_84, %c1_85, %c0_86] : memref<18x24x4xf32, #tpu.memory_space<vmem>>, vector<16x16x4xf32>
    tpu.vector_store %arg6[%c1_84, %c1_85, %c0_86], %101 {strides = array<i32>} : memref<18x24x4xf32, #tpu.memory_space<vmem>>, vector<16x16x4xf32>,
    %cst_87 = arith.constant 0.000000e+00 : f32
    %103 = vector.broadcast %cst_87 : f32 to vector<256x8xf32>
    %c0_88 = arith.constant 0 : index
    %c0_89 = arith.constant 0 : index
    %c0_90 = arith.constant 0 : index
    %104 = vector.load %arg6[%c0_88, %c0_89, %c0_90] : memref<18x24x4xf32, #tpu.memory_space<vmem>>, vector<16x16x4xf32>
    %105 = vector.shape_cast %104 : vector<16x16x4xf32> to vector<256x4xf32>
    %c0_91 = arith.constant 0 : index
    %c0_92 = arith.constant 0 : index
    %c0_93 = arith.constant 0 : index
    %106 = vector.load %arg4[%c0_91, %c0_92, %c0_93] : memref<9x4x8xf32, #tpu.memory_space<vmem>>, vector<1x4x8xf32>
    %107 = vector.shape_cast %106 : vector<1x4x8xf32> to vector<4x8xf32>
    %cst_94 = arith.constant dense<0.000000e+00> : vector<256x8xf32>
    %108 = tpu.matmul %105, %107, %cst_94 {dimension_numbers = #tpu.dot_dimension_numbers<[1], [0], [0], [1], [0, 0, 1, 1], [], []>} : vector<256x4xf32>, vector<4x8xf32>, vector<256x8xf32> -> vector<256x8xf32>
    %109 = arith.addf %103, %108 : vector<256x8xf32>
    %c0_95 = arith.constant 0 : index
    %c1_96 = arith.constant 1 : index
    %c0_97 = arith.constant 0 : index
    %110 = vector.load %arg6[%c0_95, %c1_96, %c0_97] : memref<18x24x4xf32, #tpu.memory_space<vmem>>, vector<16x16x4xf32>
    %111 = vector.shape_cast %110 : vector<16x16x4xf32> to vector<256x4xf32>
    %c1_98 = arith.constant 1 : index
    %c0_99 = arith.constant 0 : index
    %c0_100 = arith.constant 0 : index
    %112 = vector.load %arg4[%c1_98, %c0_99, %c0_100] : memref<9x4x8xf32, #tpu.memory_space<vmem>>, vector<1x4x8xf32>
    %113 = vector.shape_cast %112 : vector<1x4x8xf32> to vector<4x8xf32>
    %cst_101 = arith.constant dense<0.000000e+00> : vector<256x8xf32>
    %114 = tpu.matmul %111, %113, %cst_101 {dimension_numbers = #tpu.dot_dimension_numbers<[1], [0], [0], [1], [0, 0, 1, 1], [], []>} : vector<256x4xf32>, vector<4x8xf32>, vector<256x8xf32> -> vector<256x8xf32>
    %115 = arith.addf %109, %114 : vector<256x8xf32>
    %c0_102 = arith.constant 0 : index
    %c2_103 = arith.constant 2 : index
    %c0_104 = arith.constant 0 : index
    %116 = vector.load %arg6[%c0_102, %c2_103, %c0_104] : memref<18x24x4xf32, #tpu.memory_space<vmem>>, vector<16x16x4xf32>
    %117 = vector.shape_cast %116 : vector<16x16x4xf32> to vector<256x4xf32>
    %c2_105 = arith.constant 2 : index
    %c0_106 = arith.constant 0 : index
    %c0_107 = arith.constant 0 : index
    %118 = vector.load %arg4[%c2_105, %c0_106, %c0_107] : memref<9x4x8xf32, #tpu.memory_space<vmem>>, vector<1x4x8xf32>
    %119 = vector.shape_cast %118 : vector<1x4x8xf32> to vector<4x8xf32>
    %cst_108 = arith.constant dense<0.000000e+00> : vector<256x8xf32>
    %120 = tpu.matmul %117, %119, %cst_108 {dimension_numbers = #tpu.dot_dimension_numbers<[1], [0], [0], [1], [0, 0, 1, 1], [], []>} : vector<256x4xf32>, vector<4x8xf32>, vector<256x8xf32> -> vector<256x8xf32>
    %121 = arith.addf %115, %120 : vector<256x8xf32>
    %c1_109 = arith.constant 1 : index
    %c0_110 = arith.constant 0 : index
    %c0_111 = arith.constant 0 : index
    %122 = vector.load %arg6[%c1_109, %c0_110, %c0_111] : memref<18x24x4xf32, #tpu.memory_space<vmem>>, vector<16x16x4xf32>
    %123 = vector.shape_cast %122 : vector<16x16x4xf32> to vector<256x4xf32>
    %c3_112 = arith.constant 3 : index
    %c0_113 = arith.constant 0 : index
    %c0_114 = arith.constant 0 : index
    %124 = vector.load %arg4[%c3_112, %c0_113, %c0_114] : memref<9x4x8xf32, #tpu.memory_space<vmem>>, vector<1x4x8xf32>
    %125 = vector.shape_cast %124 : vector<1x4x8xf32> to vector<4x8xf32>
    %cst_115 = arith.constant dense<0.000000e+00> : vector<256x8xf32>
    %126 = tpu.matmul %123, %125, %cst_115 {dimension_numbers = #tpu.dot_dimension_numbers<[1], [0], [0], [1], [0, 0, 1, 1], [], []>} : vector<256x4xf32>, vector<4x8xf32>, vector<256x8xf32> -> vector<256x8xf32>
    %127 = arith.addf %121, %126 : vector<256x8xf32>
    %c1_116 = arith.constant 1 : index
    %c1_117 = arith.constant 1 : index
    %c0_118 = arith.constant 0 : index
    %128 = vector.load %arg6[%c1_116, %c1_117, %c0_118] : memref<18x24x4xf32, #tpu.memory_space<vmem>>, vector<16x16x4xf32>
    %129 = vector.shape_cast %128 : vector<16x16x4xf32> to vector<256x4xf32>
    %c4_119 = arith.constant 4 : index
    %c0_120 = arith.constant 0 : index
    %c0_121 = arith.constant 0 : index
    %130 = vector.load %arg4[%c4_119, %c0_120, %c0_121] : memref<9x4x8xf32, #tpu.memory_space<vmem>>, vector<1x4x8xf32>
    %131 = vector.shape_cast %130 : vector<1x4x8xf32> to vector<4x8xf32>
    %cst_122 = arith.constant dense<0.000000e+00> : vector<256x8xf32>
    %132 = tpu.matmul %129, %131, %cst_122 {dimension_numbers = #tpu.dot_dimension_numbers<[1], [0], [0], [1], [0, 0, 1, 1], [], []>} : vector<256x4xf32>, vector<4x8xf32>, vector<256x8xf32> -> vector<256x8xf32>
    %133 = arith.addf %127, %132 : vector<256x8xf32>
    %c1_123 = arith.constant 1 : index
    %c2_124 = arith.constant 2 : index
    %c0_125 = arith.constant 0 : index
    %134 = vector.load %arg6[%c1_123, %c2_124, %c0_125] : memref<18x24x4xf32, #tpu.memory_space<vmem>>, vector<16x16x4xf32>
    %135 = vector.shape_cast %134 : vector<16x16x4xf32> to vector<256x4xf32>
    %c5_126 = arith.constant 5 : index
    %c0_127 = arith.constant 0 : index
    %c0_128 = arith.constant 0 : index
    %136 = vector.load %arg4[%c5_126, %c0_127, %c0_128] : memref<9x4x8xf32, #tpu.memory_space<vmem>>, vector<1x4x8xf32>
    %137 = vector.shape_cast %136 : vector<1x4x8xf32> to vector<4x8xf32>
    %cst_129 = arith.constant dense<0.000000e+00> : vector<256x8xf32>
    %138 = tpu.matmul %135, %137, %cst_129 {dimension_numbers = #tpu.dot_dimension_numbers<[1], [0], [0], [1], [0, 0, 1, 1], [], []>} : vector<256x4xf32>, vector<4x8xf32>, vector<256x8xf32> -> vector<256x8xf32>
    %139 = arith.addf %133, %138 : vector<256x8xf32>
    %c2_130 = arith.constant 2 : index
    %c0_131 = arith.constant 0 : index
    %c0_132 = arith.constant 0 : index
    %140 = vector.load %arg6[%c2_130, %c0_131, %c0_132] : memref<18x24x4xf32, #tpu.memory_space<vmem>>, vector<16x16x4xf32>
    %141 = vector.shape_cast %140 : vector<16x16x4xf32> to vector<256x4xf32>
    %c6_133 = arith.constant 6 : index
    %c0_134 = arith.constant 0 : index
    %c0_135 = arith.constant 0 : index
    %142 = vector.load %arg4[%c6_133, %c0_134, %c0_135] : memref<9x4x8xf32, #tpu.memory_space<vmem>>, vector<1x4x8xf32>
    %143 = vector.shape_cast %142 : vector<1x4x8xf32> to vector<4x8xf32>
    %cst_136 = arith.constant dense<0.000000e+00> : vector<256x8xf32>
    %144 = tpu.matmul %141, %143, %cst_136 {dimension_numbers = #tpu.dot_dimension_numbers<[1], [0], [0], [1], [0, 0, 1, 1], [], []>} : vector<256x4xf32>, vector<4x8xf32>, vector<256x8xf32> -> vector<256x8xf32>
    %145 = arith.addf %139, %144 : vector<256x8xf32>
    %c2_137 = arith.constant 2 : index
    %c1_138 = arith.constant 1 : index
    %c0_139 = arith.constant 0 : index
    %146 = vector.load %arg6[%c2_137, %c1_138, %c0_139] : memref<18x24x4xf32, #tpu.memory_space<vmem>>, vector<16x16x4xf32>
    %147 = vector.shape_cast %146 : vector<16x16x4xf32> to vector<256x4xf32>
    %c7_140 = arith.constant 7 : index
    %c0_141 = arith.constant 0 : index
    %c0_142 = arith.constant 0 : index
    %148 = vector.load %arg4[%c7_140, %c0_141, %c0_142] : memref<9x4x8xf32, #tpu.memory_space<vmem>>, vector<1x4x8xf32>
    %149 = vector.shape_cast %148 : vector<1x4x8xf32> to vector<4x8xf32>
    %cst_143 = arith.constant dense<0.000000e+00> : vector<256x8xf32>
    %150 = tpu.matmul %147, %149, %cst_143 {dimension_numbers = #tpu.dot_dimension_numbers<[1], [0], [0], [1], [0, 0, 1, 1], [], []>} : vector<256x4xf32>, vector<4x8xf32>, vector<256x8xf32> -> vector<256x8xf32>
    %151 = arith.addf %145, %150 : vector<256x8xf32>
    %c2_144 = arith.constant 2 : index
    %c2_145 = arith.constant 2 : index
    %c0_146 = arith.constant 0 : index
    %152 = vector.load %arg6[%c2_144, %c2_145, %c0_146] : memref<18x24x4xf32, #tpu.memory_space<vmem>>, vector<16x16x4xf32>
    %153 = vector.shape_cast %152 : vector<16x16x4xf32> to vector<256x4xf32>
    %c8_147 = arith.constant 8 : index
    %c0_148 = arith.constant 0 : index
    %c0_149 = arith.constant 0 : index
    %154 = vector.load %arg4[%c8_147, %c0_148, %c0_149] : memref<9x4x8xf32, #tpu.memory_space<vmem>>, vector<1x4x8xf32>
    %155 = vector.shape_cast %154 : vector<1x4x8xf32> to vector<4x8xf32>
    %cst_150 = arith.constant dense<0.000000e+00> : vector<256x8xf32>
    %156 = tpu.matmul %153, %155, %cst_150 {dimension_numbers = #tpu.dot_dimension_numbers<[1], [0], [0], [1], [0, 0, 1, 1], [], []>} : vector<256x4xf32>, vector<4x8xf32>, vector<256x8xf32> -> vector<256x8xf32>
    %157 = arith.addf %151, %156 : vector<256x8xf32>
    %cst_151 = arith.constant dense<0.000000e+00> : vector<8xf32>
    %158 = vector.multi_reduction <add>, %157, %cst_151 [0] : vector<256x8xf32> to vector<8xf32>
    %159 = vector.shape_cast %158 : vector<8xf32> to vector<1x8xf32>
    %cst_152 = arith.constant 2.560000e+02 : f32
    %160 = vector.broadcast %cst_152 : f32 to vector<1x8xf32>
    %161 = arith.divf %159, %160 : vector<1x8xf32>
    %162 = vector.broadcast %161 : vector<1x8xf32> to vector<256x8xf32>
    %163 = arith.subf %157, %162 : vector<256x8xf32>
    %164 = arith.mulf %163, %163 : vector<256x8xf32>
    %cst_153 = arith.constant dense<0.000000e+00> : vector<8xf32>
    %165 = vector.multi_reduction <add>, %164, %cst_153 [0] : vector<256x8xf32> to vector<8xf32>
    %166 = vector.shape_cast %165 : vector<8xf32> to vector<1x8xf32>
    %cst_154 = arith.constant 0.00392156886 : f32
    %167 = vector.broadcast %cst_154 : f32 to vector<1x8xf32>
    %168 = arith.mulf %166, %167 : vector<1x8xf32>
    %cst_155 = arith.constant 9.99999974E-6 : f32
    %169 = vector.broadcast %cst_155 : f32 to vector<1x8xf32>
    %170 = arith.addf %168, %169 : vector<1x8xf32>
    %171 = math.rsqrt %170 : vector<1x8xf32>
    %172 = arith.mulf %171, %13 : vector<1x8xf32>
    %173 = arith.mulf %161, %172 : vector<1x8xf32>
    %174 = arith.subf %12, %173 : vector<1x8xf32>
    %175 = vector.broadcast %172 : vector<1x8xf32> to vector<256x8xf32>
    %176 = arith.mulf %157, %175 : vector<256x8xf32>
    %177 = vector.broadcast %174 : vector<1x8xf32> to vector<256x8xf32>
    %178 = arith.addf %176, %177 : vector<256x8xf32>
    %c0_156 = arith.constant 0 : index
    %c0_157 = arith.constant 0 : index
    %c0_158 = arith.constant 0 : index
    %179 = vector.load %arg5[%c0_156, %c0_157, %c0_158] : memref<1x256x8xf32, #tpu.memory_space<vmem>>, vector<1x256x8xf32>
    %180 = vector.shape_cast %179 : vector<1x256x8xf32> to vector<256x8xf32>
    %181 = vector.shape_cast %178 : vector<256x8xf32> to vector<1x256x8xf32>
    tpu.vector_store %arg5[%c0_156, %c0_157, %c0_158], %181 {strides = array<i32>} : memref<1x256x8xf32, #tpu.memory_space<vmem>>, vector<1x256x8xf32>,
    return
  }
  func.func @transform_0(%arg0: i32) -> (i32, i32, i32) {
    %c0_i32 = arith.constant 0 : i32
    %c0_i32_0 = arith.constant 0 : i32
    %c0_i32_1 = arith.constant 0 : i32
    return %arg0, %c0_i32, %c0_i32_0 : i32, i32, i32
  }
  func.func @transform_1(%arg0: i32) -> (i32, i32, i32, i32) {
    %c0_i32 = arith.constant 0 : i32
    %c0_i32_0 = arith.constant 0 : i32
    %c0_i32_1 = arith.constant 0 : i32
    %c0_i32_2 = arith.constant 0 : i32
    return %arg0, %c0_i32, %c0_i32_0, %c0_i32_1 : i32, i32, i32, i32
  }
  func.func @transform_2(%arg0: i32) -> (i32, i32, i32) {
    %c0_i32 = arith.constant 0 : i32
    %c0_i32_0 = arith.constant 0 : i32
    %c0_i32_1 = arith.constant 0 : i32
    %c0_i32_2 = arith.constant 0 : i32
    return %c0_i32, %c0_i32_0, %c0_i32_1 : i32, i32, i32
  }
  func.func @transform_3(%arg0: i32) -> (i32, i32, i32) {
    %c0_i32 = arith.constant 0 : i32
    %c0_i32_0 = arith.constant 0 : i32
    %c0_i32_1 = arith.constant 0 : i32
    %c0_i32_2 = arith.constant 0 : i32
    return %c0_i32, %c0_i32_0, %c0_i32_1 : i32, i32, i32
  }
  func.func @transform_4(%arg0: i32) -> (i32, i32, i32) {
    %c0_i32 = arith.constant 0 : i32
    %c0_i32_0 = arith.constant 0 : i32
    %c0_i32_1 = arith.constant 0 : i32
    return %arg0, %c0_i32, %c0_i32_0 : i32, i32, i32
  }
}

</mosaic_0001>

<bundles_post_ra>
// kernel: tpu_custom_call.1
= control target key start
LH: loop header
LB: loop body
LE: loop exit
PB: predicated region body
PF: predicated region fallthrough
CT: control target
= control target key end

     0   :  { %s11040_s15 = smov 0   ;;  %s14676_s0 = inlined_call_operand.vmem [shape: f32[2,1,24], index: 0, kind: input, shape index: {}]   ;;  %s14677_s1 = inlined_call_operand.vmem [shape: f32[2,8,8,4], index: 1, kind: input, shape index: {}]   ;;  %s14678_s2 = inlined_call_operand.vmem [shape: f32[9,4,4], index: 2, kind: input, shape index: {}]   ;;  %s14679_s3 = inlined_call_operand.vmem [shape: f32[9,4,8], index: 3, kind: input, shape index: {}]   ;;  %s14680_s4 = inlined_call_operand.vmem [shape: f32[2,256,8], index: 4, kind: output, shape index: {}]  }
   0x1 LB: > { %s8863_s16 = sadd.s32 4294967295, %s11006_s15   ;;  %p8867_p0 = scmp.ge.s32.totalorder %s11006_s15, 1  ;;  %s11006_s15 = sphi %s11040_s15, %s14_s15  }
   0x2   : > { %p170_p1 = scmp.lt.s32.totalorder %s11006_s15, 3 }
   0x4   : > { %p171_p2 = pnand %p8867_p0, %p170_p1 }
   0x6   : > { %174 = sbr.rel (%p171_p2) target bundleno = 1589 (0x635), region = 36 }
   0xb   : > { %v8872_v0 = vld [vmem:[%s14678_s2 + $0x4] sm:$0xf]  ;;  %vm1407_vm0 = vcmask 1043456   ;;  %v1276_v1 = vld [vmem:[%s14678_s2] sm:$0xf]  ;;  %vm212_vm1 = vcmask 31744   ;;  %v279_v2 = vlaneseq }
   0xc   : > { %10080 = vmatprep.subr.msk.mxu0 %vm1407_vm0, %v8872_v0  ;;  %10130 = vmatprep.subr.msk.mxu1 %vm1407_vm0, %v1276_v1  ;;  %vm220_vm2 = vcmask 24576   ;;  %v11059_v3 = vld [vmem:[%s14678_s2 + $0x8] sm:$0xf]  ;;  %p11063_p3 = scmp.lt.s32.totalorder %s8863_s16, 1  ;;  %vm239_vm3 = vcmask 30720   ;;  %v11008_v4 = vmov 0.0  }
   0xd   : > { %10081 = vmatpush3.msk.msra.mxu0 %vm1407_vm0, %v8872_v0  ;;  %213 = vst.msk [vmem:[#allocation2] sm:$0xff] %vm212_vm1, %v11008_v4  ;;  %214 = vst.msk [vmem:[#allocation2 + $0x8] sm:$0xff] %vm212_vm1, %v11008_v4  ;;  %10131 = vmatpush3.msk.msra.mxu1 %vm1407_vm0, %v1276_v1  ;;  %v11009_v5 = vmov 1966171168   ;;  %v280_v7 = vshrl.u32 %v279_v2, 7  ;;  %s11011_s19 = smov 124  }
   0xe   : > { %215 = vst.msk [vmem:[#allocation2 + $0x10] sm:$0xff] %vm212_vm1, %v11008_v4  ;;  %217 = vst.msk [vmem:[#allocation2 + $0x198] sm:$0xff] %vm212_vm1, %v11008_v4  ;;  %10180 = vmatprep.subr.msk.mxu0 %vm1407_vm0, %v11059_v3  ;;  %s14996_s16 = smov (!%p11063_p3, %s8863_s16), 1  ;;  %v277_v6 = vunpack.c.l.s4 %v11009_v5  ;;  %v11010_v8 = vmov 1983009808   ;;  %s11012_s12 = smov 112  }
   0xf   : > { %218 = vst.msk [vmem:[#allocation2 + $0x1a0] sm:$0xff] %vm212_vm1, %v11008_v4  ;;  %219 = vst.msk [vmem:[#allocation2 + $0x1a8] sm:$0xff] %vm212_vm1, %v11008_v4  ;;  %v926_v9 = vunpack.c.l.s4 %v11010_v8  ;;  %v8973_v10 = vld [vmem:[%s14678_s2 + $0xc] sm:$0xf]  ;;  %s9484_s26 = sshll.u32 %s14996_s16, 6  ;;  %v11132_v15 = vsub.s32 0, %v280_v7  ;;  %s12453_s18 = scalar_lea.vmem %s14676_s0, %s14996_s16 }
  0x10   : > { %222 = vst.msk [vmem:[#allocation2 + $0x18] sm:$0x1] %vm220_vm2, %v11008_v4  ;;  %223 = vst.msk [vmem:[#allocation2 + $0x30] sm:$0x1] %vm220_vm2, %v11008_v4  ;;  %10230 = vmatprep.subr.msk.mxu1 %vm1407_vm0, %v8973_v10  ;;  %v278_v11 = vunpack.c.0.s8 %v277_v6  ;;  %s11127_s29 = scalar_lea.vmem %s14677_s1, %s9484_s26  ;;  %v11164_v38 = vld [vmem:[%s14678_s2 + $0x10] sm:$0xf] }
  0x11   : > { %224 = vst.msk [vmem:[#allocation2 + $0x48] sm:$0x1] %vm220_vm2, %v11008_v4  ;;  %225 = vst.msk [vmem:[#allocation2 + $0x60] sm:$0x1] %vm220_vm2, %v11008_v4  ;;  %v927_v12 = vunpack.c.0.s8 %v926_v9  ;;  %v259_v13 = vld [vmem:[%s11127_s29] sm:$0xff]  ;;  %v260_v16 = vld [vmem:[%s11127_s29 + $0x8] sm:$0xff] }
  0x12   : > { %226 = vst.msk [vmem:[#allocation2 + $0x78] sm:$0x1] %vm220_vm2, %v11008_v4  ;;  %227 = vst.msk [vmem:[#allocation2 + $0x90] sm:$0x1] %vm220_vm2, %v11008_v4  ;;  %v11130_v14 = vsub.s32 %v278_v11, %v280_v7  ;;  %v261_v17 = vld [vmem:[%s11127_s29 + $0x10] sm:$0xff]  ;;  %v275_v19 = vcombine.high %v259_v13, %v259_v13  ;;  %v324_v20 = vcombine.high %v260_v16, %v260_v16  ;;  %v11139_v22 = vld [vmem:[%s11127_s29 + $0x18] sm:$0xff] }
  0x13   : > { %228 = vst.msk [vmem:[#allocation2 + $0xa8] sm:$0x1] %vm220_vm2, %v11008_v4  ;;  %229 = vst.msk [vmem:[#allocation2 + $0xc0] sm:$0x1] %vm220_vm2, %v11008_v4  ;;  %v11136_v18 = vsub.s32 %v927_v12, %v280_v7  ;;  %v373_v21 = vcombine.high %v261_v17, %v261_v17  ;;  %v422_v34 = vcombine.high %v11139_v22, %v11139_v22  ;;  %vm8460_vm4 = vcmask 64512   ;;  %s11013_s13 = smov 8  }
  0x14   : > { %230 = vst.msk [vmem:[#allocation2 + $0xd8] sm:$0x1] %vm220_vm2, %v11008_v4  ;;  %231 = vst.msk [vmem:[#allocation2 + $0xf0] sm:$0x1] %vm220_vm2, %v11008_v4  ;;  %v1277_v23 = vld [vmem:[#allocation2 + $0x1] sm:$0xff]  ;;  %v282_v26 = vrot.slane %v259_v13, %v11130_v14  ;;  %v331_v27 = vrot.slane %v260_v16, %v11130_v14  ;;  %v11144_v28 = vrot.slane %v261_v17, %v11130_v14  ;;  %s11014_s14 = smov 120  }
  0x15   : > { %232 = vst.msk [vmem:[#allocation2 + $0x108] sm:$0x1] %vm220_vm2, %v11008_v4  ;;  %233 = vst.msk [vmem:[#allocation2 + $0x120] sm:$0x1] %vm220_vm2, %v11008_v4  ;;  %v1278_v24 = vld [vmem:[#allocation2 + $0x9] sm:$0xff]  ;;  %v11148_v29 = vrot.slane %v11139_v22, %v11130_v14  ;;  %10082 = vmatprep.mubr.msk.f32.mxu0 %vm212_vm1, %v1277_v23  ;;  %v289_v31 = vrot.slane %v275_v19, %v11130_v14  ;;  %v338_v32 = vrot.slane %v324_v20, %v11130_v14  ;;  %s9485_s17 = sshll.u32 %s14996_s16, 8 }
  0x16   : > { %234 = vst.msk [vmem:[#allocation2 + $0x138] sm:$0x1] %vm220_vm2, %v11008_v4  ;;  %235 = vst.msk [vmem:[#allocation2 + $0x150] sm:$0x1] %vm220_vm2, %v11008_v4  ;;  %v1245_v25 = vld [vmem:[#allocation2 + $0x8] sm:$0xff]  ;;  %v11154_v33 = vrot.slane %v373_v21, %v11130_v14  ;;  %10083 = vmatmul.mubr.msk.f32.vlgmr.msra.gmra.mxu0 %vm212_vm1, %v1278_v24  ;;  %v290_v35 = vcombine.high %v282_v26, %v282_v26  ;;  %v298_v36 = vrot.slane %v282_v26, %v11130_v14 }
  0x17   : > { %236 = vst.msk [vmem:[#allocation2 + $0x168] sm:$0x1] %vm220_vm2, %v11008_v4  ;;  %237 = vst.msk [vmem:[#allocation2 + $0x180] sm:$0x1] %vm220_vm2, %v11008_v4  ;;  %v339_v37 = vcombine.high %v331_v27, %v331_v27  ;;  %10181 = vmatpush3.msk.msra.mxu0 %vm1407_vm0, %v11059_v3  ;;  %v291_v39 = vcombine.high %v289_v31, %v289_v31  ;;  %v305_v40 = vrot.slane %v289_v31, %v11130_v14 }
  0x18   : > { %241 = vst.msk [vmem:[#allocation2 + $0x29] sm:$0x7f] %vm239_vm3, %v11008_v4  ;;  %242 = vst.msk [vmem:[#allocation2 + $0x41] sm:$0x7f] %vm239_vm3, %v11008_v4  ;;  %v347_v41 = vrot.slane %v331_v27, %v11130_v14  ;;  %v312_v42 = vrot.slane %v290_v35, %v11130_v14  ;;  %v320_v43 = vcombine.high %v298_v36, %v298_v36  ;;  %10280 = vmatprep.subr.msk.mxu0 %vm1407_vm0, %v11164_v38 }
  0x19   : > { %243 = vst.msk [vmem:[#allocation2 + $0x59] sm:$0x7f] %vm239_vm3, %v11008_v4  ;;  %244 = vst.msk [vmem:[#allocation2 + $0x71] sm:$0x7f] %vm239_vm3, %v11008_v4  ;;  %v670_v44 = vrot.slane %v298_v36, %v11132_v15  ;;  %v361_v45 = vrot.slane %v339_v37, %v11130_v14  ;;  %v319_v46 = vrot.slane %v291_v39, %v11130_v14 }
  0x1a   : > { %245 = vst.msk [vmem:[#allocation2 + $0x89] sm:$0x7f] %vm239_vm3, %v11008_v4  ;;  %246 = vst.msk [vmem:[#allocation2 + $0xa1] sm:$0x7f] %vm239_vm3, %v11008_v4  ;;  %v321_v47 = vcombine.high %v305_v40, %v305_v40  ;;  %v686_v48 = vrot.slane %v305_v40, %v11132_v15  ;;  %v369_v49 = vcombine.high %v347_v41, %v347_v41 }
  0x1b   : > { %247 = vst.msk [vmem:[#allocation2 + $0xb9] sm:$0x7f] %vm239_vm3, %v11008_v4  ;;  %248 = vst.msk [vmem:[#allocation2 + $0xd1] sm:$0x7f] %vm239_vm3, %v11008_v4  ;;  %v322_v50 = vcombine.high %v312_v42, %v312_v42  ;;  %v674_v51 = vrot.slane %v312_v42, %v11132_v15  ;;  %v678_v52 = vrot.slane %v320_v43, %v11132_v15 }
  0x1c   : > { %249 = vst.msk [vmem:[#allocation2 + $0xe9] sm:$0x7f] %vm239_vm3, %v11008_v4  ;;  %250 = vst.msk [vmem:[#allocation2 + $0x101] sm:$0x7f] %vm239_vm3, %v11008_v4  ;;  %v371_v53 = vcombine.high %v361_v45, %v361_v45  ;;  %v323_v54 = vcombine.high %v319_v46, %v319_v46  ;;  %v690_v55 = vrot.slane %v319_v46, %v11132_v15 }
  0x1d   : > { %251 = vst.msk [vmem:[#allocation2 + $0x119] sm:$0x7f] %vm239_vm3, %v11008_v4  ;;  %252 = vst.msk [vmem:[#allocation2 + $0x131] sm:$0x7f] %vm239_vm3, %v11008_v4  ;;  %v694_v56 = vrot.slane %v321_v47, %v11132_v15  ;;  %v702_v57 = vrot.slane %v347_v41, %v11132_v15  ;;  %v682_v58 = vrot.slane %v322_v50, %v11132_v15 }
  0x1e   : > { %253 = vst.msk [vmem:[#allocation2 + $0x149] sm:$0x7f] %vm239_vm3, %v11008_v4  ;;  %254 = vst.msk [vmem:[#allocation2 + $0x161] sm:$0x7f] %vm239_vm3, %v11008_v4  ;;  %v923_v59 = vcombine.low %v670_v44, %v674_v51  ;;  %v706_v60 = vrot.slane %v361_v45, %v11132_v15  ;;  %v710_v61 = vrot.slane %v369_v49, %v11132_v15 }
  0x1f   : > { %255 = vst.msk [vmem:[#allocation2 + $0x179] sm:$0x7f] %vm239_vm3, %v11008_v4  ;;  %256 = vst.msk [vmem:[#allocation2 + $0x191] sm:$0x7f] %vm239_vm3, %v11008_v4  ;;  %v698_v62 = vrot.slane %v323_v54, %v11132_v15  ;;  %v940_v63 = vcombine.low %v686_v48, %v690_v55  ;;  %v714_v0 = vrot.slane %v371_v53, %v11132_v15 }
  0x20   : > { %221 = vst.msk [vmem:[#allocation2] sm:$0x1] %vm220_vm2, %v11008_v4  ;;  %238 = vst.msk [vmem:[#allocation2 + $0x198] sm:$0x1] %vm220_vm2, %v11008_v4  ;;  %v340_v1 = vcombine.high %v338_v32, %v338_v32  ;;  %v924_v2 = vcombine.low %v678_v52, %v682_v58  ;;  %v931_v3 = vrot.slane %v923_v59, %v11136_v18 }
  0x21   : > { %240 = vst.msk [vmem:[#allocation2 + $0x11] sm:$0x7f] %vm239_vm3, %v11008_v4  ;;  %257 = vst.msk [vmem:[#allocation2 + $0x1a9] sm:$0x7f] %vm239_vm3, %v11008_v4  ;;  %v957_v4 = vcombine.low %v702_v57, %v706_v60  ;;  %v354_v5 = vrot.slane %v338_v32, %v11130_v14  ;;  %v941_v6 = vcombine.low %v694_v56, %v698_v62 }
  0x22   : > { %14725 = vst [vmem:[#allocation3_spill] sm:$0xff] %v11130_v14  ;;  %14726 = vst [vmem:[#allocation4_spill] sm:$0xff] %v11132_v15  ;;  %v948_v7 = vrot.slane %v940_v63, %v11136_v18  ;;  %v958_v8 = vcombine.low %v710_v61, %v714_v0  ;;  %v368_v9 = vrot.slane %v340_v1, %v11130_v14  ;;  %v11234_v61 = vld [vmem:[%s11127_s29 + $0x20] sm:$0xff] }
  0x23   : > { %v965_v11 = vrot.slane %v957_v4, %v11136_v18  ;;  %v370_v12 = vcombine.high %v354_v5, %v354_v5  ;;  %v718_v13 = vrot.slane %v354_v5, %v11132_v15  ;;  %v955_v16 = vrot.slane %v941_v6, %v11136_v18 }
  0x24   : > { %v972_v17 = vrot.slane %v958_v8, %v11136_v18  ;;  %v372_v19 = vcombine.high %v368_v9, %v368_v9  ;;  %v722_v20 = vrot.slane %v368_v9, %v11132_v15  ;;  %v388_v24 = vcombine.high %v11144_v28, %v11144_v28 }
  0x25   : > { %v726_v23 = vrot.slane %v370_v12, %v11132_v15  ;;  %v956_v26 = vcombine.low %v948_v7, %v955_v16  ;;  %v389_v37 = vcombine.high %v11154_v33, %v11154_v33  ;;  %v403_v40 = vrot.slane %v11154_v33, %v11130_v14 }
  0x26   : > { %v973_v27 = vcombine.low %v965_v11, %v972_v17  ;;  %v974_v31 = vcombine.low %v718_v13, %v722_v20  ;;  %v410_v32 = vrot.slane %v388_v24, %v11130_v14  ;;  %v437_v41 = vcombine.high %v11148_v29, %v11148_v29 }
  0x27   : > { %v1244_v30 = vld [vmem:[#allocation2] sm:$0xff]  ;;  %1213 = vst.msk [vmem:[#allocation2 + $0x21] sm:$0xff] %vm212_vm1, %v956_v26  ;;  %1215 = vst.msk [vmem:[#allocation2 + $0x39] sm:$0xff] %vm212_vm1, %v956_v26  ;;  %v417_v45 = vrot.slane %v389_v37, %v11130_v14  ;;  %v419_v47 = vcombine.high %v403_v40, %v403_v40  ;;  %v750_v48 = vrot.slane %v403_v40, %v11132_v15 }
  0x28   : > { %10132 = vmatprep.mubr.msk.f32.mxu1 %vm212_vm1, %v1244_v30  ;;  %v730_v30 = vrot.slane %v372_v19, %v11132_v15  ;;  %1216 = vst.msk [vmem:[#allocation2 + $0x49] sm:$0xff] %vm212_vm1, %v973_v27  ;;  %1218 = vst.msk [vmem:[#allocation2 + $0x61] sm:$0xff] %vm212_vm1, %v973_v27  ;;  %v982_v39 = vrot.slane %v974_v31, %v11136_v18  ;;  %v420_v42 = vcombine.high %v410_v32, %v410_v32 }
  0x29   : > { %10133 = vmatmul.mubr.msk.f32.vlgmr.msra.gmra.mxu1 %vm212_vm1, %v1245_v25  ;;  %v396_v25 = vrot.slane %v11144_v28, %v11130_v14  ;;  %v738_v43 = vrot.slane %v410_v32, %v11132_v15  ;;  %v445_v49 = vrot.slane %v11148_v29, %v11130_v14  ;;  %v421_v51 = vcombine.high %v417_v45, %v417_v45  ;;  %v11239_v29 = vld [vmem:[%s14678_s2 + $0x14] sm:$0xf] }
  0x2a   : > { %10231 = vmatpush3.msk.msra.mxu1 %vm1407_vm0, %v8973_v10  ;;  %v938_v10 = vrot.slane %v924_v2, %v11136_v18  ;;  %v975_v28 = vcombine.low %v726_v23, %v730_v30  ;;  %v746_v33 = vrot.slane %v420_v42, %v11132_v15  ;;  %v754_v52 = vrot.slane %v417_v45, %v11132_v15 }
  0x2b   : > { %v418_v35 = vcombine.high %v396_v25, %v396_v25  ;;  %v734_v36 = vrot.slane %v396_v25, %v11132_v15  ;;  %v758_v54 = vrot.slane %v419_v47, %v11132_v15  ;;  %v459_v55 = vrot.slane %v437_v41, %v11130_v14  ;;  %10330 = vmatprep.subr.msk.mxu1 %vm1407_vm0, %v11239_v29 }
  0x2c   : > { %v939_v21 = vcombine.low %v931_v3, %v938_v10  ;;  %v989_v46 = vrot.slane %v975_v28, %v11136_v18  ;;  %v467_v56 = vcombine.high %v445_v49, %v445_v49  ;;  %v762_v59 = vrot.slane %v421_v51, %v11132_v15 }
  0x2d   : > { %v742_v44 = vrot.slane %v418_v35, %v11132_v15  ;;  %v991_v50 = vcombine.low %v734_v36, %v738_v43  ;;  %v1008_v60 = vcombine.low %v750_v48, %v754_v52  ;;  %v469_v1 = vcombine.high %v459_v55, %v459_v55 }
  0x2e   : > { %1212 = vst.msk [vmem:[#allocation2 + $0x19] sm:$0xff] %vm212_vm1, %v939_v21  ;;  %1214 = vst.msk [vmem:[#allocation2 + $0x31] sm:$0xff] %vm212_vm1, %v939_v21  ;;  %v990_v53 = vcombine.low %v982_v39, %v989_v46  ;;  %v766_v2 = vrot.slane %v445_v49, %v11132_v15  ;;  %v770_v3 = vrot.slane %v459_v55, %v11132_v15  ;;  %v1280_v5 = vld [vmem:[#allocation2 + $0x21] sm:$0xff]  ;;  %v1282_v16 = vld [vmem:[#allocation2 + $0x39] sm:$0xff] }
  0x2f   : > { %v992_v57 = vcombine.low %v742_v44, %v746_v33  ;;  %v999_v58 = vrot.slane %v991_v50, %v11136_v18  ;;  %v774_v4 = vrot.slane %v467_v56, %v11132_v15  ;;  %v1009_v9 = vcombine.low %v758_v54, %v762_v59  ;;  %v1283_v23 = vld [vmem:[#allocation2 + $0x49] sm:$0xff]  ;;  %v11300_v43 = vld [vmem:[#allocation2 + $0x61] sm:$0xff] }
  0x30   : > { %1217 = vst.msk [vmem:[#allocation2 + $0x51] sm:$0xff] %vm212_vm1, %v990_v53  ;;  %1219 = vst.msk [vmem:[#allocation2 + $0x69] sm:$0xff] %vm212_vm1, %v990_v53  ;;  %v1016_v10 = vrot.slane %v1008_v60, %v11136_v18  ;;  %v778_v11 = vrot.slane %v469_v1, %v11132_v15  ;;  %v1025_v12 = vcombine.low %v766_v2, %v770_v3  ;;  %v11275_v24 = vld [vmem:[#allocation2 + $0x48] sm:$0xff]  ;;  %v11302_v44 = vld [vmem:[#allocation2 + $0x60] sm:$0xff] }
  0x31   : > { %v1006_v8 = vrot.slane %v992_v57, %v11136_v18  ;;  %v436_v13 = vrot.slane %v422_v34, %v11130_v14  ;;  %v1023_v20 = vrot.slane %v1009_v9, %v11136_v18  ;;  %v478_v21 = vrot.slane %v11234_v61, %v11130_v14  ;;  %v11307_v49 = vld [vmem:[%s11127_s29 + $0x28] sm:$0xff] }
  0x32   : > { %v1026_v25 = vcombine.low %v774_v4, %v778_v11  ;;  %v1033_v22 = vrot.slane %v1025_v12, %v11136_v18  ;;  %v471_v32 = vcombine.high %v11234_v61, %v11234_v61  ;;  %v527_v60 = vrot.slane %v11307_v49, %v11130_v14 }
  0x33   : > { %v1007_v19 = vcombine.low %v999_v58, %v1006_v8  ;;  %v438_v34 = vcombine.high %v436_v13, %v436_v13  ;;  %v452_v26 = vrot.slane %v436_v13, %v11130_v14  ;;  %v1024_v27 = vcombine.low %v1016_v10, %v1023_v20 }
  0x34   : > { %v486_v30 = vcombine.high %v478_v21, %v478_v21  ;;  %v494_v31 = vrot.slane %v478_v21, %v11130_v14  ;;  %v1040_v35 = vrot.slane %v1026_v25, %v11136_v18  ;;  %v485_v55 = vrot.slane %v471_v32, %v11130_v14 }
  0x35   : > { %v1279_v62 = vld [vmem:[#allocation2 + $0x19] sm:$0xff]  ;;  %v1281_v0 = vld [vmem:[#allocation2 + $0x31] sm:$0xff]  ;;  %1220 = vst.msk [vmem:[#allocation2 + $0x79] sm:$0xff] %vm212_vm1, %v1007_v19  ;;  %1222 = vst.msk [vmem:[#allocation2 + $0x91] sm:$0xff] %vm212_vm1, %v1007_v19  ;;  %v466_v36 = vrot.slane %v438_v34, %v11130_v14  ;;  %v468_v37 = vcombine.high %v452_v26, %v452_v26  ;;  %v782_v40 = vrot.slane %v452_v26, %v11132_v15 }
  0x36   : > { %v11241_v63 = vld [vmem:[#allocation2 + $0x18] sm:$0xff]  ;;  %10085 = vmatprep.mubr.msk.f32.mxu0 %vm212_vm1, %v1279_v62  ;;  %v11253_v6 = vld [vmem:[#allocation2 + $0x20] sm:$0xff]  ;;  %v11255_v7 = vld [vmem:[#allocation2 + $0x30] sm:$0xff]  ;;  %1221 = vst.msk [vmem:[#allocation2 + $0x81] sm:$0xff] %vm212_vm1, %v1024_v27  ;;  %v508_v41 = vrot.slane %v486_v30, %v11130_v14  ;;  %v516_v42 = vcombine.high %v494_v31, %v494_v31  ;;  %v1041_v45 = vcombine.low %v1033_v22, %v1040_v35 }
  0x37   : > { %10135 = vmatprep.mubr.msk.f32.mxu1 %vm212_vm1, %v11241_v63  ;;  %10086 = vmatmul.mubr.msk.f32.gmra.mxu0 %vm212_vm1, %v1280_v5  ;;  %v11270_v17 = vld [vmem:[#allocation2 + $0x38] sm:$0xff]  ;;  %v11294_v39 = vld [vmem:[#allocation2 + $0x50] sm:$0xff]  ;;  %1223 = vst.msk [vmem:[#allocation2 + $0x99] sm:$0xff] %vm212_vm1, %v1024_v27  ;;  %v470_v46 = vcombine.high %v466_v36, %v466_v36  ;;  %v786_v47 = vrot.slane %v466_v36, %v11132_v15  ;;  %v11326_v57 = vld [vmem:[#allocation2 + $0x68] sm:$0xff] }
  0x38   : > { %10136 = vmatmul.mubr.msk.f32.gmra.mxu1 %vm212_vm1, %v11253_v6  ;;  %10088 = vmatprep.mubr.msk.f32.mxu0 %vm212_vm1, %v1281_v0  ;;  %v11292_v28 = vld [vmem:[#allocation2 + $0x51] sm:$0xff]  ;;  %v790_v48 = vrot.slane %v468_v37, %v11132_v15  ;;  %v518_v33 = vcombine.high %v508_v41, %v508_v41  ;;  %v798_v50 = vrot.slane %v494_v31, %v11132_v15  ;;  %v11324_v56 = vld [vmem:[#allocation2 + $0x69] sm:$0xff] }
  0x39   : > { %10138 = vmatprep.mubr.msk.f32.mxu1 %vm212_vm1, %v11255_v7  ;;  %v802_v51 = vrot.slane %v508_v41, %v11132_v15  ;;  %v806_v52 = vrot.slane %v516_v42, %v11132_v15  ;;  %1224 = vst.msk [vmem:[#allocation2 + $0xa9] sm:$0xff] %vm212_vm1, %v1041_v45  ;;  %1226 = vst.msk [vmem:[#allocation2 + $0xc1] sm:$0xff] %vm212_vm1, %v1041_v45  ;;  %v794_v53 = vrot.slane %v470_v46, %v11132_v15  ;;  %v265_v36 = vld [vmem:[%s11127_s29 + $0x30] sm:$0xff]  ;;  %v11373_v42 = vld [vmem:[%s11127_s29 + $0x38] sm:$0xff] }
  0x3a   : > { %v1042_v54 = vcombine.low %v782_v40, %v786_v47  ;;  %v810_v58 = vrot.slane %v518_v33, %v11132_v15  ;;  %v487_v2 = vcombine.high %v485_v55, %v485_v55  ;;  %v501_v3 = vrot.slane %v485_v55, %v11130_v14 }
  0x3b   : > { %10089 = vmatmul.mubr.msk.f32.gmra.mxu0 %vm212_vm1, %v1282_v16  ;;  %v1059_v59 = vcombine.low %v798_v50, %v802_v51  ;;  %v1043_v0 = vcombine.low %v790_v48, %v794_v53  ;;  %v535_v8 = vcombine.high %v527_v60, %v527_v60  ;;  %v543_v9 = vrot.slane %v527_v60, %v11130_v14 }
  0x3c   : > { %10139 = vmatmul.mubr.msk.f32.gmra.mxu1 %vm212_vm1, %v11270_v17  ;;  %10091 = vmatprep.mubr.msk.f32.mxu0 %vm212_vm1, %v1283_v23  ;;  %v11331_v61 = vld [vmem:[#allocation2 + $0x79] sm:$0xff]  ;;  %v1050_v1 = vrot.slane %v1042_v54, %v11136_v18  ;;  %v1060_v4 = vcombine.low %v806_v52, %v810_v58  ;;  %v515_v11 = vrot.slane %v487_v2, %v11130_v14  ;;  %v11356_v23 = vld [vmem:[#allocation2 + $0x91] sm:$0xff] }
  0x3d   : > { %10141 = vmatprep.mubr.msk.f32.mxu1 %vm212_vm1, %v11275_v24  ;;  %v11333_v62 = vld [vmem:[#allocation2 + $0x78] sm:$0xff]  ;;  %v1067_v5 = vrot.slane %v1059_v59, %v11136_v18  ;;  %v1057_v10 = vrot.slane %v1043_v0, %v11136_v18  ;;  %v517_v12 = vcombine.high %v501_v3, %v501_v3  ;;  %v11349_v13 = vld [vmem:[#allocation2 + $0x81] sm:$0xff]  ;;  %v814_v20 = vrot.slane %v501_v3, %v11132_v15  ;;  %v11358_v25 = vld [vmem:[#allocation2 + $0x90] sm:$0xff] }
  0x3e   : > { %v11351_v16 = vld [vmem:[#allocation2 + $0x80] sm:$0xff]  ;;  %v1074_v19 = vrot.slane %v1060_v4, %v11136_v18  ;;  %v557_v21 = vrot.slane %v535_v8, %v11130_v14  ;;  %v519_v34 = vcombine.high %v515_v11, %v515_v11  ;;  %v818_v26 = vrot.slane %v515_v11, %v11132_v15  ;;  %v11381_v46 = vld [vmem:[#allocation2 + $0x98] sm:$0xff] }
  0x3f   : > { %10092 = vmatmul.mubr.msk.f32.gmra.mxu0 %vm212_vm1, %v11292_v28  ;;  %v1058_v22 = vcombine.low %v1050_v1, %v1057_v10  ;;  %v822_v27 = vrot.slane %v517_v12, %v11132_v15  ;;  %v565_v31 = vcombine.high %v543_v9, %v543_v9  ;;  %v830_v35 = vrot.slane %v543_v9, %v11132_v15  ;;  %v11379_v45 = vld [vmem:[#allocation2 + $0x99] sm:$0xff] }
  0x40   : > { %10142 = vmatmul.mubr.msk.f32.gmra.mxu1 %vm212_vm1, %v11294_v39  ;;  %10094 = vmatprep.mubr.msk.f32.mxu0 %vm212_vm1, %v11300_v43  ;;  %v1075_v30 = vcombine.low %v1067_v5, %v1074_v19  ;;  %v567_v32 = vcombine.high %v557_v21, %v557_v21  ;;  %v826_v37 = vrot.slane %v519_v34, %v11132_v15  ;;  %v11389_v50 = vld [vmem:[#allocation2 + $0xa9] sm:$0xff]  ;;  %v11412_v8 = vld [vmem:[#allocation2 + $0xc1] sm:$0xff] }
  0x41   : > { %10144 = vmatprep.mubr.msk.f32.mxu1 %vm212_vm1, %v11302_v44  ;;  %1225 = vst.msk [vmem:[#allocation2 + $0xb1] sm:$0xff] %vm212_vm1, %v1058_v22  ;;  %1227 = vst.msk [vmem:[#allocation2 + $0xc9] sm:$0xff] %vm212_vm1, %v1058_v22  ;;  %v1076_v40 = vcombine.low %v814_v20, %v818_v26  ;;  %v834_v41 = vrot.slane %v557_v21, %v11132_v15  ;;  %v838_v47 = vrot.slane %v565_v31, %v11132_v15  ;;  %v11391_v51 = vld [vmem:[#allocation2 + $0xa8] sm:$0xff]  ;;  %v11414_v9 = vld [vmem:[#allocation2 + $0xc0] sm:$0xff] }
  0x42   : > { %1228 = vst.msk [vmem:[#allocation2 + $0xd9] sm:$0xff] %vm212_vm1, %v1075_v30  ;;  %1230 = vst.msk [vmem:[#allocation2 + $0xf1] sm:$0xff] %vm212_vm1, %v1075_v30  ;;  %v842_v48 = vrot.slane %v567_v32, %v11132_v15  ;;  %v520_v33 = vcombine.high %v11307_v49, %v11307_v49  ;;  %v1077_v52 = vcombine.low %v822_v27, %v826_v37 }
  0x43   : > { %10095 = vmatmul.mubr.msk.f32.gmra.mxu0 %vm212_vm1, %v11324_v56  ;;  %v1084_v53 = vrot.slane %v1076_v40, %v11136_v18  ;;  %v1093_v54 = vcombine.low %v830_v35, %v834_v41  ;;  %v576_v55 = vrot.slane %v265_v36, %v11130_v14  ;;  %v569_v60 = vcombine.high %v265_v36, %v265_v36 }
  0x44   : > { %10145 = vmatmul.mubr.msk.f32.gmra.mxu1 %vm212_vm1, %v11326_v57  ;;  %10097 = vmatprep.mubr.msk.f32.mxu0 %vm212_vm1, %v11331_v61  ;;  %v1094_v58 = vcombine.low %v838_v47, %v842_v48  ;;  %v534_v59 = vrot.slane %v520_v33, %v11130_v14  ;;  %v11398_v0 = vrot.slane %v11373_v42, %v11130_v14 }
  0x45   : > { %10147 = vmatprep.mubr.msk.f32.mxu1 %vm212_vm1, %v11333_v62  ;;  %v1091_v49 = vrot.slane %v1077_v52, %v11136_v18  ;;  %v1101_v1 = vrot.slane %v1093_v54, %v11136_v18  ;;  %v584_v2 = vcombine.high %v576_v55, %v576_v55  ;;  %v592_v11 = vrot.slane %v576_v55, %v11130_v14 }
  0x46   : > { %v1108_v3 = vrot.slane %v1094_v58, %v11136_v18  ;;  %v536_v4 = vcombine.high %v534_v59, %v534_v59  ;;  %v550_v5 = vrot.slane %v534_v59, %v11130_v14  ;;  %v583_v19 = vrot.slane %v569_v60, %v11130_v14 }
  0x47   : > { %10098 = vmatmul.mubr.msk.f32.gmra.mxu0 %vm212_vm1, %v11349_v13  ;;  %v1092_v10 = vcombine.low %v1084_v53, %v1091_v49  ;;  %v606_v12 = vrot.slane %v584_v2, %v11130_v14  ;;  %v614_v30 = vcombine.high %v592_v11, %v592_v11  ;;  %v862_v32 = vrot.slane %v592_v11, %v11132_v15 }
  0x48   : > { %10148 = vmatmul.mubr.msk.f32.gmra.mxu1 %vm212_vm1, %v11351_v16  ;;  %10100 = vmatprep.mubr.msk.f32.mxu0 %vm212_vm1, %v11356_v23  ;;  %v11419_v20 = vld [vmem:[#allocation2 + $0xb1] sm:$0xff]  ;;  %v1109_v22 = vcombine.low %v1101_v1, %v1108_v3  ;;  %v564_v34 = vrot.slane %v536_v4, %v11130_v14  ;;  %v566_v26 = vcombine.high %v550_v5, %v550_v5  ;;  %v11436_v35 = vld [vmem:[#allocation2 + $0xc9] sm:$0xff] }
  0x49   : > { %10150 = vmatprep.mubr.msk.f32.mxu1 %vm212_vm1, %v11358_v25  ;;  %v11421_v21 = vld [vmem:[#allocation2 + $0xb0] sm:$0xff]  ;;  %v846_v27 = vrot.slane %v550_v5, %v11132_v15  ;;  %1229 = vst.msk [vmem:[#allocation2 + $0xe1] sm:$0xff] %vm212_vm1, %v1092_v10  ;;  %1231 = vst.msk [vmem:[#allocation2 + $0xf9] sm:$0xff] %vm212_vm1, %v1092_v10  ;;  %v616_v31 = vcombine.high %v606_v12, %v606_v12  ;;  %v11438_v36 = vld [vmem:[#allocation2 + $0xc8] sm:$0xff]  ;;  %v866_v33 = vrot.slane %v606_v12, %v11132_v15 }
  0x4a   : > { %1232 = vst.msk [vmem:[#allocation2 + $0x109] sm:$0xff] %vm212_vm1, %v1109_v22  ;;  %1234 = vst.msk [vmem:[#allocation2 + $0x121] sm:$0xff] %vm212_vm1, %v1109_v22  ;;  %v568_v37 = vcombine.high %v564_v34, %v564_v34  ;;  %v850_v40 = vrot.slane %v564_v34, %v11132_v15  ;;  %v854_v41 = vrot.slane %v566_v26, %v11132_v15  ;;  %v11444_v47 = vld [vmem:[#allocation2 + $0xd9] sm:$0xff]  ;;  %v11465_v10 = vld [vmem:[#allocation2 + $0xf1] sm:$0xff] }
  0x4b   : > { %10101 = vmatmul.mubr.msk.f32.gmra.mxu0 %vm212_vm1, %v11379_v45  ;;  %v11446_v48 = vld [vmem:[#allocation2 + $0xd8] sm:$0xff]  ;;  %v870_v52 = vrot.slane %v614_v30, %v11132_v15  ;;  %v874_v53 = vrot.slane %v616_v31, %v11132_v15  ;;  %v585_v54 = vcombine.high %v583_v19, %v583_v19  ;;  %v599_v59 = vrot.slane %v583_v19, %v11130_v14  ;;  %v11467_v11 = vld [vmem:[#allocation2 + $0xf0] sm:$0xff] }
  0x4c   : > { %10151 = vmatmul.mubr.msk.f32.gmra.mxu1 %vm212_vm1, %v11381_v46  ;;  %10103 = vmatprep.mubr.msk.f32.mxu0 %vm212_vm1, %v11389_v50  ;;  %v858_v55 = vrot.slane %v568_v37, %v11132_v15  ;;  %v1110_v58 = vcombine.low %v846_v27, %v850_v40  ;;  %v633_v60 = vcombine.high %v11398_v0, %v11398_v0 }
  0x4d   : > { %10153 = vmatprep.mubr.msk.f32.mxu1 %vm212_vm1, %v11391_v51  ;;  %v1127_v49 = vcombine.low %v862_v32, %v866_v33  ;;  %v1128_v1 = vcombine.low %v870_v52, %v874_v53  ;;  %v613_v2 = vrot.slane %v585_v54, %v11130_v14  ;;  %v615_v5 = vcombine.high %v599_v59, %v599_v59 }
  0x4e   : > { %v1111_v3 = vcombine.low %v854_v41, %v858_v55  ;;  %v1118_v4 = vrot.slane %v1110_v58, %v11136_v18  ;;  %v878_v34 = vrot.slane %v599_v59, %v11132_v15  ;;  %v641_v37 = vrot.slane %v11398_v0, %v11130_v14 }
  0x4f   : > { %10104 = vmatmul.mubr.msk.f32.gmra.mxu0 %vm212_vm1, %v11419_v20  ;;  %v1135_v12 = vrot.slane %v1127_v49, %v11136_v18  ;;  %v1142_v19 = vrot.slane %v1128_v1, %v11136_v18  ;;  %v617_v22 = vcombine.high %v613_v2, %v613_v2  ;;  %v882_v31 = vrot.slane %v613_v2, %v11132_v15 }
  0x50   : > { %10154 = vmatmul.mubr.msk.f32.gmra.mxu1 %vm212_vm1, %v11421_v21  ;;  %10106 = vmatprep.mubr.msk.f32.mxu0 %vm212_vm1, %v11412_v8  ;;  %v11472_v26 = vld [vmem:[#allocation2 + $0xe1] sm:$0xff]  ;;  %v1125_v30 = vrot.slane %v1111_v3, %v11136_v18  ;;  %v886_v32 = vrot.slane %v615_v5, %v11132_v15  ;;  %v655_v33 = vrot.slane %v633_v60, %v11130_v14  ;;  %v11491_v52 = vld [vmem:[#allocation2 + $0xf9] sm:$0xff] }
  0x51   : > { %10156 = vmatprep.mubr.msk.f32.mxu1 %vm212_vm1, %v11414_v9  ;;  %v11474_v27 = vld [vmem:[#allocation2 + $0xe0] sm:$0xff]  ;;  %v1143_v40 = vcombine.low %v1135_v12, %v1142_v19  ;;  %v890_v41 = vrot.slane %v617_v22, %v11132_v15  ;;  %v11493_v0 = vld [vmem:[#allocation2 + $0xf8] sm:$0xff]  ;;  %v1144_v54 = vcombine.low %v878_v34, %v882_v31  ;;  %v663_v55 = vcombine.high %v641_v37, %v641_v37  ;;  %v11495_v58 = vld [vmem:[#allocation2 + $0x109] sm:$0xff] }
  0x52   : > { %v1126_v53 = vcombine.low %v1118_v4, %v1125_v30  ;;  %v11497_v59 = vld [vmem:[#allocation2 + $0x108] sm:$0xff]  ;;  %v665_v49 = vcombine.high %v655_v33, %v655_v33  ;;  %v894_v1 = vrot.slane %v641_v37, %v11132_v15  ;;  %v898_v2 = vrot.slane %v655_v33, %v11132_v15  ;;  %v11527_v33 = vld [vmem:[#allocation2 + $0x120] sm:$0xff] }
  0x53   : > { %10107 = vmatmul.mubr.msk.f32.gmra.mxu0 %vm212_vm1, %v11436_v35  ;;  %1236 = vst.msk [vmem:[#allocation2 + $0x139] sm:$0xff] %vm212_vm1, %v1143_v40  ;;  %1238 = vst.msk [vmem:[#allocation2 + $0x151] sm:$0xff] %vm212_vm1, %v1143_v40  ;;  %v1145_v60 = vcombine.low %v886_v32, %v890_v41  ;;  %v1152_v3 = vrot.slane %v1144_v54, %v11136_v18  ;;  %v902_v4 = vrot.slane %v663_v55, %v11132_v15  ;;  %v11525_v41 = vld [vmem:[#allocation2 + $0x121] sm:$0xff] }
  0x54   : > { %10157 = vmatmul.mubr.msk.f32.gmra.mxu1 %vm212_vm1, %v11438_v36  ;;  %10109 = vmatprep.mubr.msk.f32.mxu0 %vm212_vm1, %v11444_v47  ;;  %1233 = vst.msk [vmem:[#allocation2 + $0x111] sm:$0xff] %vm212_vm1, %v1126_v53  ;;  %1235 = vst.msk [vmem:[#allocation2 + $0x129] sm:$0xff] %vm212_vm1, %v1126_v53  ;;  %v618_v5 = vcombine.high %v11373_v42, %v11373_v42  ;;  %v906_v19 = vrot.slane %v665_v49, %v11132_v15 }
  0x55   : > { %10159 = vmatprep.mubr.msk.f32.mxu1 %vm212_vm1, %v11446_v48  ;;  %v1159_v12 = vrot.slane %v1145_v60, %v11136_v18  ;;  %v1161_v22 = vcombine.low %v894_v1, %v898_v2 }
  0x56   : > { %v632_v34 = vrot.slane %v618_v5, %v11130_v14  ;;  %v1162_v30 = vcombine.low %v902_v4, %v906_v19 }
  0x57   : > { %10110 = vmatmul.mubr.msk.f32.gmra.mxu0 %vm212_vm1, %v11472_v26  ;;  %v1160_v42 = vcombine.low %v1152_v3, %v1159_v12  ;;  %v1169_v31 = vrot.slane %v1161_v22, %v11136_v18 }
  0x58   : > { %10160 = vmatmul.mubr.msk.f32.gmra.mxu1 %vm212_vm1, %v11474_v27  ;;  %10112 = vmatprep.mubr.msk.f32.mxu0 %vm212_vm1, %v11465_v10  ;;  %v634_v32 = vcombine.high %v632_v34, %v632_v34  ;;  %v648_v37 = vrot.slane %v632_v34, %v11130_v14  ;;  %v1176_v40 = vrot.slane %v1162_v30, %v11136_v18 }
  0x59   : > { %10162 = vmatprep.mubr.msk.f32.mxu1 %vm212_vm1, %v11467_v11  ;;  %1237 = vst.msk [vmem:[#allocation2 + $0x141] sm:$0xff] %vm212_vm1, %v1160_v42  ;;  %1239 = vst.msk [vmem:[#allocation2 + $0x159] sm:$0xff] %vm212_vm1, %v1160_v42 }
  0x5a   : > { %v662_v53 = vrot.slane %v634_v32, %v11130_v14  ;;  %v664_v54 = vcombine.high %v648_v37, %v648_v37  ;;  %v910_v55 = vrot.slane %v648_v37, %v11132_v15  ;;  %v1177_v1 = vcombine.low %v1169_v31, %v1176_v40  ;;  %v11551_v19 = vld [vmem:[#allocation2 + $0x139] sm:$0xff]  ;;  %v11569_v40 = vld [vmem:[#allocation2 + $0x151] sm:$0xff] }
  0x5b   : > { %10113 = vmatmul.mubr.msk.f32.gmra.mxu0 %vm212_vm1, %v11491_v52  ;;  %v11531_v60 = vld [vmem:[#allocation2 + $0x111] sm:$0xff]  ;;  %v11545_v5 = vld [vmem:[#allocation2 + $0x129] sm:$0xff] }
  0x5c   : > { %10163 = vmatmul.mubr.msk.f32.gmra.mxu1 %vm212_vm1, %v11493_v0  ;;  %10115 = vmatprep.mubr.msk.f32.mxu0 %vm212_vm1, %v11495_v58  ;;  %v11533_v49 = vld [vmem:[#allocation2 + $0x110] sm:$0xff]  ;;  %v666_v2 = vcombine.high %v662_v53, %v662_v53  ;;  %v914_v3 = vrot.slane %v662_v53, %v11132_v15  ;;  %v918_v4 = vrot.slane %v664_v54, %v11132_v15  ;;  %v11547_v12 = vld [vmem:[#allocation2 + $0x128] sm:$0xff]  ;;  %v11553_v22 = vld [vmem:[#allocation2 + $0x138] sm:$0xff] }
  0x5d   : > { %10165 = vmatprep.mubr.msk.f32.mxu1 %vm212_vm1, %v11497_v59  ;;  %1240 = vst.msk [vmem:[#allocation2 + $0x169] sm:$0xff] %vm212_vm1, %v1177_v1  ;;  %1242 = vst.msk [vmem:[#allocation2 + $0x181] sm:$0xff] %vm212_vm1, %v1177_v1  ;;  %v11571_v53 = vld [vmem:[#allocation2 + $0x150] sm:$0xff] }
  0x5e   : > { %v922_v34 = vrot.slane %v666_v2, %v11132_v15  ;;  %v1178_v42 = vcombine.low %v910_v55, %v914_v3 }
  0x5f   : > { %10116 = vmatmul.mubr.msk.f32.gmra.mxu0 %vm212_vm1, %v11531_v60 }
  0x60   : > { %10166 = vmatmul.mubr.msk.f32.gmra.mxu1 %vm212_vm1, %v11533_v49  ;;  %10118 = vmatprep.mubr.msk.f32.mxu0 %vm212_vm1, %v11525_v41  ;;  %v1179_v30 = vcombine.low %v918_v4, %v922_v34  ;;  %v1186_v31 = vrot.slane %v1178_v42, %v11136_v18  ;;  %v11565_v32 = vld [vmem:[#allocation2 + $0x141] sm:$0xff]  ;;  %v11582_v1 = vld [vmem:[#allocation2 + $0x159] sm:$0xff] }
  0x61   : > { %10168 = vmatprep.mubr.msk.f32.mxu1 %vm212_vm1, %v11527_v33  ;;  %v11567_v37 = vld [vmem:[#allocation2 + $0x140] sm:$0xff]  ;;  %v11584_v2 = vld [vmem:[#allocation2 + $0x158] sm:$0xff] }
  0x62   : > { %v1193_v54 = vrot.slane %v1179_v30, %v11136_v18  ;;  %14727 = vst [vmem:[#allocation5_spill] sm:$0xff] %v11584_v2  ;;  %v1960_v4 = vld [vmem:[#allocation2 + $0x2] sm:$0xff]  ;;  %v1961_v30 = vld [vmem:[#allocation2 + $0xa] sm:$0xff] }
  0x63   : > { %10119 = vmatmul.mubr.msk.f32.gmra.mxu0 %vm212_vm1, %v11545_v5 }
  0x64   : > { %10169 = vmatmul.mubr.msk.f32.gmra.mxu1 %vm212_vm1, %v11547_v12  ;;  %10121 = vmatprep.mubr.msk.f32.mxu0 %vm212_vm1, %v11551_v19  ;;  %v1194_v55 = vcombine.low %v1186_v31, %v1193_v54  ;;  %v11586_v3 = vld [vmem:[#allocation2 + $0x169] sm:$0xff]  ;;  %v11611_v31 = vld [vmem:[#allocation2 + $0x1a] sm:$0xff] }
  0x65   : > { %10171 = vmatprep.mubr.msk.f32.mxu1 %vm212_vm1, %v11553_v22  ;;  %v11588_v18 = vld [vmem:[#allocation2 + $0x168] sm:$0xff]  ;;  %v11619_v54 = vld [vmem:[%s14678_s2 + $0x18] sm:$0xf] }
  0x66   : > { %14728 = vst [vmem:[#allocation6_spill] sm:$0xff] %v11588_v18  ;;  %1241 = vst.msk [vmem:[#allocation2 + $0x171] sm:$0xff] %vm212_vm1, %v1194_v55 }
  0x67   : > { %10122 = vmatmul.mubr.msk.f32.gmra.mxu0 %vm212_vm1, %v11565_v32  ;;  %1243 = vst.msk [vmem:[#allocation2 + $0x189] sm:$0xff] %vm212_vm1, %v1194_v55  ;;  %v11624_v55 = vld [vmem:[%s14678_s2 + $0x1c] sm:$0xf] }
  0x68   : > { %10172 = vmatmul.mubr.msk.f32.gmra.mxu1 %vm212_vm1, %v11567_v37  ;;  %10124 = vmatprep.mubr.msk.f32.mxu0 %vm212_vm1, %v11569_v40 }
  0x69   : > { %10174 = vmatprep.mubr.msk.f32.mxu1 %vm212_vm1, %v11571_v53 }
  0x6b   : > { %10125 = vmatmul.mubr.msk.f32.gmra.mxu0 %vm212_vm1, %v11582_v1 }
  0x6c   : > { %10175 = vmatmul.mubr.msk.f32.gmra.mxu1 %vm212_vm1, %v11584_v2  ;;  %10127 = vmatprep.mubr.msk.f32.mxu0 %vm212_vm1, %v11586_v3 }
  0x6d   : > { %10177 = vmatprep.mubr.msk.f32.mxu1 %vm212_vm1, %v11588_v18  ;;  %v11600_v34 = vld [vmem:[#allocation2 + $0x171] sm:$0xff] }
  0x6e   : > { %v11602_v42 = vld [vmem:[#allocation2 + $0x170] sm:$0xff]  ;;  %v11810_v15 = vld [vmem:[#allocation2 + $0x188] sm:$0xff] }
  0x6f   : > { %14729 = vst [vmem:[#allocation7_spill] sm:$0xff] %v11602_v42  ;;  %10128 = vmatmul.mubr.msk.f32.gmra.mxu0 %vm212_vm1, %v11600_v34  ;;  %v11806_v14 = vld [vmem:[#allocation2 + $0x172] sm:$0xff] }
  0x70   : > { %10178 = vmatmul.mubr.msk.f32.gmra.mxu1 %vm212_vm1, %v11602_v42  ;;  %10182 = vmatprep.mubr.msk.f32.mxu0 %vm212_vm1, %v1960_v4  ;;  %v11796_v4 = vld [vmem:[#allocation2 + $0x16a] sm:$0xff] }
  0x71   : > { %10232 = vmatprep.mubr.msk.f32.mxu1 %vm212_vm1, %v11241_v63  ;;  %v11630_v63 = vld [vmem:[#allocation2 + $0x22] sm:$0xff] }
  0x73   : > { %10183 = vmatmul.mubr.msk.f32.vlgmr.msra.gmra.mxu0 %vm212_vm1, %v1961_v30  ;;  %v11798_v30 = vld [vmem:[#allocation2 + $0x180] sm:$0xff] }
  0x74   : > { %10233 = vmatmul.mubr.msk.f32.vlgmr.msra.gmra.mxu1 %vm212_vm1, %v11253_v6  ;;  %10281 = vmatpush3.msk.msra.mxu0 %vm1407_vm0, %v11164_v38  ;;  %v11634_v6 = vld [vmem:[#allocation2 + $0x32] sm:$0xff]  ;;  %v11648_v38 = vld [vmem:[#allocation2 + $0x3a] sm:$0xff]  ;;  %14730 = vst [vmem:[#allocation8_spill] sm:$0xff] %v11798_v30 }
  0x75   : > { %10185 = vmatprep.mubr.msk.f32.mxu0 %vm212_vm1, %v11611_v31  ;;  %10235 = vmatprep.mubr.msk.f32.mxu1 %vm212_vm1, %v11255_v7  ;;  %v11660_v7 = vld [vmem:[#allocation2 + $0x52] sm:$0xff] }
  0x76   : > { %10331 = vmatpush3.msk.msra.mxu1 %vm1407_vm0, %v11239_v29  ;;  %10380 = vmatprep.subr.msk.mxu0 %vm1407_vm0, %v11619_v54  ;;  %v11652_v29 = vld [vmem:[#allocation2 + $0x4a] sm:$0xff] }
  0x77   : > { %10430 = vmatprep.subr.msk.mxu1 %vm1407_vm0, %v11624_v55  ;;  %10186 = vmatmul.mubr.msk.f32.gmra.mxu0 %vm212_vm1, %v11630_v63 }
  0x78   : > { %10236 = vmatmul.mubr.msk.f32.gmra.mxu1 %vm212_vm1, %v11270_v17  ;;  %10188 = vmatprep.mubr.msk.f32.mxu0 %vm212_vm1, %v11634_v6  ;;  %v11664_v17 = vld [vmem:[#allocation2 + $0x62] sm:$0xff] }
  0x79   : > { %10238 = vmatprep.mubr.msk.f32.mxu1 %vm212_vm1, %v11275_v24  ;;  %v11672_v24 = vld [vmem:[#allocation2 + $0x6a] sm:$0xff] }
  0x7b   : > { %10189 = vmatmul.mubr.msk.f32.gmra.mxu0 %vm212_vm1, %v11648_v38 }
  0x7c   : > { %10239 = vmatmul.mubr.msk.f32.gmra.mxu1 %vm212_vm1, %v11294_v39  ;;  %10191 = vmatprep.mubr.msk.f32.mxu0 %vm212_vm1, %v11652_v29  ;;  %v11676_v39 = vld [vmem:[#allocation2 + $0x7a] sm:$0xff] }
  0x7d   : > { %10241 = vmatprep.mubr.msk.f32.mxu1 %vm212_vm1, %v11302_v44  ;;  %v11684_v44 = vld [vmem:[#allocation2 + $0x82] sm:$0xff] }
  0x7f   : > { %10192 = vmatmul.mubr.msk.f32.gmra.mxu0 %vm212_vm1, %v11660_v7 }
  0x80   : > { %10242 = vmatmul.mubr.msk.f32.gmra.mxu1 %vm212_vm1, %v11326_v57  ;;  %10194 = vmatprep.mubr.msk.f32.mxu0 %vm212_vm1, %v11664_v17  ;;  %v11688_v57 = vld [vmem:[#allocation2 + $0x92] sm:$0xff] }
  0x81   : > { %10244 = vmatprep.mubr.msk.f32.mxu1 %vm212_vm1, %v11333_v62  ;;  %v11696_v62 = vld [vmem:[#allocation2 + $0x9a] sm:$0xff] }
  0x83   : > { %10195 = vmatmul.mubr.msk.f32.gmra.mxu0 %vm212_vm1, %v11672_v24 }
  0x84   : > { %10245 = vmatmul.mubr.msk.f32.gmra.mxu1 %vm212_vm1, %v11351_v16  ;;  %10197 = vmatprep.mubr.msk.f32.mxu0 %vm212_vm1, %v11676_v39  ;;  %v11700_v16 = vld [vmem:[#allocation2 + $0xaa] sm:$0xff] }
  0x85   : > { %10247 = vmatprep.mubr.msk.f32.mxu1 %vm212_vm1, %v11358_v25  ;;  %v11708_v25 = vld [vmem:[#allocation2 + $0xb2] sm:$0xff] }
  0x87   : > { %10198 = vmatmul.mubr.msk.f32.gmra.mxu0 %vm212_vm1, %v11684_v44 }
  0x88   : > { %10248 = vmatmul.mubr.msk.f32.gmra.mxu1 %vm212_vm1, %v11381_v46  ;;  %10200 = vmatprep.mubr.msk.f32.mxu0 %vm212_vm1, %v11688_v57  ;;  %v11712_v46 = vld [vmem:[#allocation2 + $0xc2] sm:$0xff] }
  0x89   : > { %10250 = vmatprep.mubr.msk.f32.mxu1 %vm212_vm1, %v11391_v51  ;;  %v11720_v51 = vld [vmem:[#allocation2 + $0xca] sm:$0xff] }
  0x8b   : > { %10201 = vmatmul.mubr.msk.f32.gmra.mxu0 %vm212_vm1, %v11696_v62 }
  0x8c   : > { %10251 = vmatmul.mubr.msk.f32.gmra.mxu1 %vm212_vm1, %v11421_v21  ;;  %10203 = vmatprep.mubr.msk.f32.mxu0 %vm212_vm1, %v11700_v16  ;;  %v11724_v21 = vld [vmem:[#allocation2 + $0xda] sm:$0xff] }
  0x8d   : > { %10253 = vmatprep.mubr.msk.f32.mxu1 %vm212_vm1, %v11414_v9  ;;  %v11732_v9 = vld [vmem:[#allocation2 + $0xe2] sm:$0xff] }
  0x8f   : > { %10204 = vmatmul.mubr.msk.f32.gmra.mxu0 %vm212_vm1, %v11708_v25 }
  0x90   : > { %10254 = vmatmul.mubr.msk.f32.gmra.mxu1 %vm212_vm1, %v11438_v36  ;;  %10206 = vmatprep.mubr.msk.f32.mxu0 %vm212_vm1, %v11712_v46  ;;  %v11736_v36 = vld [vmem:[#allocation2 + $0xf2] sm:$0xff] }
  0x91   : > { %10256 = vmatprep.mubr.msk.f32.mxu1 %vm212_vm1, %v11446_v48  ;;  %v11744_v48 = vld [vmem:[#allocation2 + $0xfa] sm:$0xff] }
  0x93   : > { %10207 = vmatmul.mubr.msk.f32.gmra.mxu0 %vm212_vm1, %v11720_v51 }
  0x94   : > { %10257 = vmatmul.mubr.msk.f32.gmra.mxu1 %vm212_vm1, %v11474_v27  ;;  %10209 = vmatprep.mubr.msk.f32.mxu0 %vm212_vm1, %v11724_v21  ;;  %v11748_v27 = vld [vmem:[#allocation2 + $0x10a] sm:$0xff] }
  0x95   : > { %10259 = vmatprep.mubr.msk.f32.mxu1 %vm212_vm1, %v11467_v11  ;;  %v11756_v11 = vld [vmem:[#allocation2 + $0x112] sm:$0xff] }
  0x97   : > { %10210 = vmatmul.mubr.msk.f32.gmra.mxu0 %vm212_vm1, %v11732_v9 }
  0x98   : > { %10260 = vmatmul.mubr.msk.f32.gmra.mxu1 %vm212_vm1, %v11493_v0  ;;  %10212 = vmatprep.mubr.msk.f32.mxu0 %vm212_vm1, %v11736_v36  ;;  %v11760_v0 = vld [vmem:[#allocation2 + $0x122] sm:$0xff] }
  0x99   : > { %10262 = vmatprep.mubr.msk.f32.mxu1 %vm212_vm1, %v11497_v59  ;;  %v11768_v59 = vld [vmem:[#allocation2 + $0x12a] sm:$0xff] }
  0x9b   : > { %10213 = vmatmul.mubr.msk.f32.gmra.mxu0 %vm212_vm1, %v11744_v48 }
  0x9c   : > { %10263 = vmatmul.mubr.msk.f32.gmra.mxu1 %vm212_vm1, %v11533_v49  ;;  %10215 = vmatprep.mubr.msk.f32.mxu0 %vm212_vm1, %v11748_v27  ;;  %v11772_v49 = vld [vmem:[#allocation2 + $0x13a] sm:$0xff] }
  0x9d   : > { %10265 = vmatprep.mubr.msk.f32.mxu1 %vm212_vm1, %v11527_v33  ;;  %v11780_v33 = vld [vmem:[#allocation2 + $0x142] sm:$0xff] }
  0x9f   : > { %10216 = vmatmul.mubr.msk.f32.gmra.mxu0 %vm212_vm1, %v11756_v11 }
  0xa0   : > { %10266 = vmatmul.mubr.msk.f32.gmra.mxu1 %vm212_vm1, %v11547_v12  ;;  %10218 = vmatprep.mubr.msk.f32.mxu0 %vm212_vm1, %v11760_v0  ;;  %v11784_v12 = vld [vmem:[#allocation2 + $0x152] sm:$0xff] }
  0xa1   : > { %10268 = vmatprep.mubr.msk.f32.mxu1 %vm212_vm1, %v11553_v22  ;;  %v11792_v22 = vld [vmem:[#allocation2 + $0x15a] sm:$0xff] }
  0xa3   : > { %10219 = vmatmul.mubr.msk.f32.gmra.mxu0 %vm212_vm1, %v11768_v59 }
  0xa4   : > { %10269 = vmatmul.mubr.msk.f32.gmra.mxu1 %vm212_vm1, %v11567_v37  ;;  %10221 = vmatprep.mubr.msk.f32.mxu0 %vm212_vm1, %v11772_v49 }
  0xa5   : > { %10271 = vmatprep.mubr.msk.f32.mxu1 %vm212_vm1, %v11571_v53 }
  0xa7   : > { %10222 = vmatmul.mubr.msk.f32.gmra.mxu0 %vm212_vm1, %v11780_v33 }
  0xa8   : > { %10272 = vmatmul.mubr.msk.f32.gmra.mxu1 %vm212_vm1, %v11584_v2  ;;  %10224 = vmatprep.mubr.msk.f32.mxu0 %vm212_vm1, %v11784_v12  ;;  %v11819_v2 = vld [vmem:[#allocation2 + $0x31] sm:$0xff] }
  0xa9   : > { %10274 = vmatprep.mubr.msk.f32.mxu1 %vm212_vm1, %v11588_v18  ;;  %v2740_v18 = vld [vmem:[#allocation2 + $0x19] sm:$0xff] }
  0xab   : > { %10225 = vmatmul.mubr.msk.f32.gmra.mxu0 %vm212_vm1, %v11792_v22 }
  0xac   : > { %10275 = vmatmul.mubr.msk.f32.gmra.mxu1 %vm212_vm1, %v11602_v42  ;;  %10227 = vmatprep.mubr.msk.f32.mxu0 %vm212_vm1, %v11796_v4  ;;  %v2741_v42 = vld [vmem:[#allocation2 + $0x21] sm:$0xff] }
  0xad   : > { %10277 = vmatprep.mubr.msk.f32.mxu1 %vm212_vm1, %v11798_v30  ;;  %v11827_v30 = vld [vmem:[%s14678_s2 + $0x20] sm:$0xf] }
  0xaf   : > { %10228 = vmatmul.mubr.msk.f32.gmra.mxu0 %vm212_vm1, %v11806_v14 }
  0xb0   : > { %10278 = vmatmul.mubr.msk.f32.gmra.mxu1 %vm212_vm1, %v11810_v15  ;;  %10282 = vmatprep.mubr.msk.f32.mxu0 %vm212_vm1, %v2740_v18  ;;  %v11833_v18 = vld [vmem:[#allocation2 + $0x39] sm:$0xff] }
  0xb1   : > { %10332 = vmatprep.mubr.msk.f32.mxu1 %vm212_vm1, %v11611_v31 }
  0xb3   : > { %10283 = vmatmul.mubr.msk.f32.vlgmr.msra.gmra.mxu0 %vm212_vm1, %v2741_v42  ;;  %v11837_v42 = vld [vmem:[#allocation2 + $0x49] sm:$0xff] }
  0xb4   : > { %10333 = vmatmul.mubr.msk.f32.vlgmr.msra.gmra.mxu1 %vm212_vm1, %v11630_v63  ;;  %10381 = vmatpush3.msk.msra.mxu0 %vm1407_vm0, %v11619_v54  ;;  %v3526_v54 = vld [vmem:[#allocation2 + $0x68] sm:$0xff] }
  0xb5   : > { %10285 = vmatprep.mubr.msk.f32.mxu0 %vm212_vm1, %v11819_v2  ;;  %10335 = vmatprep.mubr.msk.f32.mxu1 %vm212_vm1, %v11634_v6 }
  0xb6   : > { %10431 = vmatpush3.msk.msra.mxu1 %vm1407_vm0, %v11624_v55  ;;  %10480 = vmatprep.subr.msk.mxu0 %vm1407_vm0, %v11827_v30 }
  0xb7   : > { %10286 = vmatmul.mubr.msk.f32.gmra.mxu0 %vm212_vm1, %v11833_v18 }
  0xb8   : > { %10336 = vmatmul.mubr.msk.f32.gmra.mxu1 %vm212_vm1, %v11648_v38  ;;  %10288 = vmatprep.mubr.msk.f32.mxu0 %vm212_vm1, %v11837_v42 }
  0xb9   : > { %10338 = vmatprep.mubr.msk.f32.mxu1 %vm212_vm1, %v11652_v29 }
  0xbb   : > { %10289 = vmatmul.mubr.msk.f32.gmra.mxu0 %vm212_vm1, %v11292_v28 }
  0xbc   : > { %10339 = vmatmul.mubr.msk.f32.gmra.mxu1 %vm212_vm1, %v11660_v7  ;;  %10291 = vmatprep.mubr.msk.f32.mxu0 %vm212_vm1, %v11300_v43 }
  0xbd   : > { %10341 = vmatprep.mubr.msk.f32.mxu1 %vm212_vm1, %v11664_v17 }
  0xbf   : > { %10292 = vmatmul.mubr.msk.f32.gmra.mxu0 %vm212_vm1, %v11324_v56 }
  0xc0   : > { %10342 = vmatmul.mubr.msk.f32.gmra.mxu1 %vm212_vm1, %v11672_v24  ;;  %10294 = vmatprep.mubr.msk.f32.mxu0 %vm212_vm1, %v11331_v61 }
  0xc1   : > { %10344 = vmatprep.mubr.msk.f32.mxu1 %vm212_vm1, %v11676_v39 }
  0xc3   : > { %10295 = vmatmul.mubr.msk.f32.gmra.mxu0 %vm212_vm1, %v11349_v13 }
  0xc4   : > { %10345 = vmatmul.mubr.msk.f32.gmra.mxu1 %vm212_vm1, %v11684_v44  ;;  %10297 = vmatprep.mubr.msk.f32.mxu0 %vm212_vm1, %v11356_v23 }
  0xc5   : > { %10347 = vmatprep.mubr.msk.f32.mxu1 %vm212_vm1, %v11688_v57 }
  0xc7   : > { %10298 = vmatmul.mubr.msk.f32.gmra.mxu0 %vm212_vm1, %v11379_v45  ;;  %v11951_v45 = vld [vmem:[#allocation2 + $0x181] sm:$0xff] }
  0xc8   : > { %10348 = vmatmul.mubr.msk.f32.gmra.mxu1 %vm212_vm1, %v11696_v62  ;;  %10300 = vmatprep.mubr.msk.f32.mxu0 %vm212_vm1, %v11389_v50  ;;  %v11953_v50 = vld [vmem:[#allocation2 + $0x182] sm:$0xff] }
  0xc9   : > { %10350 = vmatprep.mubr.msk.f32.mxu1 %vm212_vm1, %v11700_v16 }
  0xcb   : > { %10301 = vmatmul.mubr.msk.f32.gmra.mxu0 %vm212_vm1, %v11419_v20  ;;  %v11965_v20 = vld [vmem:[#allocation2 + $0x18a] sm:$0xff] }
  0xcc   : > { %10351 = vmatmul.mubr.msk.f32.gmra.mxu1 %vm212_vm1, %v11708_v25  ;;  %10303 = vmatprep.mubr.msk.f32.mxu0 %vm212_vm1, %v11412_v8  ;;  %v11961_v8 = vld [vmem:[#allocation2 + $0x189] sm:$0xff] }
  0xcd   : > { %10353 = vmatprep.mubr.msk.f32.mxu1 %vm212_vm1, %v11712_v46 }
  0xcf   : > { %10304 = vmatmul.mubr.msk.f32.gmra.mxu0 %vm212_vm1, %v11436_v35  ;;  %v3521_v35 = vld [vmem:[#allocation2 + $0x30] sm:$0xff] }
  0xd0   : > { %10354 = vmatmul.mubr.msk.f32.gmra.mxu1 %vm212_vm1, %v11720_v51  ;;  %10306 = vmatprep.mubr.msk.f32.mxu0 %vm212_vm1, %v11444_v47  ;;  %v3523_v47 = vld [vmem:[#allocation2 + $0x48] sm:$0xff] }
  0xd1   : > { %10356 = vmatprep.mubr.msk.f32.mxu1 %vm212_vm1, %v11724_v21 }
  0xd3   : > { %10307 = vmatmul.mubr.msk.f32.gmra.mxu0 %vm212_vm1, %v11472_v26 }
  0xd4   : > { %10357 = vmatmul.mubr.msk.f32.gmra.mxu1 %vm212_vm1, %v11732_v9  ;;  %10309 = vmatprep.mubr.msk.f32.mxu0 %vm212_vm1, %v11465_v10 }
  0xd5   : > { %10359 = vmatprep.mubr.msk.f32.mxu1 %vm212_vm1, %v11736_v36 }
  0xd6   : > { %v10084_v28 = vpop.f32.mrf.mxu0 }
  0xd7   : > { %10310 = vmatmul.mubr.msk.f32.gmra.mxu0 %vm212_vm1, %v11491_v52 }
  0xd8   : > { %10360 = vmatmul.mubr.msk.f32.gmra.mxu1 %vm212_vm1, %v11744_v48  ;;  %10312 = vmatprep.mubr.msk.f32.mxu0 %vm212_vm1, %v11495_v58  ;;  %v1477_v61 = vpop.f32.mrf.mxu0  ;;  %v3524_v58 = vld [vmem:[#allocation2 + $0x50] sm:$0xff] }
  0xd9   : > { %10362 = vmatprep.mubr.msk.f32.mxu1 %vm212_vm1, %v11748_v27 }
  0xdb   : > { %10313 = vmatmul.mubr.msk.f32.gmra.mxu0 %vm212_vm1, %v11531_v60 }
  0xdc   : > { %10363 = vmatmul.mubr.msk.f32.gmra.mxu1 %vm212_vm1, %v11756_v11  ;;  %10315 = vmatprep.mubr.msk.f32.mxu0 %vm212_vm1, %v11525_v41  ;;  %v3916_v11 = vld [vmem:[#allocation2 + $0x69] sm:$0xff] }
  0xdd   : > { %10365 = vmatprep.mubr.msk.f32.mxu1 %vm212_vm1, %v11760_v0 }
  0xdf   : > { %10316 = vmatmul.mubr.msk.f32.gmra.mxu0 %vm212_vm1, %v11545_v5  ;;  %v3914_v5 = vld [vmem:[#allocation2 + $0x51] sm:$0xff] }
  0xe0   : > { %10366 = vmatmul.mubr.msk.f32.gmra.mxu1 %vm212_vm1, %v11768_v59  ;;  %10318 = vmatprep.mubr.msk.f32.mxu0 %vm212_vm1, %v11551_v19  ;;  %v3527_v59 = vld [vmem:[#allocation2 + $0x78] sm:$0xff] }
  0xe1   : > { %10368 = vmatprep.mubr.msk.f32.mxu1 %vm212_vm1, %v11772_v49  ;;  %v3917_v49 = vld [vmem:[#allocation2 + $0x79] sm:$0xff] }
  0xe3   : > { %10319 = vmatmul.mubr.msk.f32.gmra.mxu0 %vm212_vm1, %v11565_v32  ;;  %v3525_v32 = vld [vmem:[#allocation2 + $0x60] sm:$0xff] }
  0xe4   : > { %10369 = vmatmul.mubr.msk.f32.gmra.mxu1 %vm212_vm1, %v11780_v33  ;;  %10321 = vmatprep.mubr.msk.f32.mxu0 %vm212_vm1, %v11569_v40  ;;  %v3915_v40 = vld [vmem:[#allocation2 + $0x61] sm:$0xff] }
  0xe5   : > { %10371 = vmatprep.mubr.msk.f32.mxu1 %vm212_vm1, %v11784_v12 }
  0xe7   : > { %10322 = vmatmul.mubr.msk.f32.gmra.mxu0 %vm212_vm1, %v11582_v1 }
  0xe8   : > { %10372 = vmatmul.mubr.msk.f32.gmra.mxu1 %vm212_vm1, %v11792_v22  ;;  %10324 = vmatprep.mubr.msk.f32.mxu0 %vm212_vm1, %v11586_v3 }
  0xe9   : > { %v10134_v43 = vpop.f32.mrf.mxu1  ;;  %10374 = vmatprep.mubr.msk.f32.mxu1 %vm212_vm1, %v11796_v4  ;;  %v3528_v4 = vld [vmem:[#allocation2 + $0x80] sm:$0xff] }
  0xea   : > { %v11923_v56 = vadd.f32 %v10134_v43, %v10084_v28  ;;  %v3529_v43 = vld [vmem:[#allocation2 + $0x90] sm:$0xff] }
  0xeb   : > { %v1801_v13 = vpop.f32.mrf.mxu1  ;;  %10325 = vmatmul.mubr.msk.f32.gmra.mxu0 %vm212_vm1, %v11600_v34 }
  0xec   : > { %v11929_v23 = vadd.f32 %v1801_v13, %v1477_v61  ;;  %10375 = vmatmul.mubr.msk.f32.gmra.mxu1 %vm212_vm1, %v11806_v14  ;;  %10327 = vmatprep.mubr.msk.f32.mxu0 %vm212_vm1, %v11951_v45  ;;  %v3522_v14 = vld [vmem:[#allocation2 + $0x38] sm:$0xff] }
  0xed   : > { %10377 = vmatprep.mubr.msk.f32.mxu1 %vm212_vm1, %v11953_v50  ;;  %v3919_v61 = vld [vmem:[#allocation2 + $0x91] sm:$0xff] }
  0xef   : > { %10328 = vmatmul.mubr.msk.f32.gmra.mxu0 %vm212_vm1, %v11961_v8 }
  0xf0   : > { %10378 = vmatmul.mubr.msk.f32.gmra.mxu1 %vm212_vm1, %v11965_v20  ;;  %10382 = vmatprep.mubr.msk.f32.mxu0 %vm212_vm1, %v3521_v35 }
  0xf1   : > { %10432 = vmatprep.mubr.msk.f32.mxu1 %vm212_vm1, %v11819_v2 }
  0xf3   : > { %10383 = vmatmul.mubr.msk.f32.vlgmr.msra.gmra.mxu0 %vm212_vm1, %v3522_v14 }
  0xf4   : > { %10433 = vmatmul.mubr.msk.f32.vlgmr.msra.gmra.mxu1 %vm212_vm1, %v11833_v18  ;;  %10481 = vmatpush3.msk.msra.mxu0 %vm1407_vm0, %v11827_v30 }
  0xf5   : > { %10385 = vmatprep.mubr.msk.f32.mxu0 %vm212_vm1, %v3523_v47  ;;  %10435 = vmatprep.mubr.msk.f32.mxu1 %vm212_vm1, %v11837_v42  ;;  %v3918_v42 = vld [vmem:[#allocation2 + $0x81] sm:$0xff]  ;;  %v3530_v47 = vld [vmem:[#allocation2 + $0x98] sm:$0xff] }
  0xf7   : > { %v10087_v10 = vpop.f32.mrf.mxu0  ;;  %10386 = vmatmul.mubr.msk.f32.gmra.mxu0 %vm212_vm1, %v3524_v58  ;;  %v3920_v58 = vld [vmem:[#allocation2 + $0x99] sm:$0xff] }
  0xf8   : > { %v10137_v26 = vpop.f32.mrf.mxu1  ;;  %10436 = vmatmul.mubr.msk.f32.gmra.mxu1 %vm212_vm1, %v3914_v5  ;;  %10388 = vmatprep.mubr.msk.f32.mxu0 %vm212_vm1, %v3525_v32  ;;  %v3921_v5 = vld [vmem:[#allocation2 + $0xa9] sm:$0xff] }
  0xf9   : > { %v11977_v52 = vadd.f32 %v10137_v26, %v10087_v10  ;;  %v1487_v41 = vpop.f32.mrf.mxu0  ;;  %10438 = vmatprep.mubr.msk.f32.mxu1 %vm212_vm1, %v3915_v40 }
  0xfa   : > { %v1811_v60 = vpop.f32.mrf.mxu1 }
  0xfb   : > { %v11984_v19 = vadd.f32 %v1811_v60, %v1487_v41  ;;  %v10090_v1 = vpop.f32.mrf.mxu0  ;;  %10389 = vmatmul.mubr.msk.f32.gmra.mxu0 %vm212_vm1, %v3526_v54  ;;  %v3531_v60 = vld [vmem:[#allocation2 + $0xa8] sm:$0xff] }
  0xfc   : > { %v10140_v2 = vpop.f32.mrf.mxu1  ;;  %10439 = vmatmul.mubr.msk.f32.gmra.mxu1 %vm212_vm1, %v3916_v11  ;;  %10391 = vmatprep.mubr.msk.f32.mxu0 %vm212_vm1, %v3527_v59  ;;  %v3533_v59 = vld [vmem:[#allocation2 + $0xc0] sm:$0xff] }
  0xfd   : > { %v11988_v31 = vadd.f32 %v10140_v2, %v10090_v1  ;;  %v1497_v55 = vpop.f32.mrf.mxu0  ;;  %10441 = vmatprep.mubr.msk.f32.mxu1 %vm212_vm1, %v3917_v49  ;;  %v3532_v2 = vld [vmem:[#allocation2 + $0xb0] sm:$0xff]  ;;  %v3923_v49 = vld [vmem:[#allocation2 + $0xc1] sm:$0xff] }
  0xfe   : > { %v1821_v63 = vpop.f32.mrf.mxu1 }
  0xff   : > { %v11992_v0 = vadd.f32 %v1821_v63, %v1497_v55  ;;  %v10093_v33 = vpop.f32.mrf.mxu0  ;;  %10392 = vmatmul.mubr.msk.f32.gmra.mxu0 %vm212_vm1, %v3528_v4  ;;  %v3922_v63 = vld [vmem:[#allocation2 + $0xb1] sm:$0xff] }
 0x100   : > { %v10143_v12 = vpop.f32.mrf.mxu1  ;;  %10442 = vmatmul.mubr.msk.f32.gmra.mxu1 %vm212_vm1, %v3918_v42  ;;  %10394 = vmatprep.mubr.msk.f32.mxu0 %vm212_vm1, %v3529_v43  ;;  %v3924_v43 = vld [vmem:[#allocation2 + $0xc9] sm:$0xff] }
 0x101   : > { %v11996_v22 = vadd.f32 %v10143_v12, %v10093_v33  ;;  %v1507_v30 = vpop.f32.mrf.mxu0  ;;  %10444 = vmatprep.mubr.msk.f32.mxu1 %vm212_vm1, %v3919_v61 }
 0x102   : > { %v1831_v18 = vpop.f32.mrf.mxu1 }
 0x103   : > { %v12000_v28 = vadd.f32 %v1831_v18, %v1507_v30  ;;  %v10096_v13 = vpop.f32.mrf.mxu0  ;;  %10395 = vmatmul.mubr.msk.f32.gmra.mxu0 %vm212_vm1, %v3530_v47  ;;  %v3534_v30 = vld [vmem:[#allocation2 + $0xc8] sm:$0xff] }
 0x104   : > { %v10146_v35 = vpop.f32.mrf.mxu1  ;;  %10445 = vmatmul.mubr.msk.f32.gmra.mxu1 %vm212_vm1, %v3920_v58  ;;  %10397 = vmatprep.mubr.msk.f32.mxu0 %vm212_vm1, %v3531_v60  ;;  %v3536_v58 = vld [vmem:[#allocation2 + $0xe0] sm:$0xff] }
 0x105   : > { %v12004_v14 = vadd.f32 %v10146_v35, %v10096_v13  ;;  %v1517_v10 = vpop.f32.mrf.mxu0  ;;  %10447 = vmatprep.mubr.msk.f32.mxu1 %vm212_vm1, %v3921_v5  ;;  %v3535_v13 = vld [vmem:[#allocation2 + $0xd8] sm:$0xff] }
 0x106   : > { %v1841_v26 = vpop.f32.mrf.mxu1  ;;  %v3925_v35 = vld [vmem:[#allocation2 + $0xd9] sm:$0xff] }
 0x107   : > { %v12008_v41 = vadd.f32 %v1841_v26, %v1517_v10  ;;  %v10099_v32 = vpop.f32.mrf.mxu0  ;;  %10398 = vmatmul.mubr.msk.f32.gmra.mxu0 %vm212_vm1, %v3532_v2  ;;  %v3537_v2 = vld [vmem:[#allocation2 + $0xf0] sm:$0xff] }
 0x108   : > { %v10149_v40 = vpop.f32.mrf.mxu1  ;;  %10448 = vmatmul.mubr.msk.f32.gmra.mxu1 %vm212_vm1, %v3922_v63  ;;  %10400 = vmatprep.mubr.msk.f32.mxu0 %vm212_vm1, %v3533_v59 }
 0x109   : > { %v12012_v1 = vadd.f32 %v10149_v40, %v10099_v32  ;;  %v1527_v54 = vpop.f32.mrf.mxu0  ;;  %10450 = vmatprep.mubr.msk.f32.mxu1 %vm212_vm1, %v3923_v49  ;;  %v3926_v32 = vld [vmem:[#allocation2 + $0xe1] sm:$0xff]  ;;  %v3538_v49 = vld [vmem:[#allocation2 + $0xf8] sm:$0xff] }
 0x10a   : > { %v1851_v55 = vpop.f32.mrf.mxu1 }
 0x10b   : > { %v12016_v11 = vadd.f32 %v1851_v55, %v1527_v54  ;;  %v10102_v33 = vpop.f32.mrf.mxu0  ;;  %10401 = vmatmul.mubr.msk.f32.gmra.mxu0 %vm212_vm1, %v3534_v30  ;;  %v3927_v54 = vld [vmem:[#allocation2 + $0xf1] sm:$0xff]  ;;  %v3928_v30 = vld [vmem:[#allocation2 + $0xf9] sm:$0xff] }
 0x10c   : > { %v10152_v12 = vpop.f32.mrf.mxu1  ;;  %10451 = vmatmul.mubr.msk.f32.gmra.mxu1 %vm212_vm1, %v3924_v43  ;;  %10403 = vmatprep.mubr.msk.f32.mxu0 %vm212_vm1, %v3535_v13 }
 0x10d   : > { %v12020_v4 = vadd.f32 %v10152_v12, %v10102_v33  ;;  %v1537_v18 = vpop.f32.mrf.mxu0  ;;  %10453 = vmatprep.mubr.msk.f32.mxu1 %vm212_vm1, %v3925_v35 }
 0x10e   : > { %v1861_v42 = vpop.f32.mrf.mxu1 }
 0x10f   : > { %v12024_v61 = vadd.f32 %v1861_v42, %v1537_v18  ;;  %v10105_v47 = vpop.f32.mrf.mxu0  ;;  %10404 = vmatmul.mubr.msk.f32.gmra.mxu0 %vm212_vm1, %v3536_v58  ;;  %v3539_v18 = vld [vmem:[#allocation2 + $0x108] sm:$0xff] }
 0x110   : > { %v10155_v10 = vpop.f32.mrf.mxu1  ;;  %10454 = vmatmul.mubr.msk.f32.gmra.mxu1 %vm212_vm1, %v3926_v32  ;;  %10406 = vmatprep.mubr.msk.f32.mxu0 %vm212_vm1, %v3537_v2  ;;  %v3929_v42 = vld [vmem:[#allocation2 + $0x109] sm:$0xff]  ;;  %v3931_v32 = vld [vmem:[#allocation2 + $0x121] sm:$0xff] }
 0x111   : > { %v12028_v26 = vadd.f32 %v10155_v10, %v10105_v47  ;;  %v1547_v60 = vpop.f32.mrf.mxu0  ;;  %10456 = vmatprep.mubr.msk.f32.mxu1 %vm212_vm1, %v3927_v54  ;;  %v3540_v47 = vld [vmem:[#allocation2 + $0x110] sm:$0xff] }
 0x112   : > { %v1871_v5 = vpop.f32.mrf.mxu1 }
 0x113   : > { %v12032_v40 = vadd.f32 %v1871_v5, %v1547_v60  ;;  %v10108_v55 = vpop.f32.mrf.mxu0  ;;  %10407 = vmatmul.mubr.msk.f32.gmra.mxu0 %vm212_vm1, %v3538_v49  ;;  %v3930_v60 = vld [vmem:[#allocation2 + $0x111] sm:$0xff]  ;;  %v3541_v5 = vld [vmem:[#allocation2 + $0x120] sm:$0xff]  ;;  %v3932_v49 = vld [vmem:[#allocation2 + $0x129] sm:$0xff] }
 0x114   : > { %v10158_v63 = vpop.f32.mrf.mxu1  ;;  %10457 = vmatmul.mubr.msk.f32.gmra.mxu1 %vm212_vm1, %v3928_v30  ;;  %10409 = vmatprep.mubr.msk.f32.mxu0 %vm212_vm1, %v3539_v18 }
 0x115   : > { %v12036_v59 = vadd.f32 %v10158_v63, %v10108_v55  ;;  %v12040_v33 = vpop.f32.mrf.mxu0  ;;  %10459 = vmatprep.mubr.msk.f32.mxu1 %vm212_vm1, %v3929_v42  ;;  %v3542_v63 = vld [vmem:[#allocation2 + $0x128] sm:$0xff]  ;;  %v3543_v42 = vld [vmem:[#allocation2 + $0x138] sm:$0xff] }
 0x116   : > { %v12042_v12 = vpop.f32.mrf.mxu1 }
 0x117   : > { %v10111_v43 = vpop.f32.mrf.mxu0  ;;  %10410 = vmatmul.mubr.msk.f32.gmra.mxu0 %vm212_vm1, %v3540_v47 }
 0x118   : > { %v10161_v13 = vpop.f32.mrf.mxu1  ;;  %10460 = vmatmul.mubr.msk.f32.gmra.mxu1 %vm212_vm1, %v3930_v60  ;;  %10412 = vmatprep.mubr.msk.f32.mxu0 %vm212_vm1, %v3541_v5  ;;  %v3935_v5 = vld [vmem:[#allocation2 + $0x151] sm:$0xff] }
 0x119   : > { %v12046_v35 = vadd.f32 %v10161_v13, %v10111_v43  ;;  %v12050_v10 = vpop.f32.mrf.mxu0  ;;  %10462 = vmatprep.mubr.msk.f32.mxu1 %vm212_vm1, %v3931_v32  ;;  %v3933_v43 = vld [vmem:[#allocation2 + $0x139] sm:$0xff]  ;;  %v3934_v13 = vld [vmem:[#allocation2 + $0x141] sm:$0xff] }
 0x11a   : > { %14731 = vst [vmem:[#allocation9_spill] sm:$0xff] %v12050_v10  ;;  %v12052_v58 = vpop.f32.mrf.mxu1 }
 0x11b   : > { %14732 = vst [vmem:[#allocation10_spill] sm:$0xff] %v12052_v58  ;;  %v10114_v2 = vpop.f32.mrf.mxu0  ;;  %10413 = vmatmul.mubr.msk.f32.gmra.mxu0 %vm212_vm1, %v3542_v63  ;;  %v3936_v63 = vld [vmem:[#allocation2 + $0x159] sm:$0xff] }
 0x11c   : > { %v10164_v54 = vpop.f32.mrf.mxu1  ;;  %10463 = vmatmul.mubr.msk.f32.gmra.mxu1 %vm212_vm1, %v3932_v49  ;;  %10415 = vmatprep.mubr.msk.f32.mxu0 %vm212_vm1, %v3543_v42 }
 0x11d   : > { %v12056_v55 = vadd.f32 %v10164_v54, %v10114_v2  ;;  %v12060_v30 = vpop.f32.mrf.mxu0  ;;  %10465 = vmatprep.mubr.msk.f32.mxu1 %vm212_vm1, %v3933_v43 }
 0x11e   : > { %14733 = vst [vmem:[#allocation11_spill] sm:$0xff] %v12060_v30  ;;  %v12062_v18 = vpop.f32.mrf.mxu1 }
 0x11f   : > { %14734 = vst [vmem:[#allocation12_spill] sm:$0xff] %v12062_v18  ;;  %v10117_v47 = vpop.f32.mrf.mxu0  ;;  %10416 = vmatmul.mubr.msk.f32.gmra.mxu0 %vm212_vm1, %v11567_v37 }
 0x120   : > { %v10167_v60 = vpop.f32.mrf.mxu1  ;;  %10466 = vmatmul.mubr.msk.f32.gmra.mxu1 %vm212_vm1, %v3934_v13  ;;  %10418 = vmatprep.mubr.msk.f32.mxu0 %vm212_vm1, %v11571_v53  ;;  %v14740_v13 = vld [vmem:[#allocation6_spill] sm:$0xff] }
 0x121   : > { %v12068_v32 = vadd.f32 %v10167_v60, %v10117_v47  ;;  %v12072_v2 = vpop.f32.mrf.mxu0  ;;  %10468 = vmatprep.mubr.msk.f32.mxu1 %vm212_vm1, %v3935_v5  ;;  %v14737_v47 = vld [vmem:[#allocation5_spill] sm:$0xff] }
 0x122   : > { %14735 = vst [vmem:[#allocation13_spill] sm:$0xff] %v12072_v2  ;;  %v12074_v54 = vpop.f32.mrf.mxu1 }
 0x123   : > { %14736 = vst [vmem:[#allocation14_spill] sm:$0xff] %v12074_v54  ;;  %v10120_v49 = vpop.f32.mrf.mxu0  ;;  %10419 = vmatmul.mubr.msk.f32.gmra.mxu0 %vm212_vm1, %v14737_v47 }
 0x124   : > { %v10170_v42 = vpop.f32.mrf.mxu1  ;;  %10469 = vmatmul.mubr.msk.f32.gmra.mxu1 %vm212_vm1, %v3936_v63  ;;  %10421 = vmatprep.mubr.msk.f32.mxu0 %vm212_vm1, %v14740_v13  ;;  %v14744_v63 = vld [vmem:[#allocation8_spill] sm:$0xff] }
 0x125   : > { %v12080_v43 = vadd.f32 %v10170_v42, %v10120_v49  ;;  %v12084_v37 = vpop.f32.mrf.mxu0  ;;  %10471 = vmatprep.mubr.msk.f32.mxu1 %vm212_vm1, %v11586_v3  ;;  %v14741_v49 = vld [vmem:[#allocation7_spill] sm:$0xff] }
 0x126   : > { %14738 = vst [vmem:[#allocation5_spill] sm:$0xff] %v12084_v37  ;;  %v12086_v60 = vpop.f32.mrf.mxu1 }
 0x127   : > { %14739 = vst [vmem:[#allocation15_spill] sm:$0xff] %v12086_v60  ;;  %v10123_v53 = vpop.f32.mrf.mxu0  ;;  %10422 = vmatmul.mubr.msk.f32.gmra.mxu0 %vm212_vm1, %v14741_v49 }
 0x128   : > { %v10173_v5 = vpop.f32.mrf.mxu1  ;;  %10472 = vmatmul.mubr.msk.f32.gmra.mxu1 %vm212_vm1, %v11600_v34  ;;  %10424 = vmatprep.mubr.msk.f32.mxu0 %vm212_vm1, %v14744_v63  ;;  %v3552_v34 = vld [vmem:[#allocation2 + $0x1a0] sm:$0xff] }
 0x129   : > { %v12093_v54 = vadd.f32 %v10173_v5, %v10123_v53  ;;  %v12097_v42 = vpop.f32.mrf.mxu0  ;;  %10474 = vmatprep.mubr.msk.f32.mxu1 %vm212_vm1, %v11951_v45  ;;  %v3551_v53 = vld [vmem:[#allocation2 + $0x198] sm:$0xff]  ;;  %v3942_v45 = vld [vmem:[#allocation2 + $0x1a1] sm:$0xff] }
 0x12a   : > { %14742 = vst [vmem:[#allocation6_spill] sm:$0xff] %v12097_v42  ;;  %v12099_v47 = vpop.f32.mrf.mxu1  ;;  %v3941_v5 = vld [vmem:[#allocation2 + $0x199] sm:$0xff] }
 0x12b   : > { %14743 = vst [vmem:[#allocation7_spill] sm:$0xff] %v12099_v47  ;;  %v10126_v3 = vpop.f32.mrf.mxu0  ;;  %10425 = vmatmul.mubr.msk.f32.gmra.mxu0 %vm212_vm1, %v11810_v15 }
 0x12c   : > { %v10176_v13 = vpop.f32.mrf.mxu1  ;;  %10475 = vmatmul.mubr.msk.f32.gmra.mxu1 %vm212_vm1, %v11961_v8  ;;  %10427 = vmatprep.mubr.msk.f32.mxu0 %vm212_vm1, %v3551_v53 }
 0x12d   : > { %v12107_v60 = vadd.f32 %v10176_v13, %v10126_v3  ;;  %v12111_v49 = vpop.f32.mrf.mxu0  ;;  %10477 = vmatprep.mubr.msk.f32.mxu1 %vm212_vm1, %v3941_v5 }
 0x12e   : > { %14745 = vst [vmem:[#allocation8_spill] sm:$0xff] %v12111_v49  ;;  %v12113_v47 = vpop.f32.mrf.mxu1 }
 0x12f   : > { %14746 = vst [vmem:[#allocation16_spill] sm:$0xff] %v12113_v47  ;;  %v10129_v63 = vpop.f32.mrf.mxu0  ;;  %10428 = vmatmul.mubr.msk.f32.gmra.mxu0 %vm212_vm1, %v3552_v34 }
 0x130   : > { %v10179_v42 = vpop.f32.mrf.mxu1  ;;  %10478 = vmatmul.mubr.msk.f32.gmra.mxu1 %vm212_vm1, %v3942_v45  ;;  %10482 = vmatprep.mubr.msk.f32.mxu0 %vm212_vm1, %v11634_v6 }
 0x131   : > { %v12121_v15 = vadd.f32 %v10179_v42, %v10129_v63  ;;  %v12125_v3 = vpop.f32.mrf.mxu0 }
 0x132   : > { %14747 = vst [vmem:[#allocation17_spill] sm:$0xff] %v12125_v3  ;;  %v12127_v8 = vpop.f32.mrf.mxu1 }
 0x133   : > { %14748 = vst [vmem:[#allocation18_spill] sm:$0xff] %v12127_v8  ;;  %v10184_v13 = vpop.f32.mrf.mxu0  ;;  %10483 = vmatmul.mubr.msk.f32.vlgmr.msra.gmra.mxu0 %vm212_vm1, %v11648_v38 }
 0x134   : > { %v10234_v53 = vpop.f32.mrf.mxu1  ;;  %v2319_v5 = vadd.f32 %v10184_v13, %v11923_v56  ;;  %10485 = vmatprep.mubr.msk.f32.mxu0 %vm212_vm1, %v11652_v29 }
 0x135   : > { %v2159_v34 = vpop.f32.mrf.mxu0 }
 0x136   : > { %v12134_v42 = vpop.f32.mrf.mxu1  ;;  %v12137_v45 = vadd.f32 %v2159_v34, %v11929_v23  ;;  %v12139_v6 = vadd.f32 %v10234_v53, %v2319_v5 }
 0x137   : > { %v10187_v63 = vpop.f32.mrf.mxu0  ;;  %10486 = vmatmul.mubr.msk.f32.gmra.mxu0 %vm212_vm1, %v11660_v7 }
 0x138   : > { %v10237_v8 = vpop.f32.mrf.mxu1  ;;  %v2321_v38 = vadd.f32 %v10187_v63, %v11977_v52  ;;  %10488 = vmatprep.mubr.msk.f32.mxu0 %vm212_vm1, %v11664_v17 }
 0x139   : > { %v2169_v56 = vpop.f32.mrf.mxu0 }
 0x13a   : > { %v12146_v29 = vpop.f32.mrf.mxu1  ;;  %v12149_v13 = vadd.f32 %v2169_v56, %v11984_v19  ;;  %v12151_v23 = vadd.f32 %v10237_v8, %v2321_v38 }
 0x13b   : > { %v10190_v53 = vpop.f32.mrf.mxu0  ;;  %10489 = vmatmul.mubr.msk.f32.gmra.mxu0 %vm212_vm1, %v11672_v24 }
 0x13c   : > { %v10240_v5 = vpop.f32.mrf.mxu1  ;;  %v2323_v7 = vadd.f32 %v10190_v53, %v11988_v31  ;;  %10491 = vmatprep.mubr.msk.f32.mxu0 %vm212_vm1, %v11676_v39 }
 0x13d   : > { %v2179_v52 = vpop.f32.mrf.mxu0 }
 0x13e   : > { %v12158_v17 = vpop.f32.mrf.mxu1  ;;  %v12161_v34 = vadd.f32 %v2179_v52, %v11992_v0  ;;  %v12163_v19 = vadd.f32 %v10240_v5, %v2323_v7 }
 0x13f   : > { %v10193_v8 = vpop.f32.mrf.mxu0  ;;  %10492 = vmatmul.mubr.msk.f32.gmra.mxu0 %vm212_vm1, %v11684_v44 }
 0x140   : > { %v10243_v63 = vpop.f32.mrf.mxu1  ;;  %v2325_v24 = vadd.f32 %v10193_v8, %v11996_v22  ;;  %10494 = vmatprep.mubr.msk.f32.mxu0 %vm212_vm1, %v11688_v57 }
 0x141   : > { %v2189_v31 = vpop.f32.mrf.mxu0 }
 0x142   : > { %v12170_v39 = vpop.f32.mrf.mxu1  ;;  %v12173_v38 = vadd.f32 %v2189_v31, %v12000_v28  ;;  %v12175_v0 = vadd.f32 %v10243_v63, %v2325_v24 }
 0x143   : > { %v10196_v56 = vpop.f32.mrf.mxu0  ;;  %10495 = vmatmul.mubr.msk.f32.gmra.mxu0 %vm212_vm1, %v11696_v62 }
 0x144   : > { %v10246_v53 = vpop.f32.mrf.mxu1  ;;  %v2327_v44 = vadd.f32 %v10196_v56, %v12004_v14  ;;  %10497 = vmatprep.mubr.msk.f32.mxu0 %vm212_vm1, %v11700_v16 }
 0x145   : > { %v2199_v22 = vpop.f32.mrf.mxu0 }
 0x146   : > { %v12182_v57 = vpop.f32.mrf.mxu1  ;;  %v12185_v5 = vadd.f32 %v2199_v22, %v12008_v41  ;;  %v12187_v28 = vadd.f32 %v10246_v53, %v2327_v44 }
 0x147   : > { %v10199_v7 = vpop.f32.mrf.mxu0  ;;  %10498 = vmatmul.mubr.msk.f32.gmra.mxu0 %vm212_vm1, %v11708_v25 }
 0x148   : > { %v10249_v52 = vpop.f32.mrf.mxu1  ;;  %v2329_v62 = vadd.f32 %v10199_v7, %v12012_v1  ;;  %10500 = vmatprep.mubr.msk.f32.mxu0 %vm212_vm1, %v11712_v46 }
 0x149   : > { %v2209_v14 = vpop.f32.mrf.mxu0 }
 0x14a   : > { %v12194_v16 = vpop.f32.mrf.mxu1  ;;  %v12197_v8 = vadd.f32 %v2209_v14, %v12016_v11  ;;  %v12199_v41 = vadd.f32 %v10249_v52, %v2329_v62  ;;  %v4321_v62 = vld [vmem:[#allocation2 + $0x122] sm:$0xff] }
 0x14b   : > { %v10202_v63 = vpop.f32.mrf.mxu0  ;;  %10501 = vmatmul.mubr.msk.f32.gmra.mxu0 %vm212_vm1, %v11720_v51 }
 0x14c   : > { %v10252_v24 = vpop.f32.mrf.mxu1  ;;  %v2331_v25 = vadd.f32 %v10202_v63, %v12020_v4  ;;  %10503 = vmatprep.mubr.msk.f32.mxu0 %vm212_vm1, %v11724_v21 }
 0x14d   : > { %v2219_v1 = vpop.f32.mrf.mxu0 }
 0x14e   : > { %v12206_v46 = vpop.f32.mrf.mxu1  ;;  %v12209_v31 = vadd.f32 %v2219_v1, %v12024_v61  ;;  %v12211_v11 = vadd.f32 %v10252_v24, %v2331_v25  ;;  %v4323_v25 = vld [vmem:[#allocation2 + $0x13a] sm:$0xff] }
 0x14f   : > { %v10205_v56 = vpop.f32.mrf.mxu0  ;;  %10504 = vmatmul.mubr.msk.f32.gmra.mxu0 %vm212_vm1, %v11732_v9 }
 0x150   : > { %v10255_v53 = vpop.f32.mrf.mxu1  ;;  %v2333_v51 = vadd.f32 %v10205_v56, %v12028_v26  ;;  %10506 = vmatprep.mubr.msk.f32.mxu0 %vm212_vm1, %v11736_v36  ;;  %v4320_v26 = vld [vmem:[#allocation2 + $0x112] sm:$0xff] }
 0x151   : > { %v2229_v4 = vpop.f32.mrf.mxu0 }
 0x152   : > { %v12218_v21 = vpop.f32.mrf.mxu1  ;;  %v12221_v44 = vadd.f32 %v2229_v4, %v12032_v40  ;;  %v12223_v61 = vadd.f32 %v10255_v53, %v2333_v51  ;;  %v4324_v4 = vld [vmem:[#allocation2 + $0x142] sm:$0xff] }
 0x153   : > { %14749 = vst [vmem:[#allocation19_spill] sm:$0xff] %v12218_v21  ;;  %v10208_v22 = vpop.f32.mrf.mxu0  ;;  %10507 = vmatmul.mubr.msk.f32.gmra.mxu0 %vm212_vm1, %v11744_v48 }
 0x154   : > { %14750 = vst [vmem:[#allocation20_spill] sm:$0xff] %v12221_v44  ;;  %v10258_v7 = vpop.f32.mrf.mxu1  ;;  %v2335_v9 = vadd.f32 %v10208_v22, %v12036_v59  ;;  %10509 = vmatprep.mubr.msk.f32.mxu0 %vm212_vm1, %v11748_v27  ;;  %v4322_v59 = vld [vmem:[#allocation2 + $0x12a] sm:$0xff] }
 0x155   : > { %v12230_v36 = vpop.f32.mrf.mxu0 }
 0x156   : > { %14751 = vst [vmem:[#allocation21_spill] sm:$0xff] %v12230_v36  ;;  %v12232_v52 = vpop.f32.mrf.mxu1  ;;  %v12234_v40 = vadd.f32 %v10258_v7, %v2335_v9  ;;  %v4325_v7 = vld [vmem:[#allocation2 + $0x152] sm:$0xff] }
 0x157   : > { %14752 = vst [vmem:[#allocation22_spill] sm:$0xff] %v12232_v52  ;;  %v10211_v14 = vpop.f32.mrf.mxu0  ;;  %10510 = vmatmul.mubr.msk.f32.gmra.mxu0 %vm212_vm1, %v4320_v26 }
 0x158   : > { %v10261_v63 = vpop.f32.mrf.mxu1  ;;  %v2337_v48 = vadd.f32 %v10211_v14, %v12046_v35  ;;  %10512 = vmatprep.mubr.msk.f32.mxu0 %vm212_vm1, %v4321_v62 }
 0x159   : > { %v12239_v24 = vpop.f32.mrf.mxu0 }
 0x15a   : > { %14753 = vst [vmem:[#allocation23_spill] sm:$0xff] %v12239_v24  ;;  %v12241_v27 = vpop.f32.mrf.mxu1  ;;  %v12243_v1 = vadd.f32 %v10261_v63, %v2337_v48  ;;  %v4326_v63 = vld [vmem:[#allocation2 + $0x15a] sm:$0xff] }
 0x15b   : > { %14754 = vst [vmem:[#allocation24_spill] sm:$0xff] %v12241_v27  ;;  %v10214_v56 = vpop.f32.mrf.mxu0  ;;  %10513 = vmatmul.mubr.msk.f32.gmra.mxu0 %vm212_vm1, %v4322_v59  ;;  %v4327_v59 = vld [vmem:[#allocation2 + $0x16a] sm:$0xff] }
 0x15c   : > { %v10264_v53 = vpop.f32.mrf.mxu1  ;;  %v2339_v51 = vadd.f32 %v10214_v56, %v12056_v55  ;;  %10515 = vmatprep.mubr.msk.f32.mxu0 %vm212_vm1, %v4323_v25 }
 0x15d   : > { %v12248_v35 = vpop.f32.mrf.mxu0 }
 0x15e   : > { %14755 = vst [vmem:[#allocation25_spill] sm:$0xff] %v12248_v35  ;;  %v12250_v22 = vpop.f32.mrf.mxu1  ;;  %v12252_v9 = vadd.f32 %v10264_v53, %v2339_v51 }
 0x15f   : > { %14756 = vst [vmem:[#allocation26_spill] sm:$0xff] %v12250_v22  ;;  %v10217_v26 = vpop.f32.mrf.mxu0  ;;  %10516 = vmatmul.mubr.msk.f32.gmra.mxu0 %vm212_vm1, %v4324_v4  ;;  %v4328_v4 = vld [vmem:[#allocation2 + $0x172] sm:$0xff] }
 0x160   : > { %v10267_v62 = vpop.f32.mrf.mxu1  ;;  %v2341_v14 = vadd.f32 %v10217_v26, %v12068_v32  ;;  %10518 = vmatprep.mubr.msk.f32.mxu0 %vm212_vm1, %v4325_v7 }
 0x161   : > { %v12257_v55 = vpop.f32.mrf.mxu0 }
 0x162   : > { %14757 = vst [vmem:[#allocation27_spill] sm:$0xff] %v12257_v55  ;;  %v12259_v48 = vpop.f32.mrf.mxu1  ;;  %v12261_v25 = vadd.f32 %v10267_v62, %v2341_v14 }
 0x163   : > { %14758 = vst [vmem:[#allocation28_spill] sm:$0xff] %v12259_v48  ;;  %v10220_v56 = vpop.f32.mrf.mxu0  ;;  %10519 = vmatmul.mubr.msk.f32.gmra.mxu0 %vm212_vm1, %v4326_v63 }
 0x164   : > { %v10270_v53 = vpop.f32.mrf.mxu1  ;;  %v2343_v51 = vadd.f32 %v10220_v56, %v12080_v43  ;;  %10521 = vmatprep.mubr.msk.f32.mxu0 %vm212_vm1, %v4327_v59  ;;  %v4331_v59 = vld [vmem:[#allocation2 + $0x19a] sm:$0xff] }
 0x165   : > { %v12266_v32 = vpop.f32.mrf.mxu0 }
 0x166   : > { %14759 = vst [vmem:[#allocation29_spill] sm:$0xff] %v12266_v32  ;;  %v12268_v7 = vpop.f32.mrf.mxu1  ;;  %v12270_v26 = vadd.f32 %v10270_v53, %v2343_v51 }
 0x167   : > { %14760 = vst [vmem:[#allocation30_spill] sm:$0xff] %v12268_v7  ;;  %v10223_v3 = vpop.f32.mrf.mxu0  ;;  %10522 = vmatmul.mubr.msk.f32.gmra.mxu0 %vm212_vm1, %v4328_v4 }
 0x168   : > { %v10273_v62 = vpop.f32.mrf.mxu1  ;;  %v2345_v14 = vadd.f32 %v10223_v3, %v12093_v54  ;;  %10524 = vmatprep.mubr.msk.f32.mxu0 %vm212_vm1, %v11953_v50  ;;  %v4332_v54 = vld [vmem:[#allocation2 + $0x1a2] sm:$0xff] }
 0x169   : > { %v12276_v63 = vpop.f32.mrf.mxu0 }
 0x16a   : > { %14761 = vst [vmem:[#allocation31_spill] sm:$0xff] %v12276_v63  ;;  %v12278_v43 = vpop.f32.mrf.mxu1  ;;  %v12280_v56 = vadd.f32 %v10273_v62, %v2345_v14 }
 0x16b   : > { %14762 = vst [vmem:[#allocation32_spill] sm:$0xff] %v12278_v43  ;;  %v10226_v47 = vpop.f32.mrf.mxu0  ;;  %10525 = vmatmul.mubr.msk.f32.gmra.mxu0 %vm212_vm1, %v11965_v20 }
 0x16c   : > { %v10276_v53 = vpop.f32.mrf.mxu1  ;;  %v2347_v51 = vadd.f32 %v10226_v47, %v12107_v60  ;;  %10527 = vmatprep.mubr.msk.f32.mxu0 %vm212_vm1, %v4331_v59 }
 0x16d   : > { %v12286_v3 = vpop.f32.mrf.mxu0 }
 0x16e   : > { %14763 = vst [vmem:[#allocation33_spill] sm:$0xff] %v12286_v3  ;;  %v12288_v50 = vpop.f32.mrf.mxu1  ;;  %v12290_v4 = vadd.f32 %v10276_v53, %v2347_v51 }
 0x16f   : > { %14764 = vst [vmem:[#allocation34_spill] sm:$0xff] %v12288_v50  ;;  %v10229_v43 = vpop.f32.mrf.mxu0  ;;  %10528 = vmatmul.mubr.msk.f32.gmra.mxu0 %vm212_vm1, %v4332_v54 }
 0x170   : > { %v10279_v62 = vpop.f32.mrf.mxu1  ;;  %v2349_v14 = vadd.f32 %v10229_v43, %v12121_v15 }
 0x171   : > { %v12294_v49 = vpop.f32.mrf.mxu0 }
 0x172   : > { %14765 = vst [vmem:[#allocation35_spill] sm:$0xff] %v12294_v49  ;;  %v12296_v20 = vpop.f32.mrf.mxu1  ;;  %v12298_v60 = vadd.f32 %v10279_v62, %v2349_v14 }
 0x173   : > { %14766 = vst [vmem:[#allocation36_spill] sm:$0xff] %v12296_v20  ;;  %v10284_v47 = vpop.f32.mrf.mxu0 }
 0x174   : > { %v10334_v59 = vpop.f32.mrf.mxu1  ;;  %v3099_v3 = vadd.f32 %v10284_v47, %v12139_v6 }
 0x175   : > { %v12301_v63 = vpop.f32.mrf.mxu0 }
 0x176   : > { %v12303_v53 = vpop.f32.mrf.mxu1  ;;  %v12305_v51 = vadd.f32 %v10334_v59, %v3099_v3 }
 0x177   : > { %v10287_v54 = vpop.f32.mrf.mxu0 }
 0x178   : > { %v10337_v50 = vpop.f32.mrf.mxu1  ;;  %v3101_v15 = vadd.f32 %v10287_v54, %v12151_v23 }
 0x179   : > { %v12308_v43 = vpop.f32.mrf.mxu0 }
 0x17a   : > { %v12310_v49 = vpop.f32.mrf.mxu1  ;;  %v12312_v62 = vadd.f32 %v10337_v50, %v3101_v15 }
 0x17b   : > { %v10290_v14 = vpop.f32.mrf.mxu0 }
 0x17c   : > { %v10340_v20 = vpop.f32.mrf.mxu1  ;;  %v3103_v6 = vadd.f32 %v10290_v14, %v12163_v19 }
 0x17d   : > { %v12315_v47 = vpop.f32.mrf.mxu0 }
 0x17e   : > { %v12317_v7 = vpop.f32.mrf.mxu1  ;;  %v12319_v3 = vadd.f32 %v10340_v20, %v3103_v6 }
 0x17f   : > { %v10293_v59 = vpop.f32.mrf.mxu0 }
 0x180   : > { %v10343_v32 = vpop.f32.mrf.mxu1  ;;  %v3105_v23 = vadd.f32 %v10293_v59, %v12175_v0 }
 0x181   : > { %v12322_v54 = vpop.f32.mrf.mxu0 }
 0x182   : > { %v12324_v48 = vpop.f32.mrf.mxu1  ;;  %v12326_v50 = vadd.f32 %v10343_v32, %v3105_v23 }
 0x183   : > { %v10296_v15 = vpop.f32.mrf.mxu0 }
 0x184   : > { %v10346_v37 = vpop.f32.mrf.mxu1  ;;  %v3107_v19 = vadd.f32 %v10296_v15, %v12187_v28 }
 0x185   : > { %v12329_v14 = vpop.f32.mrf.mxu0 }
 0x186   : > { %v12331_v55 = vpop.f32.mrf.mxu1  ;;  %v12333_v20 = vadd.f32 %v10346_v37, %v3107_v19 }
 0x187   : > { %v10299_v6 = vpop.f32.mrf.mxu0 }
 0x188   : > { %v10349_v22 = vpop.f32.mrf.mxu1  ;;  %v3109_v0 = vadd.f32 %v10299_v6, %v12199_v41 }
 0x189   : > { %v12336_v59 = vpop.f32.mrf.mxu0 }
 0x18a   : > { %v12338_v2 = vpop.f32.mrf.mxu1  ;;  %v12340_v32 = vadd.f32 %v10349_v22, %v3109_v0 }
 0x18b   : > { %14767 = vst [vmem:[#allocation37_spill] sm:$0xff] %v12338_v2  ;;  %v10302_v23 = vpop.f32.mrf.mxu0 }
 0x18c   : > { %v10352_v35 = vpop.f32.mrf.mxu1  ;;  %v3111_v28 = vadd.f32 %v10302_v23, %v12211_v11 }
 0x18d   : > { %v12343_v15 = vpop.f32.mrf.mxu0 }
 0x18e   : > { %14768 = vst [vmem:[#allocation38_spill] sm:$0xff] %v12343_v15  ;;  %v12345_v27 = vpop.f32.mrf.mxu1  ;;  %v12347_v37 = vadd.f32 %v10352_v35, %v3111_v28 }
 0x18f   : > { %14769 = vst [vmem:[#allocation39_spill] sm:$0xff] %v12345_v27  ;;  %v10305_v19 = vpop.f32.mrf.mxu0 }
 0x190   : > { %v10355_v18 = vpop.f32.mrf.mxu1  ;;  %v3113_v41 = vadd.f32 %v10305_v19, %v12223_v61 }
 0x191   : > { %v12350_v6 = vpop.f32.mrf.mxu0 }
 0x192   : > { %14770 = vst [vmem:[#allocation40_spill] sm:$0xff] %v12350_v6  ;;  %v12352_v30 = vpop.f32.mrf.mxu1  ;;  %v12354_v22 = vadd.f32 %v10355_v18, %v3113_v41 }
 0x193   : > { %14771 = vst [vmem:[#allocation41_spill] sm:$0xff] %v12352_v30  ;;  %v10308_v0 = vpop.f32.mrf.mxu0 }
 0x194   : > { %v10358_v24 = vpop.f32.mrf.mxu1  ;;  %v3115_v11 = vadd.f32 %v10308_v0, %v12234_v40 }
 0x195   : > { %v12357_v23 = vpop.f32.mrf.mxu0 }
 0x196   : > { %14772 = vst [vmem:[#allocation42_spill] sm:$0xff] %v12357_v23  ;;  %v12359_v52 = vpop.f32.mrf.mxu1  ;;  %v12361_v35 = vadd.f32 %v10358_v24, %v3115_v11 }
 0x197   : > { %14773 = vst [vmem:[#allocation43_spill] sm:$0xff] %v12359_v52  ;;  %v10311_v28 = vpop.f32.mrf.mxu0 }
 0x198   : > { %v10361_v27 = vpop.f32.mrf.mxu1  ;;  %v3117_v61 = vadd.f32 %v10311_v28, %v12243_v1 }
 0x199   : > { %v12364_v19 = vpop.f32.mrf.mxu0 }
 0x19a   : > { %14774 = vst [vmem:[#allocation44_spill] sm:$0xff] %v12364_v19  ;;  %v12366_v6 = vpop.f32.mrf.mxu1  ;;  %v12368_v18 = vadd.f32 %v10361_v27, %v3117_v61 }
 0x19b   : > { %14775 = vst [vmem:[#allocation45_spill] sm:$0xff] %v12366_v6  ;;  %v10314_v41 = vpop.f32.mrf.mxu0 }
 0x19c   : > { %v10364_v30 = vpop.f32.mrf.mxu1  ;;  %v3119_v40 = vadd.f32 %v10314_v41, %v12252_v9 }
 0x19d   : > { %v12371_v0 = vpop.f32.mrf.mxu0 }
 0x19e   : > { %14776 = vst [vmem:[#allocation46_spill] sm:$0xff] %v12371_v0  ;;  %v12373_v23 = vpop.f32.mrf.mxu1  ;;  %v12375_v24 = vadd.f32 %v10364_v30, %v3119_v40 }
 0x19f   : > { %14777 = vst [vmem:[#allocation47_spill] sm:$0xff] %v12373_v23  ;;  %v10317_v11 = vpop.f32.mrf.mxu0 }
 0x1a0   : > { %v10367_v52 = vpop.f32.mrf.mxu1  ;;  %v3121_v1 = vadd.f32 %v10317_v11, %v12261_v25 }
 0x1a1   : > { %v12378_v28 = vpop.f32.mrf.mxu0 }
 0x1a2   : > { %14778 = vst [vmem:[#allocation48_spill] sm:$0xff] %v12378_v28  ;;  %v12380_v19 = vpop.f32.mrf.mxu1  ;;  %v12382_v27 = vadd.f32 %v10367_v52, %v3121_v1 }
 0x1a3   : > { %14779 = vst [vmem:[#allocation49_spill] sm:$0xff] %v12380_v19  ;;  %v10320_v61 = vpop.f32.mrf.mxu0 }
 0x1a4   : > { %v10370_v6 = vpop.f32.mrf.mxu1  ;;  %v3123_v9 = vadd.f32 %v10320_v61, %v12270_v26 }
 0x1a5   : > { %v12385_v41 = vpop.f32.mrf.mxu0 }
 0x1a6   : > { %14780 = vst [vmem:[#allocation50_spill] sm:$0xff] %v12385_v41  ;;  %v12387_v0 = vpop.f32.mrf.mxu1  ;;  %v12389_v30 = vadd.f32 %v10370_v6, %v3123_v9 }
 0x1a7   : > { %14781 = vst [vmem:[#allocation51_spill] sm:$0xff] %v12387_v0  ;;  %v10323_v40 = vpop.f32.mrf.mxu0 }
 0x1a8   : > { %v10373_v23 = vpop.f32.mrf.mxu1  ;;  %v3125_v25 = vadd.f32 %v10323_v40, %v12280_v56 }
 0x1a9   : > { %v12392_v11 = vpop.f32.mrf.mxu0 }
 0x1aa   : > { %14782 = vst [vmem:[#allocation52_spill] sm:$0xff] %v12392_v11  ;;  %v12394_v28 = vpop.f32.mrf.mxu1  ;;  %v12396_v52 = vadd.f32 %v10373_v23, %v3125_v25 }
 0x1ab   : > { %14783 = vst [vmem:[#allocation53_spill] sm:$0xff] %v12394_v28  ;;  %v10326_v1 = vpop.f32.mrf.mxu0 }
 0x1ac   : > { %v10376_v19 = vpop.f32.mrf.mxu1  ;;  %v3127_v26 = vadd.f32 %v10326_v1, %v12290_v4 }
 0x1ad   : > { %v12399_v61 = vpop.f32.mrf.mxu0 }
 0x1ae   : > { %14784 = vst [vmem:[#allocation54_spill] sm:$0xff] %v12399_v61  ;;  %v12401_v41 = vpop.f32.mrf.mxu1  ;;  %v12403_v6 = vadd.f32 %v10376_v19, %v3127_v26 }
 0x1af   : > { %14785 = vst [vmem:[#allocation55_spill] sm:$0xff] %v12401_v41  ;;  %v10329_v9 = vpop.f32.mrf.mxu0 }
 0x1b0   : > { %v10379_v0 = vpop.f32.mrf.mxu1  ;;  %v3129_v56 = vadd.f32 %v10329_v9, %v12298_v60 }
 0x1b1   : > { %v12406_v40 = vpop.f32.mrf.mxu0 }
 0x1b2   : > { %14786 = vst [vmem:[#allocation56_spill] sm:$0xff] %v12406_v40  ;;  %v12408_v11 = vpop.f32.mrf.mxu1  ;;  %v12410_v23 = vadd.f32 %v10379_v0, %v3129_v56 }
 0x1b3   : > { %14787 = vst [vmem:[#allocation57_spill] sm:$0xff] %v12408_v11  ;;  %v10384_v25 = vpop.f32.mrf.mxu0 }
 0x1b4   : > { %v12412_v28 = vpop.f32.mrf.mxu1  ;;  %v12415_v4 = vadd.f32 %v10384_v25, %v12305_v51 }
 0x1b5   : > { %v12417_v1 = vpop.f32.mrf.mxu0 }
 0x1b6   : > { %v12419_v19 = vpop.f32.mrf.mxu1 }
 0x1b7   : > { %v10387_v26 = vpop.f32.mrf.mxu0 }
 0x1b8   : > { %v12422_v60 = vadd.f32 %v10387_v26, %v12312_v62  ;;  %v12426_v11 = vpop.f32.mrf.mxu1 }
 0x1b9   : > { %v12424_v9 = vpop.f32.mrf.mxu0 }
 0x1ba   : > { %v12431_v40 = vpop.f32.mrf.mxu1 }
 0x1bb   : > { %v10390_v0 = vpop.f32.mrf.mxu0 }
 0x1bc   : > { %v12429_v56 = vadd.f32 %v10390_v0, %v12319_v3  ;;  %v12438_v61 = vpop.f32.mrf.mxu1 }
 0x1bd   : > { %v12433_v51 = vpop.f32.mrf.mxu0 }
 0x1be   : > { %v12445_v10 = vpop.f32.mrf.mxu1 }
 0x1bf   : > { %v10393_v25 = vpop.f32.mrf.mxu0 }
 0x1c0   : > { %v12436_v41 = vadd.f32 %v10393_v25, %v12326_v50  ;;  %v12456_v50 = vld [vmem:[%s12453_s18] sm:$0x1]  ;;  %v14790_v25 = vld [vmem:[#allocation4_spill] sm:$0xff] }
 0x1c1   : > { %v12440_v62 = vpop.f32.mrf.mxu0  ;;  %14789 = vst [vmem:[#allocation59_spill] sm:$0xff] %v12456_v50  ;;  %v12460_v36 = vrot.slane %v12456_v50, %v14790_v25 }
 0x1c3   : > { %v10396_v26 = vpop.f32.mrf.mxu0  ;;  %14791 = vst [vmem:[#allocation60_spill] sm:$0xff] %v12460_v36  ;;  %4903 = vrot.lane.b32.xlu0 %v12460_v36, %s11011_s19  ;;  %s14603_s19 = scalar_lea.vmem %s14680_s4, %s9485_s17 }
 0x1c4   : > { %v12443_v58 = vadd.f32 %v10396_v26, %v12333_v20  ;;  %v12465_v26 = vpop.f32.mrf.mxu1 }
 0x1c5   : > { %v12447_v3 = vpop.f32.mrf.mxu0 }
 0x1c6   : > { %14788 = vst [vmem:[#allocation58_spill] sm:$0xff] %v12443_v58  ;;  %v12473_v2 = vpop.f32.mrf.mxu1 }
 0x1c7   : > { %v10399_v0 = vpop.f32.mrf.mxu0 }
 0x1c8   : > { %v12463_v20 = vadd.f32 %v10399_v0, %v12340_v32  ;;  %v12480_v32 = vpop.f32.mrf.mxu1 }
 0x1c9   : > { %v12467_v58 = vpop.f32.mrf.mxu0 }
 0x1ca   : > { %14792 = vst [vmem:[#allocation61_spill] sm:$0xff] %v12463_v20  ;;  %14793 = vst [vmem:[#allocation62_spill] sm:$0xff] %v12467_v58  ;;  %v12487_v36 = vpop.f32.mrf.mxu1 }
 0x1cb   : > { %v10402_v21 = vpop.f32.mrf.mxu0 }
 0x1cc   : > { %v12471_v44 = vadd.f32 %v10402_v21, %v12347_v37 }
 0x1cd   : > { %v12475_v15 = vpop.f32.mrf.mxu0 }
 0x1ce   : > { %14794 = vst [vmem:[#allocation63_spill] sm:$0xff] %v12471_v44  ;;  %14795 = vst [vmem:[#allocation64_spill] sm:$0xff] %v12475_v15  ;;  %v12494_v15 = vpop.f32.mrf.mxu1 }
 0x1cf   : > { %v10405_v50 = vpop.f32.mrf.mxu0 }
 0x1d0   : > { %v12478_v25 = vadd.f32 %v10405_v50, %v12354_v22 }
 0x1d1   : > { %v12482_v0 = vpop.f32.mrf.mxu0 }
 0x1d2   : > { %14796 = vst [vmem:[#allocation65_spill] sm:$0xff] %v12478_v25  ;;  %14797 = vst [vmem:[#allocation66_spill] sm:$0xff] %v12482_v0  ;;  %v12501_v0 = vpop.f32.mrf.mxu1 }
 0x1d3   : > { %v10408_v20 = vpop.f32.mrf.mxu0 }
 0x1d4   : > { %v12485_v58 = vadd.f32 %v10408_v20, %v12361_v35 }
 0x1d5   : > { %v12489_v21 = vpop.f32.mrf.mxu0 }
 0x1d6   : > { %14798 = vst [vmem:[#allocation67_spill] sm:$0xff] %v12485_v58  ;;  %14799 = vst [vmem:[#allocation68_spill] sm:$0xff] %v12489_v21  ;;  %v12508_v21 = vpop.f32.mrf.mxu1 }
 0x1d7   : > { %v10411_v37 = vpop.f32.mrf.mxu0 }
 0x1d8   : > { %v12492_v44 = vadd.f32 %v10411_v37, %v12368_v18 }
 0x1d9   : > { %v12496_v22 = vpop.f32.mrf.mxu0 }
 0x1da   : > { %14800 = vst [vmem:[#allocation69_spill] sm:$0xff] %v12492_v44  ;;  %14801 = vst [vmem:[#allocation70_spill] sm:$0xff] %v12496_v22  ;;  %v12515_v22 = vpop.f32.mrf.mxu1 }
 0x1db   : > { %v10414_v50 = vpop.f32.mrf.mxu0 }
 0x1dc   : > { %v12499_v25 = vadd.f32 %v10414_v50, %v12375_v24 }
 0x1dd   : > { %v12503_v35 = vpop.f32.mrf.mxu0 }
 0x1de   : > { %14802 = vst [vmem:[#allocation71_spill] sm:$0xff] %v12499_v25  ;;  %14803 = vst [vmem:[#allocation72_spill] sm:$0xff] %v12503_v35  ;;  %v2708_v25 = vadd.f32 %v12134_v42, %v12137_v45 }
 0x1df   : > { %v10417_v20 = vpop.f32.mrf.mxu0 }
 0x1e0   : > { %v12506_v58 = vadd.f32 %v10417_v20, %v12382_v27  ;;  %v12524_v27 = vpop.f32.mrf.mxu1 }
 0x1e1   : > { %v12510_v18 = vpop.f32.mrf.mxu0 }
 0x1e2   : > { %14804 = vst [vmem:[#allocation73_spill] sm:$0xff] %v12506_v58  ;;  %14805 = vst [vmem:[#allocation74_spill] sm:$0xff] %v12510_v18  ;;  %v3098_v58 = vadd.f32 %v12301_v63, %v2708_v25 }
 0x1e3   : > { %v10420_v37 = vpop.f32.mrf.mxu0 }
 0x1e4   : > { %v12513_v44 = vadd.f32 %v10420_v37, %v12389_v30  ;;  %v2710_v30 = vadd.f32 %v12146_v29, %v12149_v13  ;;  %v3488_v42 = vadd.f32 %v12303_v53, %v3098_v58  ;;  %v2714_v53 = vadd.f32 %v12170_v39, %v12173_v38 }
 0x1e5   : > { %v12517_v24 = vpop.f32.mrf.mxu0  ;;  %v2716_v39 = vadd.f32 %v12182_v57, %v12185_v5 }
 0x1e6   : > { %14806 = vst [vmem:[#allocation75_spill] sm:$0xff] %v12513_v44  ;;  %14807 = vst [vmem:[#allocation76_spill] sm:$0xff] %v12517_v24  ;;  %v12534_v44 = vpop.f32.mrf.mxu1  ;;  %v3100_v45 = vadd.f32 %v12308_v43, %v2710_v30  ;;  %v3879_v63 = vadd.f32 %v12417_v1, %v3488_v42 }
 0x1e7   : > { %v10423_v50 = vpop.f32.mrf.mxu0 }
 0x1e8   : > { %v12522_v35 = vadd.f32 %v10423_v50, %v12396_v52  ;;  %v2712_v50 = vadd.f32 %v12158_v17, %v12161_v34  ;;  %v12546_v29 = vpop.f32.mrf.mxu1  ;;  %v4270_v17 = vadd.f32 %v12412_v28, %v12415_v4  ;;  %v4269_v34 = vadd.f32 %v12419_v19, %v3879_v63 }
 0x1e9   : > { %v12526_v20 = vpop.f32.mrf.mxu0  ;;  %v4272_v28 = vadd.f32 %v12426_v11, %v12422_v60 }
 0x1eb   : > { %v10426_v18 = vpop.f32.mrf.mxu0 }
 0x1ec   : > { %v12532_v37 = vadd.f32 %v10426_v18, %v12403_v6  ;;  %v3490_v6 = vadd.f32 %v12310_v49, %v3100_v45  ;;  %v3102_v18 = vadd.f32 %v12315_v47, %v2712_v50  ;;  %v3104_v49 = vadd.f32 %v12322_v54, %v2714_v53 }
 0x1ed   : > { %v12536_v24 = vpop.f32.mrf.mxu0  ;;  %v3106_v54 = vadd.f32 %v12329_v14, %v2716_v39  ;;  %v4274_v14 = vadd.f32 %v12438_v61, %v12429_v56 }
 0x1ee   : > { %v3881_v43 = vadd.f32 %v12424_v9, %v3490_v6  ;;  %v3492_v30 = vadd.f32 %v12317_v7, %v3102_v18 }
 0x1ef   : > { %v10429_v52 = vpop.f32.mrf.mxu0  ;;  %v3496_v6 = vadd.f32 %v12331_v55, %v3106_v54  ;;  %v4276_v55 = vadd.f32 %v12465_v26, %v12436_v41  ;;  %v14810_v26 = vld [vmem:[#allocation20_spill] sm:$0xff] }
 0x1f0   : > { %v12544_v25 = vadd.f32 %v10429_v52, %v12410_v23  ;;  %v12558_v23 = vpop.f32.mrf.mxu1  ;;  %v4271_v4 = vadd.f32 %v12431_v40, %v3881_v43  ;;  %v3883_v19 = vadd.f32 %v12433_v51, %v3492_v30  ;;  %v3494_v52 = vadd.f32 %v12324_v48, %v3104_v49  ;;  %v14808_v30 = vld [vmem:[#allocation38_spill] sm:$0xff] }
 0x1f1   : > { %v12548_v13 = vpop.f32.mrf.mxu0  ;;  %v2718_v40 = vadd.f32 %v12194_v16, %v12197_v8  ;;  %v3887_v43 = vadd.f32 %v12447_v3, %v3496_v6 }
 0x1f2   : > { %v12575_v9 = vpop.f32.mrf.mxu1  ;;  %v4273_v50 = vadd.f32 %v12445_v10, %v3883_v19  ;;  %v3885_v63 = vadd.f32 %v12440_v62, %v3494_v52  ;;  %v2720_v10 = vadd.f32 %v12206_v46, %v12209_v31 }
 0x1f3   : > { %v10484_v58 = vpop.f32.mrf.mxu0  ;;  %v3108_v16 = vadd.f32 %v12336_v59, %v2718_v40  ;;  %v14814_v40 = vld [vmem:[#allocation62_spill] sm:$0xff] }
 0x1f4   : > { %v12562_v42 = vadd.f32 %v10484_v58, %v4270_v17  ;;  %v12593_v18 = vpop.f32.mrf.mxu1  ;;  %v3110_v49 = vadd.f32 %v14808_v30, %v2720_v10  ;;  %v14821_v30 = vld [vmem:[#allocation61_spill] sm:$0xff] }
 0x1f5   : > { %v4500_v1 = vpop.f32.mrf.mxu0 }
 0x1f6   : > { %v12564_v47 = vadd.f32 %v4500_v1, %v4269_v34  ;;  %v4692_v57 = vsel %vm212_vm1, %v12562_v42, 0.0  ;;  %v4275_v34 = vadd.f32 %v12473_v2, %v3885_v63  ;;  %v1882_v1 = vadd.f32 %v12042_v12, %v12040_v33  ;;  %v12613_v39 = vpop.f32.mrf.mxu1 }
 0x1f7   : > { %v10487_v38 = vpop.f32.mrf.mxu0 }
 0x1f8   : > { %v4691_v7 = vsel %vm212_vm1, %v12564_v47, 0.0  ;;  %v12580_v5 = vadd.f32 %v10487_v38, %v4272_v28  ;;  %v14809_v38 = vld [vmem:[#allocation37_spill] sm:$0xff] }
 0x1f9   : > { %v4510_v45 = vpop.f32.mrf.mxu0  ;;  %v4693_v60 = vadd.f32 %v4692_v57, %v4691_v7  ;;  %v3498_v28 = vadd.f32 %v14809_v38, %v3108_v16  ;;  %v14812_v7 = vld [vmem:[#allocation21_spill] sm:$0xff]  ;;  %v4277_v57 = vadd.f32 %v12487_v36, %v3887_v43 }
 0x1fa   : > { %v12582_v11 = vadd.f32 %v4510_v45, %v4271_v4  ;;  %v4696_v8 = vsel %vm212_vm1, %v12580_v5, 0.0  ;;  %v14811_v4 = vld [vmem:[#allocation19_spill] sm:$0xff]  ;;  %v2334_v33 = vadd.f32 %v14812_v7, %v1882_v1  ;;  %v14813_v45 = vld [vmem:[#allocation58_spill] sm:$0xff] }
 0x1fb   : > { %v10490_v51 = vpop.f32.mrf.mxu0  ;;  %v2722_v19 = vadd.f32 %v14811_v4, %v14810_v26  ;;  %v4278_v52 = vadd.f32 %v12480_v32, %v14813_v45  ;;  %v14824_v26 = vld [vmem:[#allocation12_spill] sm:$0xff]  ;;  %v14826_v45 = vld [vmem:[#allocation41_spill] sm:$0xff] }
 0x1fc   : > { %v4694_v48 = vsel %vm212_vm1, %v12582_v11, 0.0  ;;  %v12598_v17 = vadd.f32 %v10490_v51, %v4274_v14  ;;  %v14815_v14 = vld [vmem:[#allocation9_spill] sm:$0xff] }
 0x1fd   : > { %v4695_v58 = vadd.f32 %v4694_v48, %v4693_v60  ;;  %v4520_v53 = vpop.f32.mrf.mxu0  ;;  %v3889_v60 = vadd.f32 %v14814_v40, %v3498_v28  ;;  %v14817_v48 = vld [vmem:[#allocation39_spill] sm:$0xff]  ;;  %v14827_v40 = vld [vmem:[#allocation24_spill] sm:$0xff] }
 0x1fe   : > { %v12600_v61 = vadd.f32 %v4520_v53, %v4273_v50  ;;  %v4700_v41 = vsel %vm212_vm1, %v12598_v17, 0.0  ;;  %v14816_v50 = vld [vmem:[#allocation10_spill] sm:$0xff]  ;;  %v3500_v6 = vadd.f32 %v14817_v48, %v3110_v49  ;;  %v4280_v49 = vadd.f32 %v12494_v15, %v14821_v30  ;;  %v14829_v48 = vld [vmem:[#allocation63_spill] sm:$0xff] }
 0x1ff   : > { %v4697_v56 = vadd.f32 %v4696_v8, %v4695_v58  ;;  %v10493_v62 = vpop.f32.mrf.mxu0  ;;  %v1892_v63 = vadd.f32 %v14816_v50, %v14815_v14  ;;  %v12634_v58 = vpop.f32.mrf.mxu1  ;;  %v14818_v8 = vld [vmem:[#allocation40_spill] sm:$0xff] }
 0x200   : > { %v4698_v59 = vsel %vm212_vm1, %v12600_v61, 0.0  ;;  %v12618_v2 = vadd.f32 %v10493_v62, %v4276_v55  ;;  %v3112_v10 = vadd.f32 %v14818_v8, %v2722_v19  ;;  %v14819_v62 = vld [vmem:[#allocation22_spill] sm:$0xff] }
 0x201   : > { %v4699_v46 = vadd.f32 %v4698_v59, %v4697_v56  ;;  %v4530_v31 = vpop.f32.mrf.mxu0  ;;  %v2724_v55 = vadd.f32 %v14819_v62, %v2334_v33  ;;  %v14825_v19 = vld [vmem:[#allocation42_spill] sm:$0xff]  ;;  %v12654_v33 = vpop.f32.mrf.mxu1 }
 0x202   : > { %v12620_v3 = vadd.f32 %v4530_v31, %v4275_v34  ;;  %v4704_v32 = vsel %vm212_vm1, %v12618_v2, 0.0  ;;  %v14820_v34 = vld [vmem:[#allocation23_spill] sm:$0xff]  ;;  %v14822_v31 = vld [vmem:[#allocation64_spill] sm:$0xff]  ;;  %v14832_v62 = vld [vmem:[#allocation14_spill] sm:$0xff] }
 0x203   : > { %v4701_v12 = vadd.f32 %v4700_v41, %v4699_v46  ;;  %v10496_v54 = vpop.f32.mrf.mxu0  ;;  %v2336_v43 = vadd.f32 %v14820_v34, %v1892_v63  ;;  %v4279_v46 = vadd.f32 %v12501_v0, %v3889_v60  ;;  %v3891_v38 = vadd.f32 %v14822_v31, %v3500_v6  ;;  %v14823_v41 = vld [vmem:[#allocation11_spill] sm:$0xff] }
 0x204   : > { %v4702_v51 = vsel %vm212_vm1, %v12620_v3, 0.0  ;;  %v12639_v36 = vadd.f32 %v10496_v54, %v4278_v52  ;;  %v1902_v4 = vadd.f32 %v14824_v26, %v14823_v41  ;;  %v3114_v7 = vadd.f32 %v14825_v19, %v2724_v55  ;;  %v14833_v34 = vld [vmem:[#allocation43_spill] sm:$0xff] }
 0x205   : > { %v4703_v53 = vadd.f32 %v4702_v51, %v4701_v12  ;;  %v4540_v16 = vpop.f32.mrf.mxu0  ;;  %v3502_v52 = vadd.f32 %v14826_v45, %v3112_v10  ;;  %v2726_v60 = vadd.f32 %v14827_v40, %v2336_v43  ;;  %v14828_v51 = vld [vmem:[#allocation25_spill] sm:$0xff]  ;;  %v4282_v6 = vadd.f32 %v12508_v21, %v14829_v48  ;;  %v12674_v43 = vpop.f32.mrf.mxu1  ;;  %v14836_v41 = vld [vmem:[#allocation27_spill] sm:$0xff]  ;;  %v14838_v45 = vld [vmem:[#allocation68_spill] sm:$0xff] }
 0x206   : > { %v12641_v56 = vadd.f32 %v4540_v16, %v4277_v57  ;;  %v4708_v15 = vsel %vm212_vm1, %v12639_v36, 0.0  ;;  %v2338_v14 = vadd.f32 %v14828_v51, %v1902_v4  ;;  %v14830_v16 = vld [vmem:[#allocation66_spill] sm:$0xff]  ;;  %v14839_v40 = vld [vmem:[#allocation5_spill] sm:$0xff] }
 0x207   : > { %v4705_v59 = vadd.f32 %v4704_v32, %v4703_v53  ;;  %v10499_v1 = vpop.f32.mrf.mxu0  ;;  %v4281_v53 = vadd.f32 %v12515_v22, %v3891_v38  ;;  %v3893_v8 = vadd.f32 %v14830_v16, %v3502_v52  ;;  %v14831_v32 = vld [vmem:[#allocation13_spill] sm:$0xff]  ;;  %v14835_v38 = vld [vmem:[#allocation26_spill] sm:$0xff] }
 0x208   : > { %v4706_v28 = vsel %vm212_vm1, %v12641_v56, 0.0  ;;  %v12659_v0 = vadd.f32 %v10499_v1, %v4280_v49  ;;  %v1912_v55 = vadd.f32 %v14832_v62, %v14831_v32  ;;  %v14834_v49 = vld [vmem:[#allocation44_spill] sm:$0xff]  ;;  %v14844_v62 = vld [vmem:[#allocation29_spill] sm:$0xff] }
 0x209   : > { %v4707_v12 = vadd.f32 %v4706_v28, %v4705_v59  ;;  %v4550_v54 = vpop.f32.mrf.mxu0  ;;  %v3504_v59 = vadd.f32 %v14833_v34, %v3114_v7  ;;  %v2728_v28 = vadd.f32 %v14835_v38, %v2338_v14  ;;  %v14837_v7 = vld [vmem:[#allocation65_spill] sm:$0xff]  ;;  %v12694_v14 = vpop.f32.mrf.mxu1 }
 0x20a   : > { %v12661_v57 = vadd.f32 %v4550_v54, %v4279_v46  ;;  %v3116_v46 = vadd.f32 %v14834_v49, %v2726_v60  ;;  %v4712_v21 = vsel %vm212_vm1, %v12659_v0, 0.0  ;;  %v2340_v26 = vadd.f32 %v14836_v41, %v1912_v55  ;;  %v14840_v60 = vld [vmem:[#allocation15_spill] sm:$0xff] }
 0x20b   : > { %v4709_v50 = vadd.f32 %v4708_v15, %v4707_v12  ;;  %v10502_v63 = vpop.f32.mrf.mxu0  ;;  %v4284_v12 = vadd.f32 %v12524_v27, %v14837_v7  ;;  %v4283_v54 = vadd.f32 %v12534_v44, %v3893_v8  ;;  %v3895_v52 = vadd.f32 %v14838_v45, %v3504_v59  ;;  %v14848_v41 = vld [vmem:[#allocation7_spill] sm:$0xff]  ;;  %v14850_v45 = vld [vmem:[#allocation48_spill] sm:$0xff] }
 0x20c   : > { %v4710_v10 = vsel %vm212_vm1, %v12661_v57, 0.0  ;;  %v12679_v22 = vadd.f32 %v10502_v63, %v4282_v6  ;;  %v1922_v51 = vadd.f32 %v14840_v60, %v14839_v40  ;;  %v14851_v40 = vld [vmem:[#allocation30_spill] sm:$0xff] }
 0x20d   : > { %v4711_v1 = vadd.f32 %v4710_v10, %v4709_v50  ;;  %v4560_v30 = vpop.f32.mrf.mxu0  ;;  %v14841_v50 = vld [vmem:[#allocation46_spill] sm:$0xff]  ;;  %v14843_v10 = vld [vmem:[#allocation28_spill] sm:$0xff]  ;;  %v4285_v49 = vadd.f32 %v12558_v23, %v3895_v52 }
 0x20e   : > { %v12681_v31 = vadd.f32 %v4560_v30, %v4281_v53  ;;  %v3118_v63 = vadd.f32 %v14841_v50, %v2728_v28  ;;  %v14842_v53 = vld [vmem:[#allocation45_spill] sm:$0xff]  ;;  %v4716_v27 = vsel %vm212_vm1, %v12679_v22, 0.0  ;;  %v2730_v32 = vadd.f32 %v14843_v10, %v2340_v26  ;;  %v14847_v28 = vld [vmem:[#allocation6_spill] sm:$0xff]  ;;  %v12714_v26 = vpop.f32.mrf.mxu1 }
 0x20f   : > { %v4713_v4 = vadd.f32 %v4712_v21, %v4711_v1  ;;  %v10505_v19 = vpop.f32.mrf.mxu0  ;;  %v3506_v16 = vadd.f32 %v14842_v53, %v3116_v46  ;;  %v2342_v55 = vadd.f32 %v14844_v62, %v1922_v51  ;;  %v14845_v1 = vld [vmem:[#allocation67_spill] sm:$0xff]  ;;  %v14846_v21 = vld [vmem:[#allocation70_spill] sm:$0xff]  ;;  %v14855_v62 = vld [vmem:[#allocation8_spill] sm:$0xff] }
 0x210   : > { %v4714_v15 = vsel %vm212_vm1, %v12681_v31, 0.0  ;;  %v12699_v44 = vadd.f32 %v10505_v19, %v4284_v12  ;;  %v4286_v30 = vadd.f32 %v12546_v29, %v14845_v1  ;;  %v14849_v19 = vld [vmem:[#allocation47_spill] sm:$0xff]  ;;  %v14857_v1 = vld [vmem:[#allocation50_spill] sm:$0xff] }
 0x211   : > { %v4715_v48 = vadd.f32 %v4714_v15, %v4713_v4  ;;  %v4570_v6 = vpop.f32.mrf.mxu0  ;;  %v3897_v46 = vadd.f32 %v14846_v21, %v3506_v16  ;;  %v1932_v4 = vadd.f32 %v14848_v41, %v14847_v28  ;;  %v3508_v7 = vadd.f32 %v14849_v19, %v3118_v63  ;;  %v14852_v51 = vld [vmem:[#allocation31_spill] sm:$0xff]  ;;  %v14853_v63 = vld [vmem:[#allocation69_spill] sm:$0xff] }
 0x212   : > { %v12701_v8 = vadd.f32 %v4570_v6, %v4283_v54  ;;  %v3120_v15 = vadd.f32 %v14850_v45, %v2730_v32  ;;  %v4720_v29 = vsel %vm212_vm1, %v12699_v44, 0.0  ;;  %v2732_v60 = vadd.f32 %v14851_v40, %v2342_v55  ;;  %v10473_v55 = vpop.f32.mrf.mxu1  ;;  %v14860_v19 = vld [vmem:[#allocation33_spill] sm:$0xff]  ;;  %v14861_v45 = vld [vmem:[#allocation71_spill] sm:$0xff] }
 0x213   : > { %v4717_v34 = vadd.f32 %v4716_v27, %v4715_v48  ;;  %v10508_v59 = vpop.f32.mrf.mxu0  ;;  %v2344_v50 = vadd.f32 %v14852_v51, %v1932_v4  ;;  %v4288_v53 = vadd.f32 %v12575_v9, %v14853_v63  ;;  %v4287_v16 = vadd.f32 %v12593_v18, %v3897_v46  ;;  %v14854_v27 = vld [vmem:[#allocation72_spill] sm:$0xff] }
 0x214   : > { %v4718_v38 = vsel %vm212_vm1, %v12701_v8, 0.0  ;;  %v12719_v23 = vadd.f32 %v10508_v59, %v4286_v30  ;;  %v3899_v10 = vadd.f32 %v14854_v27, %v3508_v7  ;;  %v3122_v30 = vadd.f32 %v14857_v1, %v2732_v60  ;;  %v14859_v46 = vld [vmem:[#allocation32_spill] sm:$0xff]  ;;  %v14862_v60 = vld [vmem:[#allocation74_spill] sm:$0xff] }
 0x215   : > { %v4719_v12 = vadd.f32 %v4718_v38, %v4717_v34  ;;  %v4580_v54 = vpop.f32.mrf.mxu0  ;;  %v14856_v34 = vld [vmem:[#allocation16_spill] sm:$0xff]  ;;  %v14858_v38 = vld [vmem:[#allocation49_spill] sm:$0xff]  ;;  %v2734_v4 = vadd.f32 %v14859_v46, %v2344_v50  ;;  %v4240_v50 = vpop.f32.mrf.mxu1  ;;  %v14867_v1 = vld [vmem:[#allocation34_spill] sm:$0xff] }
 0x216   : > { %v12721_v52 = vadd.f32 %v4580_v54, %v4285_v49  ;;  %v1942_v59 = vadd.f32 %v14856_v34, %v14855_v62  ;;  %v3510_v28 = vadd.f32 %v14858_v38, %v3120_v15  ;;  %v4724_v9 = vsel %vm212_vm1, %v12719_v23, 0.0  ;;  %v14866_v62 = vld [vmem:[#allocation52_spill] sm:$0xff] }
 0x217   : > { %v4721_v48 = vadd.f32 %v4720_v29, %v4719_v12  ;;  %v10511_v6 = vpop.f32.mrf.mxu0  ;;  %v4290_v29 = vadd.f32 %v12613_v39, %v14861_v45  ;;  %v4289_v40 = vadd.f32 %v12634_v58, %v3899_v10  ;;  %v3124_v34 = vadd.f32 %v14866_v62, %v2734_v4  ;;  %v9177_v10 = vld [vmem:[%s14679_s3 + $0x4] sm:$0xf]  ;;  %v14871_v45 = vld [vmem:[#allocation54_spill] sm:$0xff] }
 0x218   : > { %v4722_v32 = vsel %vm212_vm1, %v12721_v52, 0.0  ;;  %v12737_v41 = vadd.f32 %v10511_v6, %v4288_v53  ;;  %v2346_v7 = vadd.f32 %v14860_v19, %v1942_v59  ;;  %v3901_v15 = vadd.f32 %v14862_v60, %v3510_v28  ;;  %v14864_v6 = vld [vmem:[#allocation18_spill] sm:$0xff]  ;;  %v14865_v53 = vld [vmem:[#allocation51_spill] sm:$0xff]  ;;  %10530 = vmatprep.subr.msk.mxu1 %vm1407_vm0, %v9177_v10  ;;  %v14870_v19 = vld [vmem:[#allocation76_spill] sm:$0xff] }
 0x219   : > { %v4723_v49 = vadd.f32 %v4722_v32, %v4721_v48  ;;  %v4590_v21 = vpop.f32.mrf.mxu0  ;;  %v14863_v48 = vld [vmem:[#allocation17_spill] sm:$0xff]  ;;  %10531 = vmatpush3.msk.msra.mxu1 %vm1407_vm0, %v9177_v10  ;;  %v14875_v10 = vld [vmem:[#allocation55_spill] sm:$0xff] }
 0x21a   : > { %v12739_v18 = vadd.f32 %v4590_v21, %v4287_v16  ;;  %v1952_v63 = vadd.f32 %v14864_v6, %v14863_v48  ;;  %v3512_v16 = vadd.f32 %v14865_v53, %v3122_v30  ;;  %v4728_v39 = vsel %vm212_vm1, %v12737_v41, 0.0  ;;  %v14868_v21 = vld [vmem:[#allocation35_spill] sm:$0xff] }
 0x21b   : > { %v4725_v12 = vadd.f32 %v4724_v9, %v4723_v49  ;;  %v10514_v54 = vpop.f32.mrf.mxu0  ;;  %v2736_v49 = vadd.f32 %v14867_v1, %v2346_v7  ;;  %v14869_v9 = vld [vmem:[#allocation73_spill] sm:$0xff]  ;;  %v4291_v4 = vadd.f32 %v12674_v43, %v3901_v15  ;;  %v14873_v15 = vld [vmem:[#allocation36_spill] sm:$0xff] }
 0x21c   : > { %v4726_v51 = vsel %vm212_vm1, %v12739_v18, 0.0  ;;  %v12755_v59 = vadd.f32 %v10514_v54, %v4290_v29  ;;  %v2348_v30 = vadd.f32 %v14868_v21, %v1952_v63  ;;  %v4292_v46 = vadd.f32 %v12654_v33, %v14869_v9  ;;  %v10476_v29 = vpop.f32.mrf.mxu1 }
 0x21d   : > { %v4727_v27 = vadd.f32 %v4726_v51, %v4725_v12  ;;  %v4600_v32 = vpop.f32.mrf.mxu0  ;;  %v3903_v12 = vadd.f32 %v14870_v19, %v3512_v16  ;;  %v3126_v7 = vadd.f32 %v14871_v45, %v2736_v49  ;;  %v14872_v51 = vld [vmem:[#allocation53_spill] sm:$0xff] }
 0x21e   : > { %v12757_v58 = vadd.f32 %v4600_v32, %v4289_v40  ;;  %v3514_v48 = vadd.f32 %v14872_v51, %v3124_v34  ;;  %v4732_v6 = vsel %vm212_vm1, %v12755_v59, 0.0  ;;  %v2738_v63 = vadd.f32 %v14873_v15, %v2348_v30  ;;  %v4250_v49 = vpop.f32.mrf.mxu1 }
 0x21f   : > { %v4729_v38 = vadd.f32 %v4728_v39, %v4727_v27  ;;  %v10517_v28 = vpop.f32.mrf.mxu0  ;;  %v14874_v27 = vld [vmem:[#allocation75_spill] sm:$0xff]  ;;  %v4293_v62 = vadd.f32 %v12714_v26, %v3903_v12  ;;  %v3516_v1 = vadd.f32 %v14875_v10, %v3126_v7 }
 0x220   : > { %v4730_v54 = vsel %vm212_vm1, %v12757_v58, 0.0  ;;  %v12776_v33 = vadd.f32 %v10517_v28, %v4292_v46  ;;  %v4294_v32 = vadd.f32 %v12694_v14, %v14874_v27  ;;  %v3905_v39 = vadd.f32 %v12526_v20, %v3514_v48  ;;  %v14876_v28 = vld [vmem:[#allocation56_spill] sm:$0xff]  ;;  %v10479_v45 = vpop.f32.mrf.mxu1 }
 0x221   : > { %v4731_v40 = vadd.f32 %v4730_v54, %v4729_v38  ;;  %v4610_v60 = vpop.f32.mrf.mxu0  ;;  %v3128_v9 = vadd.f32 %v14876_v28, %v2738_v63  ;;  %v4296_v20 = vadd.f32 %v10473_v55, %v12522_v35  ;;  %v3907_v12 = vadd.f32 %v12536_v24, %v3516_v1 }
 0x222   : > { %v12778_v43 = vadd.f32 %v4610_v60, %v4291_v4  ;;  %v4736_v30 = vsel %vm212_vm1, %v12776_v33, 0.0  ;;  %v4295_v19 = vadd.f32 %v4240_v50, %v3905_v39  ;;  %v14877_v60 = vld [vmem:[#allocation57_spill] sm:$0xff]  ;;  %v4298_v55 = vadd.f32 %v10476_v29, %v12532_v37 }
 0x223   : > { %v4733_v53 = vadd.f32 %v4732_v6, %v4731_v40  ;;  %v10520_v16 = vpop.f32.mrf.mxu0  ;;  %v3518_v51 = vadd.f32 %v14877_v60, %v3128_v9  ;;  %v4297_v24 = vadd.f32 %v4250_v49, %v3907_v12  ;;  %v4300_v37 = vadd.f32 %v10479_v45, %v12544_v25 }
 0x224   : > { %v4734_v34 = vsel %vm212_vm1, %v12778_v43, 0.0  ;;  %v12791_v46 = vadd.f32 %v10520_v16, %v4294_v32  ;;  %v4260_v16 = vpop.f32.mrf.mxu1 }
 0x225   : > { %v4735_v21 = vadd.f32 %v4734_v34, %v4733_v53  ;;  %v4620_v38 = vpop.f32.mrf.mxu0  ;;  %v3909_v50 = vadd.f32 %v12548_v13, %v3518_v51  ;;  %v5048_v51 = vld [vmem:[#allocation2 + $0x1] sm:$0xff] }
 0x226   : > { %v12793_v14 = vadd.f32 %v4620_v38, %v4293_v62  ;;  %v4740_v48 = vsel %vm212_vm1, %v12791_v46, 0.0  ;;  %10532 = vmatprep.mubr.msk.f32.mxu1 %vm212_vm1, %v5048_v51 }
 0x227   : > { %v4737_v26 = vadd.f32 %v4736_v30, %v4735_v21  ;;  %v10523_v4 = vpop.f32.mrf.mxu0  ;;  %v4299_v29 = vadd.f32 %v4260_v16, %v3909_v50 }
 0x228   : > { %v4738_v54 = vsel %vm212_vm1, %v12793_v14, 0.0  ;;  %v12802_v6 = vadd.f32 %v10523_v4, %v4296_v20 }
 0x229   : > { %v4739_v7 = vadd.f32 %v4738_v54, %v4737_v26  ;;  %v4630_v40 = vpop.f32.mrf.mxu0 }
 0x22a   : > { %v12804_v15 = vadd.f32 %v4630_v40, %v4295_v19  ;;  %v4744_v62 = vsel %vm212_vm1, %v12802_v6, 0.0 }
 0x22b   : > { %v4741_v63 = vadd.f32 %v4740_v48, %v4739_v7  ;;  %v10526_v35 = vpop.f32.mrf.mxu0  ;;  %v5047_v7 = vld [vmem:[%s14679_s3] sm:$0xf] }
 0x22c   : > { %v4742_v53 = vsel %vm212_vm1, %v12804_v15, 0.0  ;;  %v12812_v39 = vadd.f32 %v10526_v35, %v4298_v55  ;;  %10580 = vmatprep.subr.msk.mxu0 %vm1407_vm0, %v5047_v7  ;;  %v5015_v48 = vld [vmem:[#allocation2] sm:$0xff]  ;;  %v5016_v35 = vld [vmem:[#allocation2 + $0x8] sm:$0xff] }
 0x22d   : > { %v4743_v27 = vadd.f32 %v4742_v53, %v4741_v63  ;;  %v4640_v32 = vpop.f32.mrf.mxu0  ;;  %10581 = vmatpush3.msk.msra.mxu0 %vm1407_vm0, %v5047_v7  ;;  %v5049_v63 = vld [vmem:[#allocation2 + $0x9] sm:$0xff]  ;;  %10582 = vmatprep.mubr.msk.f32.mxu0 %vm212_vm1, %v5015_v48 }
 0x22e   : > { %v12814_v34 = vadd.f32 %v4640_v32, %v4297_v24  ;;  %v4748_v38 = vsel %vm212_vm1, %v12812_v39, 0.0  ;;  %v9244_v24 = vld [vmem:[%s14679_s3 + $0x8] sm:$0xf]  ;;  %10533 = vmatmul.mubr.msk.f32.vlgmr.msra.gmra.mxu1 %vm212_vm1, %v5049_v63  ;;  %10583 = vmatmul.mubr.msk.f32.vlgmr.msra.gmra.mxu0 %vm212_vm1, %v5016_v35 }
 0x22f   : > { %v4745_v10 = vadd.f32 %v4744_v62, %v4743_v27  ;;  %v10529_v1 = vpop.f32.mrf.mxu0  ;;  %10630 = vmatprep.subr.msk.mxu1 %vm1407_vm0, %v9244_v24 }
 0x230   : > { %v4746_v13 = vsel %vm212_vm1, %v12814_v34, 0.0  ;;  %v12821_v28 = vadd.f32 %v10529_v1, %v4300_v37  ;;  %10631 = vmatpush3.msk.msra.mxu1 %vm1407_vm0, %v9244_v24 }
 0x231   : > { %v4747_v49 = vadd.f32 %v4746_v13, %v4745_v10  ;;  %v4650_v21 = vpop.f32.mrf.mxu0 }
 0x232   : > { %v12823_v9 = vadd.f32 %v4650_v21, %v4299_v29  ;;  %v4752_v25 = vsel %vm212_vm1, %v12821_v28, 0.0 }
 0x233   : > { %v4749_v30 = vadd.f32 %v4748_v38, %v4747_v49 }
 0x234   : > { %v4750_v26 = vsel %vm212_vm1, %v12823_v9, 0.0 }
 0x235   : > { %v4751_v4 = vadd.f32 %v4750_v26, %v4749_v30 }
 0x237   : > { %v4753_v20 = vadd.f32 %v4752_v25, %v4751_v4 }
 0x239   : > { %v4754_v19 = vrot.slane %v4753_v20, 4 }
 0x23b   : > { %v4755_v12 = vadd.f32 %v4754_v19, %v4753_v20 }
 0x23d   : > { %v4756_v54 = vrot.slane %v4755_v12, 2 }
 0x23f   : > { %v4757_v45 = vadd.f32 %v4756_v54, %v4755_v12 }
 0x241   : > { %v4758_v40 = vrot.slane %v4757_v45, 1 }
 0x243   : > { %v4759_v60 = vadd.f32 %v4758_v40, %v4757_v45 }
 0x245   : > { %v12835_v55 = vmul.f32 0.00390625, %v4759_v60 }
 0x247   : > { %v4762_v50 = vsub.f32 %v12564_v47, %v12835_v55  ;;  %v4763_v53 = vsub.f32 %v12562_v42, %v12835_v55  ;;  %v4764_v16 = vsub.f32 %v12582_v11, %v12835_v55  ;;  %v4765_v27 = vsub.f32 %v12580_v5, %v12835_v55 }
 0x248   : > { %v4766_v10 = vsub.f32 %v12600_v61, %v12835_v55  ;;  %v4767_v37 = vsub.f32 %v12598_v17, %v12835_v55  ;;  %v4768_v38 = vsub.f32 %v12620_v3, %v12835_v55  ;;  %v4769_v25 = vsub.f32 %v12618_v2, %v12835_v55 }
 0x249   : > { %v4794_v32 = vmul.f32 %v4762_v50, %v4762_v50  ;;  %v4795_v62 = vmul.f32 %v4763_v53, %v4763_v53  ;;  %v4796_v1 = vmul.f32 %v4764_v16, %v4764_v16  ;;  %v4797_v29 = vmul.f32 %v4765_v27, %v4765_v27 }
 0x24a   : > { %v4798_v30 = vmul.f32 %v4766_v10, %v4766_v10  ;;  %v4799_v20 = vmul.f32 %v4767_v37, %v4767_v37  ;;  %v4770_v54 = vsub.f32 %v12641_v56, %v12835_v55  ;;  %v4800_v45 = vmul.f32 %v4768_v38, %v4768_v38 }
 0x24b   : > { %v4826_v13 = vsel %vm212_vm1, %v4794_v32, 0.0  ;;  %v4827_v49 = vsel %vm212_vm1, %v4795_v62, 0.0  ;;  %v4829_v26 = vsel %vm212_vm1, %v4796_v1, 0.0  ;;  %v4831_v19 = vsel %vm212_vm1, %v4797_v29, 0.0 }
 0x24c   : > { %v4828_v21 = vadd.f32 %v4827_v49, %v4826_v13  ;;  %v4833_v7 = vsel %vm212_vm1, %v4798_v30, 0.0  ;;  %v4771_v60 = vsub.f32 %v12639_v36, %v12835_v55  ;;  %v4801_v51 = vmul.f32 %v4769_v25, %v4769_v25 }
 0x24d   : > { %v4835_v48 = vsel %vm212_vm1, %v4799_v20, 0.0  ;;  %v4772_v35 = vsub.f32 %v12661_v57, %v12835_v55  ;;  %v4802_v24 = vmul.f32 %v4770_v54, %v4770_v54  ;;  %v4837_v50 = vsel %vm212_vm1, %v4800_v45, 0.0 }
 0x24e   : > { %v4830_v4 = vadd.f32 %v4829_v26, %v4828_v21  ;;  %v4773_v16 = vsub.f32 %v12659_v0, %v12835_v55  ;;  %v4803_v27 = vmul.f32 %v4771_v60, %v4771_v60  ;;  %v4839_v32 = vsel %vm212_vm1, %v4801_v51, 0.0 }
 0x24f   : > { %v4774_v10 = vsub.f32 %v12681_v31, %v12835_v55  ;;  %v4804_v1 = vmul.f32 %v4772_v35, %v4772_v35  ;;  %v4841_v37 = vsel %vm212_vm1, %v4802_v24, 0.0  ;;  %v4775_v13 = vsub.f32 %v12679_v22, %v12835_v55 }
 0x250   : > { %v4832_v12 = vadd.f32 %v4831_v19, %v4830_v4  ;;  %v4805_v49 = vmul.f32 %v4773_v16, %v4773_v16  ;;  %v4843_v21 = vsel %vm212_vm1, %v4803_v27, 0.0  ;;  %v4776_v30 = vsub.f32 %v12701_v8, %v12835_v55 }
 0x251   : > { %v4806_v26 = vmul.f32 %v4774_v10, %v4774_v10  ;;  %v4845_v4 = vsel %vm212_vm1, %v4804_v1, 0.0  ;;  %v4777_v20 = vsub.f32 %v12699_v44, %v12835_v55  ;;  %v4807_v19 = vmul.f32 %v4775_v13, %v4775_v13 }
 0x252   : > { %v4834_v40 = vadd.f32 %v4833_v7, %v4832_v12  ;;  %v4847_v12 = vsel %vm212_vm1, %v4805_v49, 0.0  ;;  %v4778_v45 = vsub.f32 %v12721_v52, %v12835_v55  ;;  %v4808_v7 = vmul.f32 %v4776_v30, %v4776_v30 }
 0x253   : > { %v4779_v51 = vsub.f32 %v12719_v23, %v12835_v55  ;;  %v4780_v24 = vsub.f32 %v12739_v18, %v12835_v55  ;;  %v4781_v27 = vsub.f32 %v12737_v41, %v12835_v55  ;;  %v4782_v1 = vsub.f32 %v12757_v58, %v12835_v55 }
 0x254   : > { %v4836_v63 = vadd.f32 %v4835_v48, %v4834_v40  ;;  %v4849_v40 = vsel %vm212_vm1, %v4806_v26, 0.0  ;;  %v4809_v48 = vmul.f32 %v4777_v20, %v4777_v20  ;;  %v4783_v49 = vsub.f32 %v12755_v59, %v12835_v55 }
 0x255   : > { %v4784_v26 = vsub.f32 %v12778_v43, %v12835_v55 }
 0x256   : > { %v4838_v53 = vadd.f32 %v4837_v50, %v4836_v63  ;;  %v4851_v63 = vsel %vm212_vm1, %v4807_v19, 0.0  ;;  %v4810_v50 = vmul.f32 %v4778_v45, %v4778_v45  ;;  %v4785_v19 = vsub.f32 %v12776_v33, %v12835_v55 }
 0x258   : > { %v4840_v62 = vadd.f32 %v4839_v32, %v4838_v53  ;;  %v4853_v53 = vsel %vm212_vm1, %v4808_v7, 0.0  ;;  %v4811_v32 = vmul.f32 %v4779_v51, %v4779_v51  ;;  %v4786_v7 = vsub.f32 %v12793_v14, %v12835_v55 }
 0x25a   : > { %v4842_v29 = vadd.f32 %v4841_v37, %v4840_v62  ;;  %v4855_v62 = vsel %vm212_vm1, %v4809_v48, 0.0  ;;  %v4812_v37 = vmul.f32 %v4780_v24, %v4780_v24  ;;  %v4787_v48 = vsub.f32 %v12791_v46, %v12835_v55 }
 0x25c   : > { %v4844_v38 = vadd.f32 %v4843_v21, %v4842_v29  ;;  %v4857_v29 = vsel %vm212_vm1, %v4810_v50, 0.0  ;;  %v4813_v21 = vmul.f32 %v4781_v27, %v4781_v27  ;;  %v4788_v50 = vsub.f32 %v12804_v15, %v12835_v55 }
 0x25e   : > { %v4846_v25 = vadd.f32 %v4845_v4, %v4844_v38  ;;  %v4859_v38 = vsel %vm212_vm1, %v4811_v32, 0.0  ;;  %v4814_v4 = vmul.f32 %v4782_v1, %v4782_v1  ;;  %v4789_v32 = vsub.f32 %v12802_v6, %v12835_v55  ;;  %v9278_v1 = vld [vmem:[%s14679_s3 + $0xc] sm:$0xf] }
 0x25f   : > { %10680 = vmatprep.subr.msk.mxu0 %vm1407_vm0, %v9278_v1 }
 0x260   : > { %v4848_v54 = vadd.f32 %v4847_v12, %v4846_v25  ;;  %v4861_v25 = vsel %vm212_vm1, %v4812_v37, 0.0  ;;  %v4815_v12 = vmul.f32 %v4783_v49, %v4783_v49  ;;  %v4820_v49 = vmul.f32 %v4788_v50, %v4788_v50  ;;  %10681 = vmatpush3.msk.msra.mxu0 %vm1407_vm0, %v9278_v1 }
 0x262   : > { %v4850_v60 = vadd.f32 %v4849_v40, %v4848_v54  ;;  %v4863_v54 = vsel %vm212_vm1, %v4813_v21, 0.0  ;;  %v4816_v40 = vmul.f32 %v4784_v26, %v4784_v26  ;;  %v4821_v26 = vmul.f32 %v4789_v32, %v4789_v32 }
 0x264   : > { %v4852_v35 = vadd.f32 %v4851_v63, %v4850_v60  ;;  %v4865_v60 = vsel %vm212_vm1, %v4814_v4, 0.0  ;;  %v4817_v63 = vmul.f32 %v4785_v19, %v4785_v19 }
 0x266   : > { %v4854_v16 = vadd.f32 %v4853_v53, %v4852_v35  ;;  %v4867_v35 = vsel %vm212_vm1, %v4815_v12, 0.0  ;;  %v4818_v53 = vmul.f32 %v4786_v7, %v4786_v7  ;;  %v4877_v12 = vsel %vm212_vm1, %v4820_v49, 0.0 }
 0x268   : > { %v4856_v10 = vadd.f32 %v4855_v62, %v4854_v16  ;;  %v4869_v16 = vsel %vm212_vm1, %v4816_v40, 0.0  ;;  %v4819_v62 = vmul.f32 %v4787_v48, %v4787_v48  ;;  %v4873_v21 = vsel %vm212_vm1, %v4818_v53, 0.0 }
 0x269   : > { %v4879_v40 = vsel %vm212_vm1, %v4821_v26, 0.0 }
 0x26a   : > { %v4858_v13 = vadd.f32 %v4857_v29, %v4856_v10  ;;  %v4871_v10 = vsel %vm212_vm1, %v4817_v63, 0.0  ;;  %v12932_v29 = vld [vmem:[%s14679_s3 + $0x10] sm:$0xf]  ;;  %v4875_v4 = vsel %vm212_vm1, %v4819_v62, 0.0 }
 0x26b   : > { %10730 = vmatprep.subr.msk.mxu1 %vm1407_vm0, %v12932_v29 }
 0x26c   : > { %v4860_v30 = vadd.f32 %v4859_v38, %v4858_v13  ;;  %v4790_v13 = vsub.f32 %v12814_v34, %v12835_v55 }
 0x26e   : > { %v4862_v20 = vadd.f32 %v4861_v25, %v4860_v30  ;;  %v4791_v30 = vsub.f32 %v12812_v39, %v12835_v55  ;;  %v4822_v19 = vmul.f32 %v4790_v13, %v4790_v13 }
 0x270   : > { %v4864_v45 = vadd.f32 %v4863_v54, %v4862_v20  ;;  %v4792_v20 = vsub.f32 %v12823_v9, %v12835_v55  ;;  %v4823_v7 = vmul.f32 %v4791_v30, %v4791_v30  ;;  %v4881_v48 = vsel %vm212_vm1, %v4822_v19, 0.0  ;;  %v4904_v30 = vpop.permute.xlu0 %4903 }
 0x272   : > { %v4866_v51 = vadd.f32 %v4865_v60, %v4864_v45  ;;  %v4793_v45 = vsub.f32 %v12821_v28, %v12835_v55 }
 0x274   : > { %v4868_v24 = vadd.f32 %v4867_v35, %v4866_v51  ;;  %v4824_v51 = vmul.f32 %v4792_v20, %v4792_v20  ;;  %v4825_v35 = vmul.f32 %v4793_v45, %v4793_v45  ;;  %v14878_v20 = vld [vmem:[#allocation4_spill] sm:$0xff] }
 0x276   : > { %v4870_v27 = vadd.f32 %v4869_v16, %v4868_v24  ;;  %v4883_v24 = vsel %vm212_vm1, %v4823_v7, 0.0  ;;  %v4885_v53 = vsel %vm212_vm1, %v4824_v51, 0.0 }
 0x278   : > { %v4872_v37 = vadd.f32 %v4871_v10, %v4870_v27  ;;  %v4887_v27 = vsel %vm212_vm1, %v4825_v35, 0.0 }
 0x27a   : > { %v4874_v38 = vadd.f32 %v4873_v21, %v4872_v37 }
 0x27c   : > { %v4876_v25 = vadd.f32 %v4875_v4, %v4874_v38 }
 0x27e   : > { %v4878_v54 = vadd.f32 %v4877_v12, %v4876_v25  ;;  %v14879_v12 = vld [vmem:[#allocation59_spill] sm:$0xff] }
 0x280   : > { %v4880_v60 = vadd.f32 %v4879_v40, %v4878_v54 }
 0x282   : > { %v4882_v63 = vadd.f32 %v4881_v48, %v4880_v60 }
 0x284   : > { %v4884_v50 = vadd.f32 %v4883_v24, %v4882_v63 }
 0x286   : > { %v4886_v16 = vadd.f32 %v4885_v53, %v4884_v50 }
 0x288   : > { %v4888_v32 = vadd.f32 %v4887_v27, %v4886_v16 }
 0x28a   : > { %v4889_v62 = vrot.slane %v4888_v32, 4 }
 0x28c   : > { %v4890_v10 = vadd.f32 %v4889_v62, %v4888_v32 }
 0x28e   : > { %v4891_v1 = vrot.slane %v4890_v10, 2 }
 0x290   : > { %v4892_v37 = vadd.f32 %v4891_v1, %v4890_v10 }
 0x292   : > { %v4893_v13 = vrot.slane %v4892_v37, 1 }
 0x294   : > { %v4894_v49 = vadd.f32 %v4893_v13, %v4892_v37  ;;  %v13022_v13 = vld [vmem:[%s14679_s3 + $0x14] sm:$0xf] }
 0x295   : > { %10780 = vmatprep.subr.msk.mxu0 %vm1407_vm0, %v13022_v13 }
 0x296   : > { %v4895_v21 = vmul.f32 0.003921569, %v4894_v49 }
 0x298   : > { %v4896_v38 = vadd.f32 1e-05, %v4895_v21 }
 0x29a   : > { %10995 = vrsqrt.f32 %v4896_v38 }
 0x2a7   : > { %v10996_v26 = vpop.eup %10995 }
 0x2a8   : > { %v4906_v4 = vmul.f32 %v10996_v26, %v4904_v30 }
 0x2aa   : > { %v4907_v25 = vmul.f32 %v4906_v4, %v12835_v55  ;;  %v4912_v19 = vrot.slane %v4906_v4, %v14878_v20 }
 0x2ac   : > { %v4908_v54 = vsub.f32 %v14879_v12, %v4907_v25  ;;  %v4913_v45 = vmul.f32 %v4912_v19, %v12564_v47  ;;  %v4914_v7 = vmul.f32 %v4912_v19, %v12562_v42  ;;  %v4915_v40 = vmul.f32 %v4912_v19, %v12582_v11 }
 0x2ad   : > { %v4916_v60 = vmul.f32 %v4912_v19, %v12580_v5  ;;  %v4917_v51 = vmul.f32 %v4912_v19, %v12600_v61  ;;  %v4918_v48 = vmul.f32 %v4912_v19, %v12598_v17  ;;  %v4919_v63 = vmul.f32 %v4912_v19, %v12620_v3 }
 0x2ae   : > { %v12964_v55 = vrot.slane %v4908_v54, %v14878_v20  ;;  %v4920_v35 = vmul.f32 %v4912_v19, %v12618_v2  ;;  %v4921_v24 = vmul.f32 %v4912_v19, %v12641_v56  ;;  %v4922_v47 = vmul.f32 %v4912_v19, %v12639_v36  ;;  %v5731_v20 = vld [vmem:[#allocation2 + $0xa] sm:$0xff] }
 0x2af   : > { %v4923_v42 = vmul.f32 %v4912_v19, %v12661_v57  ;;  %v4924_v11 = vmul.f32 %v4912_v19, %v12659_v0  ;;  %v4925_v5 = vmul.f32 %v4912_v19, %v12681_v31  ;;  %v4926_v61 = vmul.f32 %v4912_v19, %v12679_v22 }
 0x2b0   : > { %v4927_v17 = vmul.f32 %v4912_v19, %v12701_v8  ;;  %v4928_v3 = vmul.f32 %v4912_v19, %v12699_v44  ;;  %v4929_v50 = vmul.f32 %v4912_v19, %v12721_v52  ;;  %v4930_v2 = vmul.f32 %v4912_v19, %v12719_v23 }
 0x2b1   : > { %v4931_v56 = vmul.f32 %v4912_v19, %v12739_v18  ;;  %v4932_v36 = vmul.f32 %v4912_v19, %v12737_v41  ;;  %v4933_v57 = vmul.f32 %v4912_v19, %v12757_v58  ;;  %v4934_v0 = vmul.f32 %v4912_v19, %v12755_v59 }
 0x2b2   : > { %v4935_v31 = vmul.f32 %v4912_v19, %v12778_v43  ;;  %v4936_v22 = vmul.f32 %v4912_v19, %v12776_v33  ;;  %v4937_v8 = vmul.f32 %v4912_v19, %v12793_v14  ;;  %v4938_v44 = vmul.f32 %v4912_v19, %v12791_v46 }
 0x2b3   : > { %v4939_v52 = vmul.f32 %v4912_v19, %v12804_v15  ;;  %v4940_v23 = vmul.f32 %v4912_v19, %v12802_v6  ;;  %v4941_v18 = vmul.f32 %v4912_v19, %v12814_v34  ;;  %v4942_v41 = vmul.f32 %v4912_v19, %v12812_v39 }
 0x2b4   : > { %v4943_v58 = vmul.f32 %v4912_v19, %v12823_v9  ;;  %v4944_v59 = vmul.f32 %v4912_v19, %v12821_v28  ;;  %v4951_v43 = vadd.f32 %v12964_v55, %v4913_v45  ;;  %v4952_v33 = vadd.f32 %v12964_v55, %v4914_v7 }
 0x2b5   : > { %v4953_v14 = vadd.f32 %v12964_v55, %v4915_v40  ;;  %v4954_v46 = vadd.f32 %v12964_v55, %v4916_v60  ;;  %v4955_v15 = vadd.f32 %v12964_v55, %v4917_v51  ;;  %v4956_v6 = vadd.f32 %v12964_v55, %v4918_v48 }
 0x2b6   : > { %v4957_v34 = vadd.f32 %v12964_v55, %v4919_v63  ;;  %v4958_v39 = vadd.f32 %v12964_v55, %v4920_v35  ;;  %v4959_v9 = vadd.f32 %v12964_v55, %v4921_v24  ;;  %v4960_v28 = vadd.f32 %v12964_v55, %v4922_v47  ;;  %4983 = vst.msk [vmem:[#allocation2 + $0x19] sm:$0xff] %vm212_vm1, %v4951_v43 }
 0x2b7   : > { %4984 = vst.msk [vmem:[#allocation2 + $0x21] sm:$0xff] %vm212_vm1, %v4952_v33  ;;  %v4961_v53 = vadd.f32 %v12964_v55, %v4923_v42  ;;  %v4962_v16 = vadd.f32 %v12964_v55, %v4924_v11  ;;  %v4963_v27 = vadd.f32 %v12964_v55, %v4925_v5  ;;  %v4964_v32 = vadd.f32 %v12964_v55, %v4926_v61 }
 0x2b8   : > { %4985 = vst.msk [vmem:[#allocation2 + $0x31] sm:$0xff] %vm212_vm1, %v4953_v14  ;;  %4986 = vst.msk [vmem:[#allocation2 + $0x39] sm:$0xff] %vm212_vm1, %v4954_v46  ;;  %v4965_v62 = vadd.f32 %v12964_v55, %v4927_v17  ;;  %v4966_v10 = vadd.f32 %v12964_v55, %v4928_v3  ;;  %v4967_v1 = vadd.f32 %v12964_v55, %v4929_v50 }
 0x2b9   : > { %4987 = vst.msk [vmem:[#allocation2 + $0x49] sm:$0xff] %vm212_vm1, %v4955_v15  ;;  %4988 = vst.msk [vmem:[#allocation2 + $0x51] sm:$0xff] %vm212_vm1, %v4956_v6  ;;  %v4968_v37 = vadd.f32 %v12964_v55, %v4930_v2  ;;  %v4969_v49 = vadd.f32 %v12964_v55, %v4931_v56  ;;  %v4970_v21 = vadd.f32 %v12964_v55, %v4932_v36 }
 0x2ba   : > { %4989 = vst.msk [vmem:[#allocation2 + $0x61] sm:$0xff] %vm212_vm1, %v4957_v34  ;;  %4990 = vst.msk [vmem:[#allocation2 + $0x69] sm:$0xff] %vm212_vm1, %v4958_v39  ;;  %v4971_v38 = vadd.f32 %v12964_v55, %v4933_v57  ;;  %v4972_v30 = vadd.f32 %v12964_v55, %v4934_v0  ;;  %v4973_v26 = vadd.f32 %v12964_v55, %v4935_v31 }
 0x2bb   : > { %4991 = vst.msk [vmem:[#allocation2 + $0x79] sm:$0xff] %vm212_vm1, %v4959_v9  ;;  %4992 = vst.msk [vmem:[#allocation2 + $0x81] sm:$0xff] %vm212_vm1, %v4960_v28  ;;  %v4974_v4 = vadd.f32 %v12964_v55, %v4936_v22  ;;  %v4975_v25 = vadd.f32 %v12964_v55, %v4937_v8  ;;  %v4976_v19 = vadd.f32 %v12964_v55, %v4938_v44 }
 0x2bc   : > { %4993 = vst.msk [vmem:[#allocation2 + $0x91] sm:$0xff] %vm212_vm1, %v4961_v53  ;;  %4994 = vst.msk [vmem:[#allocation2 + $0x99] sm:$0xff] %vm212_vm1, %v4962_v16  ;;  %v4977_v12 = vadd.f32 %v12964_v55, %v4939_v52  ;;  %v4978_v54 = vadd.f32 %v12964_v55, %v4940_v23  ;;  %v4979_v45 = vadd.f32 %v12964_v55, %v4941_v18 }
 0x2bd   : > { %4995 = vst.msk [vmem:[#allocation2 + $0xa9] sm:$0xff] %vm212_vm1, %v4963_v27  ;;  %4996 = vst.msk [vmem:[#allocation2 + $0xb1] sm:$0xff] %vm212_vm1, %v4964_v32  ;;  %v4980_v7 = vadd.f32 %v12964_v55, %v4942_v41  ;;  %v4981_v40 = vadd.f32 %v12964_v55, %v4943_v58  ;;  %v4982_v60 = vadd.f32 %v12964_v55, %v4944_v59  ;;  %v13060_v51 = vld [vmem:[#allocation2 + $0x19] sm:$0xff] }
 0x2be   : > { %4997 = vst.msk [vmem:[#allocation2 + $0xc1] sm:$0xff] %vm212_vm1, %v4965_v62  ;;  %4998 = vst.msk [vmem:[#allocation2 + $0xc9] sm:$0xff] %vm212_vm1, %v4966_v10  ;;  %v13062_v48 = vld [vmem:[#allocation2 + $0x18] sm:$0xff]  ;;  %v13064_v63 = vld [vmem:[#allocation2 + $0x21] sm:$0xff]  ;;  %10535 = vmatprep.mubr.msk.f32.mxu1 %vm212_vm1, %v13060_v51 }
 0x2bf   : > { %4999 = vst.msk [vmem:[#allocation2 + $0xd9] sm:$0xff] %vm212_vm1, %v4967_v1  ;;  %5000 = vst.msk [vmem:[#allocation2 + $0xe1] sm:$0xff] %vm212_vm1, %v4968_v37  ;;  %10585 = vmatprep.mubr.msk.f32.mxu0 %vm212_vm1, %v13062_v48  ;;  %v13072_v55 = vld [vmem:[#allocation2 + $0x20] sm:$0xff]  ;;  %10536 = vmatmul.mubr.msk.f32.gmra.mxu1 %vm212_vm1, %v13064_v63  ;;  %v13078_v35 = vld [vmem:[#allocation2 + $0x31] sm:$0xff] }
 0x2c0   : > { %5001 = vst.msk [vmem:[#allocation2 + $0xf1] sm:$0xff] %vm212_vm1, %v4969_v49  ;;  %5002 = vst.msk [vmem:[#allocation2 + $0xf9] sm:$0xff] %vm212_vm1, %v4970_v21  ;;  %10586 = vmatmul.mubr.msk.f32.gmra.mxu0 %vm212_vm1, %v13072_v55  ;;  %v13080_v24 = vld [vmem:[#allocation2 + $0x30] sm:$0xff]  ;;  %10538 = vmatprep.mubr.msk.f32.mxu1 %vm212_vm1, %v13078_v35  ;;  %v13086_v47 = vld [vmem:[#allocation2 + $0x39] sm:$0xff] }
 0x2c1   : > { %5003 = vst.msk [vmem:[#allocation2 + $0x109] sm:$0xff] %vm212_vm1, %v4971_v38  ;;  %5004 = vst.msk [vmem:[#allocation2 + $0x111] sm:$0xff] %vm212_vm1, %v4972_v30  ;;  %10588 = vmatprep.mubr.msk.f32.mxu0 %vm212_vm1, %v13080_v24  ;;  %v13088_v42 = vld [vmem:[#allocation2 + $0x38] sm:$0xff]  ;;  %v13094_v11 = vld [vmem:[#allocation2 + $0x49] sm:$0xff] }
 0x2c2   : > { %5005 = vst.msk [vmem:[#allocation2 + $0x121] sm:$0xff] %vm212_vm1, %v4973_v26  ;;  %5006 = vst.msk [vmem:[#allocation2 + $0x129] sm:$0xff] %vm212_vm1, %v4974_v4  ;;  %v13096_v5 = vld [vmem:[#allocation2 + $0x48] sm:$0xff]  ;;  %v13102_v61 = vld [vmem:[#allocation2 + $0x51] sm:$0xff] }
 0x2c3   : > { %5007 = vst.msk [vmem:[#allocation2 + $0x139] sm:$0xff] %vm212_vm1, %v4975_v25  ;;  %5008 = vst.msk [vmem:[#allocation2 + $0x141] sm:$0xff] %vm212_vm1, %v4976_v19  ;;  %10539 = vmatmul.mubr.msk.f32.gmra.mxu1 %vm212_vm1, %v13086_v47  ;;  %v13104_v17 = vld [vmem:[#allocation2 + $0x50] sm:$0xff]  ;;  %v13110_v3 = vld [vmem:[#allocation2 + $0x61] sm:$0xff] }
 0x2c4   : > { %5009 = vst.msk [vmem:[#allocation2 + $0x151] sm:$0xff] %vm212_vm1, %v4977_v12  ;;  %5010 = vst.msk [vmem:[#allocation2 + $0x159] sm:$0xff] %vm212_vm1, %v4978_v54  ;;  %10589 = vmatmul.mubr.msk.f32.gmra.mxu0 %vm212_vm1, %v13088_v42  ;;  %10541 = vmatprep.mubr.msk.f32.mxu1 %vm212_vm1, %v13094_v11  ;;  %v13112_v50 = vld [vmem:[#allocation2 + $0x60] sm:$0xff]  ;;  %v13118_v2 = vld [vmem:[#allocation2 + $0x69] sm:$0xff] }
 0x2c5   : > { %5011 = vst.msk [vmem:[#allocation2 + $0x169] sm:$0xff] %vm212_vm1, %v4979_v45  ;;  %5012 = vst.msk [vmem:[#allocation2 + $0x171] sm:$0xff] %vm212_vm1, %v4980_v7  ;;  %10591 = vmatprep.mubr.msk.f32.mxu0 %vm212_vm1, %v13096_v5  ;;  %v13120_v56 = vld [vmem:[#allocation2 + $0x68] sm:$0xff]  ;;  %v13126_v36 = vld [vmem:[#allocation2 + $0x79] sm:$0xff] }
 0x2c6   : > { %5013 = vst.msk [vmem:[#allocation2 + $0x181] sm:$0xff] %vm212_vm1, %v4981_v40  ;;  %5014 = vst.msk [vmem:[#allocation2 + $0x189] sm:$0xff] %vm212_vm1, %v4982_v60  ;;  %v13128_v57 = vld [vmem:[#allocation2 + $0x78] sm:$0xff]  ;;  %v13134_v0 = vld [vmem:[#allocation2 + $0x81] sm:$0xff] }
 0x2c7   : > { %14880 = vst [vmem:[#allocation38_spill] sm:$0xff] %v13088_v42  ;;  %14881 = vst [vmem:[#allocation37_spill] sm:$0xff] %v13096_v5  ;;  %10542 = vmatmul.mubr.msk.f32.gmra.mxu1 %vm212_vm1, %v13102_v61  ;;  %v13136_v31 = vld [vmem:[#allocation2 + $0x80] sm:$0xff]  ;;  %v13142_v22 = vld [vmem:[#allocation2 + $0x91] sm:$0xff] }
 0x2c8   : > { %10592 = vmatmul.mubr.msk.f32.gmra.mxu0 %vm212_vm1, %v13104_v17  ;;  %14882 = vst [vmem:[#allocation20_spill] sm:$0xff] %v13112_v50  ;;  %10544 = vmatprep.mubr.msk.f32.mxu1 %vm212_vm1, %v13110_v3  ;;  %14883 = vst [vmem:[#allocation19_spill] sm:$0xff] %v13120_v56  ;;  %v13144_v8 = vld [vmem:[#allocation2 + $0x90] sm:$0xff]  ;;  %v13150_v44 = vld [vmem:[#allocation2 + $0x99] sm:$0xff] }
 0x2c9   : > { %10594 = vmatprep.mubr.msk.f32.mxu0 %vm212_vm1, %v13112_v50  ;;  %14884 = vst [vmem:[#allocation21_spill] sm:$0xff] %v13128_v57  ;;  %14885 = vst [vmem:[#allocation58_spill] sm:$0xff] %v13136_v31  ;;  %v13152_v52 = vld [vmem:[#allocation2 + $0x98] sm:$0xff]  ;;  %v13158_v23 = vld [vmem:[#allocation2 + $0xa9] sm:$0xff] }
 0x2ca   : > { %14886 = vst [vmem:[#allocation62_spill] sm:$0xff] %v13144_v8  ;;  %14887 = vst [vmem:[#allocation9_spill] sm:$0xff] %v13152_v52  ;;  %v13160_v18 = vld [vmem:[#allocation2 + $0xa8] sm:$0xff]  ;;  %v13166_v41 = vld [vmem:[#allocation2 + $0xb1] sm:$0xff] }
 0x2cb   : > { %10545 = vmatmul.mubr.msk.f32.gmra.mxu1 %vm212_vm1, %v13118_v2  ;;  %14888 = vst [vmem:[#allocation10_spill] sm:$0xff] %v13160_v18  ;;  %v13168_v58 = vld [vmem:[#allocation2 + $0xb0] sm:$0xff]  ;;  %v13174_v59 = vld [vmem:[#allocation2 + $0xc1] sm:$0xff]  ;;  %v13190_v46 = vld [vmem:[#allocation2 + $0xd9] sm:$0xff] }
 0x2cc   : > { %10595 = vmatmul.mubr.msk.f32.gmra.mxu0 %vm212_vm1, %v13120_v56  ;;  %10547 = vmatprep.mubr.msk.f32.mxu1 %vm212_vm1, %v13126_v36  ;;  %14889 = vst [vmem:[#allocation39_spill] sm:$0xff] %v13168_v58  ;;  %v13176_v43 = vld [vmem:[#allocation2 + $0xc0] sm:$0xff]  ;;  %v13182_v33 = vld [vmem:[#allocation2 + $0xc9] sm:$0xff]  ;;  %v13192_v15 = vld [vmem:[#allocation2 + $0xd8] sm:$0xff] }
 0x2cd   : > { %10597 = vmatprep.mubr.msk.f32.mxu0 %vm212_vm1, %v13128_v57  ;;  %14890 = vst [vmem:[#allocation40_spill] sm:$0xff] %v13176_v43  ;;  %v13184_v14 = vld [vmem:[#allocation2 + $0xc8] sm:$0xff]  ;;  %14892 = vst [vmem:[#allocation23_spill] sm:$0xff] %v13192_v15  ;;  %v13200_v34 = vld [vmem:[#allocation2 + $0xe0] sm:$0xff] }
 0x2ce   : > { %14891 = vst [vmem:[#allocation22_spill] sm:$0xff] %v13184_v14  ;;  %v13198_v6 = vld [vmem:[#allocation2 + $0xe1] sm:$0xff]  ;;  %14893 = vst [vmem:[#allocation61_spill] sm:$0xff] %v13200_v34  ;;  %v13206_v39 = vld [vmem:[#allocation2 + $0xf1] sm:$0xff] }
 0x2cf   : > { %10548 = vmatmul.mubr.msk.f32.gmra.mxu1 %vm212_vm1, %v13134_v0  ;;  %v13208_v9 = vld [vmem:[#allocation2 + $0xf0] sm:$0xff]  ;;  %v13214_v28 = vld [vmem:[#allocation2 + $0xf9] sm:$0xff]  ;;  %v13224_v27 = vld [vmem:[#allocation2 + $0x108] sm:$0xff] }
 0x2d0   : > { %10598 = vmatmul.mubr.msk.f32.gmra.mxu0 %vm212_vm1, %v13136_v31  ;;  %10550 = vmatprep.mubr.msk.f32.mxu1 %vm212_vm1, %v13142_v22  ;;  %14894 = vst [vmem:[#allocation64_spill] sm:$0xff] %v13208_v9  ;;  %v13216_v53 = vld [vmem:[#allocation2 + $0xf8] sm:$0xff]  ;;  %v13222_v16 = vld [vmem:[#allocation2 + $0x109] sm:$0xff]  ;;  %14896 = vst [vmem:[#allocation12_spill] sm:$0xff] %v13224_v27 }
 0x2d1   : > { %10600 = vmatprep.mubr.msk.f32.mxu0 %vm212_vm1, %v13144_v8  ;;  %14895 = vst [vmem:[#allocation11_spill] sm:$0xff] %v13216_v53  ;;  %v13230_v32 = vld [vmem:[#allocation2 + $0x111] sm:$0xff]  ;;  %v13238_v10 = vld [vmem:[#allocation2 + $0x121] sm:$0xff]  ;;  %v13246_v37 = vld [vmem:[#allocation2 + $0x129] sm:$0xff] }
 0x2d2   : > { %v13232_v62 = vld [vmem:[#allocation2 + $0x110] sm:$0xff]  ;;  %v13240_v1 = vld [vmem:[#allocation2 + $0x120] sm:$0xff]  ;;  %v13248_v49 = vld [vmem:[#allocation2 + $0x128] sm:$0xff] }
 0x2d3   : > { %10551 = vmatmul.mubr.msk.f32.gmra.mxu1 %vm212_vm1, %v13150_v44  ;;  %14897 = vst [vmem:[#allocation42_spill] sm:$0xff] %v13232_v62  ;;  %14898 = vst [vmem:[#allocation41_spill] sm:$0xff] %v13240_v1  ;;  %v13254_v21 = vld [vmem:[#allocation2 + $0x139] sm:$0xff]  ;;  %v13262_v30 = vld [vmem:[#allocation2 + $0x141] sm:$0xff] }
 0x2d4   : > { %10601 = vmatmul.mubr.msk.f32.gmra.mxu0 %vm212_vm1, %v13152_v52  ;;  %10553 = vmatprep.mubr.msk.f32.mxu1 %vm212_vm1, %v13158_v23  ;;  %14899 = vst [vmem:[#allocation24_spill] sm:$0xff] %v13248_v49  ;;  %v13256_v38 = vld [vmem:[#allocation2 + $0x138] sm:$0xff]  ;;  %v13264_v26 = vld [vmem:[#allocation2 + $0x140] sm:$0xff]  ;;  %v13272_v25 = vld [vmem:[#allocation2 + $0x150] sm:$0xff] }
 0x2d5   : > { %10603 = vmatprep.mubr.msk.f32.mxu0 %vm212_vm1, %v13160_v18  ;;  %14900 = vst [vmem:[#allocation25_spill] sm:$0xff] %v13256_v38  ;;  %14901 = vst [vmem:[#allocation63_spill] sm:$0xff] %v13264_v26  ;;  %v13270_v4 = vld [vmem:[#allocation2 + $0x151] sm:$0xff]  ;;  %v13278_v19 = vld [vmem:[#allocation2 + $0x159] sm:$0xff] }
 0x2d6   : > { %14902 = vst [vmem:[#allocation66_spill] sm:$0xff] %v13272_v25  ;;  %14903 = vst [vmem:[#allocation13_spill] sm:$0xff] %v13278_v19  ;;  %v13280_v12 = vld [vmem:[#allocation2 + $0x158] sm:$0xff]  ;;  %v13286_v54 = vld [vmem:[#allocation2 + $0x169] sm:$0xff] }
 0x2d7   : > { %10554 = vmatmul.mubr.msk.f32.gmra.mxu1 %vm212_vm1, %v13166_v41  ;;  %14904 = vst [vmem:[#allocation14_spill] sm:$0xff] %v13280_v12  ;;  %14905 = vst [vmem:[#allocation43_spill] sm:$0xff] %v13286_v54  ;;  %v13288_v45 = vld [vmem:[#allocation2 + $0x168] sm:$0xff]  ;;  %v13294_v40 = vld [vmem:[#allocation2 + $0x171] sm:$0xff] }
 0x2d8   : > { %10604 = vmatmul.mubr.msk.f32.gmra.mxu0 %vm212_vm1, %v13168_v58  ;;  %10556 = vmatprep.mubr.msk.f32.mxu1 %vm212_vm1, %v13174_v59  ;;  %14906 = vst [vmem:[#allocation44_spill] sm:$0xff] %v13288_v45  ;;  %v5730_v7 = vld [vmem:[#allocation2 + $0x2] sm:$0xff]  ;;  %14907 = vst [vmem:[#allocation26_spill] sm:$0xff] %v13294_v40  ;;  %v13296_v60 = vld [vmem:[#allocation2 + $0x170] sm:$0xff] }
 0x2d9   : > { %10606 = vmatprep.mubr.msk.f32.mxu0 %vm212_vm1, %v13176_v43 }
 0x2db   : > { %10557 = vmatmul.mubr.msk.f32.gmra.mxu1 %vm212_vm1, %v13182_v33 }
 0x2dc   : > { %10607 = vmatmul.mubr.msk.f32.gmra.mxu0 %vm212_vm1, %v13184_v14  ;;  %10559 = vmatprep.mubr.msk.f32.mxu1 %vm212_vm1, %v13190_v46 }
 0x2dd   : > { %10609 = vmatprep.mubr.msk.f32.mxu0 %vm212_vm1, %v13192_v15 }
 0x2df   : > { %10560 = vmatmul.mubr.msk.f32.gmra.mxu1 %vm212_vm1, %v13198_v6 }
 0x2e0   : > { %10610 = vmatmul.mubr.msk.f32.gmra.mxu0 %vm212_vm1, %v13200_v34  ;;  %10562 = vmatprep.mubr.msk.f32.mxu1 %vm212_vm1, %v13206_v39 }
 0x2e1   : > { %10612 = vmatprep.mubr.msk.f32.mxu0 %vm212_vm1, %v13208_v9 }
 0x2e3   : > { %10563 = vmatmul.mubr.msk.f32.gmra.mxu1 %vm212_vm1, %v13214_v28 }
 0x2e4   : > { %10613 = vmatmul.mubr.msk.f32.gmra.mxu0 %vm212_vm1, %v13216_v53  ;;  %10565 = vmatprep.mubr.msk.f32.mxu1 %vm212_vm1, %v13222_v16 }
 0x2e5   : > { %10615 = vmatprep.mubr.msk.f32.mxu0 %vm212_vm1, %v13224_v27 }
 0x2e7   : > { %10566 = vmatmul.mubr.msk.f32.gmra.mxu1 %vm212_vm1, %v13230_v32 }
 0x2e8   : > { %10616 = vmatmul.mubr.msk.f32.gmra.mxu0 %vm212_vm1, %v13232_v62  ;;  %10568 = vmatprep.mubr.msk.f32.mxu1 %vm212_vm1, %v13238_v10 }
 0x2e9   : > { %10618 = vmatprep.mubr.msk.f32.mxu0 %vm212_vm1, %v13240_v1 }
 0x2eb   : > { %10569 = vmatmul.mubr.msk.f32.gmra.mxu1 %vm212_vm1, %v13246_v37 }
 0x2ec   : > { %10619 = vmatmul.mubr.msk.f32.gmra.mxu0 %vm212_vm1, %v13248_v49  ;;  %10571 = vmatprep.mubr.msk.f32.mxu1 %vm212_vm1, %v13254_v21 }
 0x2ed   : > { %10621 = vmatprep.mubr.msk.f32.mxu0 %vm212_vm1, %v13256_v38 }
 0x2ef   : > { %10572 = vmatmul.mubr.msk.f32.gmra.mxu1 %vm212_vm1, %v13262_v30 }
 0x2f0   : > { %10622 = vmatmul.mubr.msk.f32.gmra.mxu0 %vm212_vm1, %v13264_v26  ;;  %10574 = vmatprep.mubr.msk.f32.mxu1 %vm212_vm1, %v13270_v4 }
 0x2f1   : > { %10624 = vmatprep.mubr.msk.f32.mxu0 %vm212_vm1, %v13272_v25 }
 0x2f3   : > { %10575 = vmatmul.mubr.msk.f32.gmra.mxu1 %vm212_vm1, %v13278_v19  ;;  %v13318_v19 = vld [vmem:[%s14679_s3 + $0x1c] sm:$0xf] }
 0x2f4   : > { %10625 = vmatmul.mubr.msk.f32.gmra.mxu0 %vm212_vm1, %v13280_v12  ;;  %10577 = vmatprep.mubr.msk.f32.mxu1 %vm212_vm1, %v13286_v54  ;;  %v13308_v54 = vld [vmem:[#allocation2 + $0x1a] sm:$0xff] }
 0x2f5   : > { %10627 = vmatprep.mubr.msk.f32.mxu0 %vm212_vm1, %v13288_v45 }
 0x2f7   : > { %10578 = vmatmul.mubr.msk.f32.gmra.mxu1 %vm212_vm1, %v13294_v40  ;;  %v13313_v40 = vld [vmem:[%s14679_s3 + $0x18] sm:$0xf] }
 0x2f8   : > { %10628 = vmatmul.mubr.msk.f32.gmra.mxu0 %vm212_vm1, %v13296_v60  ;;  %10632 = vmatprep.mubr.msk.f32.mxu1 %vm212_vm1, %v5730_v7 }
 0x2f9   : > { %10682 = vmatprep.mubr.msk.f32.mxu0 %vm212_vm1, %v13062_v48  ;;  %v10584_v48 = vpop.f32.mrf.mxu0 }
 0x2fb   : > { %10633 = vmatmul.mubr.msk.f32.vlgmr.msra.gmra.mxu1 %vm212_vm1, %v5731_v20  ;;  %v13328_v20 = vld [vmem:[#allocation2 + $0x22] sm:$0xff] }
 0x2fc   : > { %10683 = vmatmul.mubr.msk.f32.vlgmr.msra.gmra.mxu0 %vm212_vm1, %v13072_v55  ;;  %10731 = vmatpush3.msk.msra.mxu1 %vm1407_vm0, %v12932_v29  ;;  %v13338_v29 = vld [vmem:[#allocation2 + $0x32] sm:$0xff]  ;;  %v13344_v55 = vld [vmem:[#allocation2 + $0x3a] sm:$0xff] }
 0x2fd   : > { %10635 = vmatprep.mubr.msk.f32.mxu1 %vm212_vm1, %v13308_v54  ;;  %10685 = vmatprep.mubr.msk.f32.mxu0 %vm212_vm1, %v13080_v24 }
 0x2fe   : > { %10781 = vmatpush3.msk.msra.mxu0 %vm1407_vm0, %v13022_v13  ;;  %10830 = vmatprep.subr.msk.mxu1 %vm1407_vm0, %v13313_v40  ;;  %v10534_v13 = vpop.f32.mrf.mxu1 }
 0x2ff   : > { %10880 = vmatprep.subr.msk.mxu0 %vm1407_vm0, %v13318_v19  ;;  %10636 = vmatmul.mubr.msk.f32.gmra.mxu1 %vm212_vm1, %v13328_v20  ;;  %v13346_v7 = vadd.f32 %v10584_v48, %v10534_v13  ;;  %v13364_v13 = vld [vmem:[#allocation2 + $0x62] sm:$0xff]  ;;  %v13370_v48 = vld [vmem:[#allocation2 + $0x6a] sm:$0xff] }
 0x300   : > { %10686 = vmatmul.mubr.msk.f32.gmra.mxu0 %vm212_vm1, %v13088_v42  ;;  %10638 = vmatprep.mubr.msk.f32.mxu1 %vm212_vm1, %v13338_v29  ;;  %v13352_v42 = vld [vmem:[#allocation2 + $0x4a] sm:$0xff] }
 0x301   : > { %10688 = vmatprep.mubr.msk.f32.mxu0 %vm212_vm1, %v13096_v5  ;;  %14908 = vst [vmem:[#allocation27_spill] sm:$0xff] %v13346_v7  ;;  %v13358_v5 = vld [vmem:[#allocation2 + $0x52] sm:$0xff]  ;;  %v13376_v7 = vld [vmem:[#allocation2 + $0x7a] sm:$0xff] }
 0x303   : > { %10639 = vmatmul.mubr.msk.f32.gmra.mxu1 %vm212_vm1, %v13344_v55 }
 0x304   : > { %10689 = vmatmul.mubr.msk.f32.gmra.mxu0 %vm212_vm1, %v13104_v17  ;;  %10641 = vmatprep.mubr.msk.f32.mxu1 %vm212_vm1, %v13352_v42 }
 0x305   : > { %10691 = vmatprep.mubr.msk.f32.mxu0 %vm212_vm1, %v13112_v50  ;;  %v13498_v50 = vld [vmem:[#allocation2 + $0x180] sm:$0xff] }
 0x306   : > { %14909 = vst [vmem:[#allocation65_spill] sm:$0xff] %v13498_v50 }
 0x307   : > { %10642 = vmatmul.mubr.msk.f32.gmra.mxu1 %vm212_vm1, %v13358_v5 }
 0x308   : > { %10692 = vmatmul.mubr.msk.f32.gmra.mxu0 %vm212_vm1, %v13120_v56  ;;  %10644 = vmatprep.mubr.msk.f32.mxu1 %vm212_vm1, %v13364_v13  ;;  %v13382_v56 = vld [vmem:[#allocation2 + $0x82] sm:$0xff] }
 0x309   : > { %10694 = vmatprep.mubr.msk.f32.mxu0 %vm212_vm1, %v13128_v57  ;;  %v13388_v57 = vld [vmem:[#allocation2 + $0x92] sm:$0xff] }
 0x30b   : > { %10645 = vmatmul.mubr.msk.f32.gmra.mxu1 %vm212_vm1, %v13370_v48 }
 0x30c   : > { %10695 = vmatmul.mubr.msk.f32.gmra.mxu0 %vm212_vm1, %v13136_v31  ;;  %10647 = vmatprep.mubr.msk.f32.mxu1 %vm212_vm1, %v13376_v7  ;;  %v13394_v31 = vld [vmem:[#allocation2 + $0x9a] sm:$0xff] }
 0x30d   : > { %10697 = vmatprep.mubr.msk.f32.mxu0 %vm212_vm1, %v13144_v8  ;;  %v13400_v8 = vld [vmem:[#allocation2 + $0xaa] sm:$0xff] }
 0x30f   : > { %10648 = vmatmul.mubr.msk.f32.gmra.mxu1 %vm212_vm1, %v13382_v56 }
 0x310   : > { %10698 = vmatmul.mubr.msk.f32.gmra.mxu0 %vm212_vm1, %v13152_v52  ;;  %10650 = vmatprep.mubr.msk.f32.mxu1 %vm212_vm1, %v13388_v57  ;;  %v13406_v52 = vld [vmem:[#allocation2 + $0xb2] sm:$0xff] }
 0x311   : > { %10700 = vmatprep.mubr.msk.f32.mxu0 %vm212_vm1, %v13160_v18  ;;  %v13412_v18 = vld [vmem:[#allocation2 + $0xc2] sm:$0xff] }
 0x313   : > { %10651 = vmatmul.mubr.msk.f32.gmra.mxu1 %vm212_vm1, %v13394_v31 }
 0x314   : > { %10701 = vmatmul.mubr.msk.f32.gmra.mxu0 %vm212_vm1, %v13168_v58  ;;  %10653 = vmatprep.mubr.msk.f32.mxu1 %vm212_vm1, %v13400_v8  ;;  %v13418_v58 = vld [vmem:[#allocation2 + $0xca] sm:$0xff] }
 0x315   : > { %10703 = vmatprep.mubr.msk.f32.mxu0 %vm212_vm1, %v13176_v43  ;;  %v13424_v43 = vld [vmem:[#allocation2 + $0xda] sm:$0xff] }
 0x317   : > { %10654 = vmatmul.mubr.msk.f32.gmra.mxu1 %vm212_vm1, %v13406_v52 }
 0x318   : > { %10704 = vmatmul.mubr.msk.f32.gmra.mxu0 %vm212_vm1, %v13184_v14  ;;  %10656 = vmatprep.mubr.msk.f32.mxu1 %vm212_vm1, %v13412_v18  ;;  %v13430_v14 = vld [vmem:[#allocation2 + $0xe2] sm:$0xff] }
 0x319   : > { %10706 = vmatprep.mubr.msk.f32.mxu0 %vm212_vm1, %v13192_v15  ;;  %v13436_v15 = vld [vmem:[#allocation2 + $0xf2] sm:$0xff] }
 0x31b   : > { %10657 = vmatmul.mubr.msk.f32.gmra.mxu1 %vm212_vm1, %v13418_v58 }
 0x31c   : > { %10707 = vmatmul.mubr.msk.f32.gmra.mxu0 %vm212_vm1, %v13200_v34  ;;  %10659 = vmatprep.mubr.msk.f32.mxu1 %vm212_vm1, %v13424_v43  ;;  %v13442_v34 = vld [vmem:[#allocation2 + $0xfa] sm:$0xff] }
 0x31d   : > { %10709 = vmatprep.mubr.msk.f32.mxu0 %vm212_vm1, %v13208_v9  ;;  %v13448_v9 = vld [vmem:[#allocation2 + $0x10a] sm:$0xff] }
 0x31f   : > { %10660 = vmatmul.mubr.msk.f32.gmra.mxu1 %vm212_vm1, %v13430_v14 }
 0x320   : > { %10710 = vmatmul.mubr.msk.f32.gmra.mxu0 %vm212_vm1, %v13216_v53  ;;  %10662 = vmatprep.mubr.msk.f32.mxu1 %vm212_vm1, %v13436_v15  ;;  %v13454_v53 = vld [vmem:[#allocation2 + $0x112] sm:$0xff] }
 0x321   : > { %10712 = vmatprep.mubr.msk.f32.mxu0 %vm212_vm1, %v13224_v27  ;;  %v13460_v27 = vld [vmem:[#allocation2 + $0x122] sm:$0xff] }
 0x323   : > { %10663 = vmatmul.mubr.msk.f32.gmra.mxu1 %vm212_vm1, %v13442_v34 }
 0x324   : > { %10713 = vmatmul.mubr.msk.f32.gmra.mxu0 %vm212_vm1, %v13232_v62  ;;  %10665 = vmatprep.mubr.msk.f32.mxu1 %vm212_vm1, %v13448_v9  ;;  %v13466_v62 = vld [vmem:[#allocation2 + $0x12a] sm:$0xff] }
 0x325   : > { %10715 = vmatprep.mubr.msk.f32.mxu0 %vm212_vm1, %v13240_v1  ;;  %v13472_v1 = vld [vmem:[#allocation2 + $0x13a] sm:$0xff] }
 0x327   : > { %10666 = vmatmul.mubr.msk.f32.gmra.mxu1 %vm212_vm1, %v13454_v53 }
 0x328   : > { %10716 = vmatmul.mubr.msk.f32.gmra.mxu0 %vm212_vm1, %v13248_v49  ;;  %10668 = vmatprep.mubr.msk.f32.mxu1 %vm212_vm1, %v13460_v27  ;;  %v13478_v49 = vld [vmem:[#allocation2 + $0x142] sm:$0xff] }
 0x329   : > { %10718 = vmatprep.mubr.msk.f32.mxu0 %vm212_vm1, %v13256_v38  ;;  %v13484_v38 = vld [vmem:[#allocation2 + $0x152] sm:$0xff] }
 0x32b   : > { %10669 = vmatmul.mubr.msk.f32.gmra.mxu1 %vm212_vm1, %v13466_v62 }
 0x32c   : > { %10719 = vmatmul.mubr.msk.f32.gmra.mxu0 %vm212_vm1, %v13264_v26  ;;  %10671 = vmatprep.mubr.msk.f32.mxu1 %vm212_vm1, %v13472_v1  ;;  %v13490_v26 = vld [vmem:[#allocation2 + $0x15a] sm:$0xff] }
 0x32d   : > { %10721 = vmatprep.mubr.msk.f32.mxu0 %vm212_vm1, %v13272_v25  ;;  %v13496_v25 = vld [vmem:[#allocation2 + $0x16a] sm:$0xff] }
 0x32f   : > { %10672 = vmatmul.mubr.msk.f32.gmra.mxu1 %vm212_vm1, %v13478_v49 }
 0x330   : > { %10722 = vmatmul.mubr.msk.f32.gmra.mxu0 %vm212_vm1, %v13280_v12  ;;  %10674 = vmatprep.mubr.msk.f32.mxu1 %vm212_vm1, %v13484_v38  ;;  %v13504_v12 = vld [vmem:[#allocation2 + $0x172] sm:$0xff] }
 0x331   : > { %10724 = vmatprep.mubr.msk.f32.mxu0 %vm212_vm1, %v13288_v45  ;;  %v13506_v45 = vld [vmem:[#allocation2 + $0x188] sm:$0xff] }
 0x333   : > { %10675 = vmatmul.mubr.msk.f32.gmra.mxu1 %vm212_vm1, %v13490_v26 }
 0x334   : > { %10725 = vmatmul.mubr.msk.f32.gmra.mxu0 %vm212_vm1, %v13296_v60  ;;  %10677 = vmatprep.mubr.msk.f32.mxu1 %vm212_vm1, %v13496_v25 }
 0x335   : > { %10727 = vmatprep.mubr.msk.f32.mxu0 %vm212_vm1, %v13498_v50  ;;  %v13523_v50 = vld [vmem:[%s14679_s3 + $0x20] sm:$0xf] }
 0x337   : > { %10678 = vmatmul.mubr.msk.f32.gmra.mxu1 %vm212_vm1, %v13504_v12 }
 0x338   : > { %10728 = vmatmul.mubr.msk.f32.gmra.mxu0 %vm212_vm1, %v13506_v45  ;;  %10732 = vmatprep.mubr.msk.f32.mxu1 %vm212_vm1, %v13060_v51  ;;  %v14910_v51 = vld [vmem:[#allocation13_spill] sm:$0xff] }
 0x339   : > { %10782 = vmatprep.mubr.msk.f32.mxu0 %vm212_vm1, %v13308_v54 }
 0x33b   : > { %10733 = vmatmul.mubr.msk.f32.vlgmr.msra.gmra.mxu1 %vm212_vm1, %v13064_v63  ;;  %v14911_v63 = vld [vmem:[#allocation43_spill] sm:$0xff] }
 0x33c   : > { %10783 = vmatmul.mubr.msk.f32.vlgmr.msra.gmra.mxu0 %vm212_vm1, %v13328_v20  ;;  %10831 = vmatpush3.msk.msra.mxu1 %vm1407_vm0, %v13313_v40 }
 0x33d   : > { %10735 = vmatprep.mubr.msk.f32.mxu1 %vm212_vm1, %v13078_v35  ;;  %10785 = vmatprep.mubr.msk.f32.mxu0 %vm212_vm1, %v13338_v29 }
 0x33e   : > { %10881 = vmatpush3.msk.msra.mxu0 %vm1407_vm0, %v13318_v19  ;;  %10930 = vmatprep.subr.msk.mxu1 %vm1407_vm0, %v13523_v50  ;;  %v13671_v19 = vpop.f32.mrf.mxu1 }
 0x33f   : > { %10736 = vmatmul.mubr.msk.f32.gmra.mxu1 %vm212_vm1, %v13086_v47 }
 0x340   : > { %10786 = vmatmul.mubr.msk.f32.gmra.mxu0 %vm212_vm1, %v13344_v55  ;;  %10738 = vmatprep.mubr.msk.f32.mxu1 %vm212_vm1, %v13094_v11 }
 0x341   : > { %10788 = vmatprep.mubr.msk.f32.mxu0 %vm212_vm1, %v13352_v42 }
 0x343   : > { %10739 = vmatmul.mubr.msk.f32.gmra.mxu1 %vm212_vm1, %v13102_v61 }
 0x344   : > { %10789 = vmatmul.mubr.msk.f32.gmra.mxu0 %vm212_vm1, %v13358_v5  ;;  %10741 = vmatprep.mubr.msk.f32.mxu1 %vm212_vm1, %v13110_v3 }
 0x345   : > { %10791 = vmatprep.mubr.msk.f32.mxu0 %vm212_vm1, %v13364_v13 }
 0x347   : > { %10742 = vmatmul.mubr.msk.f32.gmra.mxu1 %vm212_vm1, %v13118_v2 }
 0x348   : > { %10792 = vmatmul.mubr.msk.f32.gmra.mxu0 %vm212_vm1, %v13370_v48  ;;  %10744 = vmatprep.mubr.msk.f32.mxu1 %vm212_vm1, %v13126_v36 }
 0x349   : > { %10794 = vmatprep.mubr.msk.f32.mxu0 %vm212_vm1, %v13376_v7 }
 0x34b   : > { %10745 = vmatmul.mubr.msk.f32.gmra.mxu1 %vm212_vm1, %v13134_v0 }
 0x34c   : > { %10795 = vmatmul.mubr.msk.f32.gmra.mxu0 %vm212_vm1, %v13382_v56  ;;  %10747 = vmatprep.mubr.msk.f32.mxu1 %vm212_vm1, %v13142_v22 }
 0x34d   : > { %10797 = vmatprep.mubr.msk.f32.mxu0 %vm212_vm1, %v13388_v57 }
 0x34f   : > { %10748 = vmatmul.mubr.msk.f32.gmra.mxu1 %vm212_vm1, %v13150_v44 }
 0x350   : > { %10798 = vmatmul.mubr.msk.f32.gmra.mxu0 %vm212_vm1, %v13394_v31  ;;  %10750 = vmatprep.mubr.msk.f32.mxu1 %vm212_vm1, %v13158_v23 }
 0x351   : > { %10800 = vmatprep.mubr.msk.f32.mxu0 %vm212_vm1, %v13400_v8 }
 0x353   : > { %10751 = vmatmul.mubr.msk.f32.gmra.mxu1 %vm212_vm1, %v13166_v41 }
 0x354   : > { %10801 = vmatmul.mubr.msk.f32.gmra.mxu0 %vm212_vm1, %v13406_v52  ;;  %10753 = vmatprep.mubr.msk.f32.mxu1 %vm212_vm1, %v13174_v59 }
 0x355   : > { %10803 = vmatprep.mubr.msk.f32.mxu0 %vm212_vm1, %v13412_v18 }
 0x357   : > { %10754 = vmatmul.mubr.msk.f32.gmra.mxu1 %vm212_vm1, %v13182_v33 }
 0x358   : > { %10804 = vmatmul.mubr.msk.f32.gmra.mxu0 %vm212_vm1, %v13418_v58  ;;  %10756 = vmatprep.mubr.msk.f32.mxu1 %vm212_vm1, %v13190_v46 }
 0x359   : > { %10806 = vmatprep.mubr.msk.f32.mxu0 %vm212_vm1, %v13424_v43 }
 0x35b   : > { %10757 = vmatmul.mubr.msk.f32.gmra.mxu1 %vm212_vm1, %v13198_v6 }
 0x35c   : > { %10807 = vmatmul.mubr.msk.f32.gmra.mxu0 %vm212_vm1, %v13430_v14  ;;  %10759 = vmatprep.mubr.msk.f32.mxu1 %vm212_vm1, %v13206_v39 }
 0x35d   : > { %10809 = vmatprep.mubr.msk.f32.mxu0 %vm212_vm1, %v13436_v15 }
 0x35f   : > { %10760 = vmatmul.mubr.msk.f32.gmra.mxu1 %vm212_vm1, %v13214_v28 }
 0x360   : > { %10810 = vmatmul.mubr.msk.f32.gmra.mxu0 %vm212_vm1, %v13442_v34  ;;  %10762 = vmatprep.mubr.msk.f32.mxu1 %vm212_vm1, %v13222_v16 }
 0x361   : > { %10812 = vmatprep.mubr.msk.f32.mxu0 %vm212_vm1, %v13448_v9 }
 0x363   : > { %10763 = vmatmul.mubr.msk.f32.gmra.mxu1 %vm212_vm1, %v13230_v32 }
 0x364   : > { %10813 = vmatmul.mubr.msk.f32.gmra.mxu0 %vm212_vm1, %v13454_v53  ;;  %10765 = vmatprep.mubr.msk.f32.mxu1 %vm212_vm1, %v13238_v10  ;;  %v14912_v53 = vld [vmem:[#allocation26_spill] sm:$0xff] }
 0x365   : > { %10815 = vmatprep.mubr.msk.f32.mxu0 %vm212_vm1, %v13460_v27 }
 0x367   : > { %10766 = vmatmul.mubr.msk.f32.gmra.mxu1 %vm212_vm1, %v13246_v37 }
 0x368   : > { %10816 = vmatmul.mubr.msk.f32.gmra.mxu0 %vm212_vm1, %v13466_v62  ;;  %10768 = vmatprep.mubr.msk.f32.mxu1 %vm212_vm1, %v13254_v21  ;;  %v13643_v62 = vld [vmem:[#allocation2 + $0x181] sm:$0xff] }
 0x369   : > { %10818 = vmatprep.mubr.msk.f32.mxu0 %vm212_vm1, %v13472_v1  ;;  %v13645_v1 = vld [vmem:[#allocation2 + $0x182] sm:$0xff] }
 0x36b   : > { %10769 = vmatmul.mubr.msk.f32.gmra.mxu1 %vm212_vm1, %v13262_v30 }
 0x36c   : > { %10819 = vmatmul.mubr.msk.f32.gmra.mxu0 %vm212_vm1, %v13478_v49  ;;  %10771 = vmatprep.mubr.msk.f32.mxu1 %vm212_vm1, %v13270_v4  ;;  %v13651_v49 = vld [vmem:[#allocation2 + $0x189] sm:$0xff] }
 0x36d   : > { %10821 = vmatprep.mubr.msk.f32.mxu0 %vm212_vm1, %v13484_v38  ;;  %v13653_v38 = vld [vmem:[#allocation2 + $0x18a] sm:$0xff] }
 0x36f   : > { %10772 = vmatmul.mubr.msk.f32.gmra.mxu1 %vm212_vm1, %v14910_v51 }
 0x370   : > { %10822 = vmatmul.mubr.msk.f32.gmra.mxu0 %vm212_vm1, %v13490_v26  ;;  %10774 = vmatprep.mubr.msk.f32.mxu1 %vm212_vm1, %v14911_v63  ;;  %v14913_v26 = vld [vmem:[#allocation38_spill] sm:$0xff] }
 0x371   : > { %10824 = vmatprep.mubr.msk.f32.mxu0 %vm212_vm1, %v13496_v25  ;;  %v14914_v25 = vld [vmem:[#allocation37_spill] sm:$0xff] }
 0x373   : > { %10775 = vmatmul.mubr.msk.f32.gmra.mxu1 %vm212_vm1, %v14912_v53 }
 0x374   : > { %10825 = vmatmul.mubr.msk.f32.gmra.mxu0 %vm212_vm1, %v13504_v12  ;;  %10777 = vmatprep.mubr.msk.f32.mxu1 %vm212_vm1, %v13643_v62  ;;  %v13673_v12 = vpop.f32.mrf.mxu0 }
 0x375   : > { %10827 = vmatprep.mubr.msk.f32.mxu0 %vm212_vm1, %v13645_v1 }
 0x377   : > { %10778 = vmatmul.mubr.msk.f32.gmra.mxu1 %vm212_vm1, %v13651_v49 }
 0x378   : > { %10828 = vmatmul.mubr.msk.f32.gmra.mxu0 %vm212_vm1, %v13653_v38  ;;  %10832 = vmatprep.mubr.msk.f32.mxu1 %vm212_vm1, %v13080_v24 }
 0x379   : > { %10882 = vmatprep.mubr.msk.f32.mxu0 %vm212_vm1, %v13078_v35 }
 0x37b   : > { %10833 = vmatmul.mubr.msk.f32.vlgmr.msra.gmra.mxu1 %vm212_vm1, %v14913_v26 }
 0x37c   : > { %10883 = vmatmul.mubr.msk.f32.vlgmr.msra.gmra.mxu0 %vm212_vm1, %v13086_v47  ;;  %10931 = vmatpush3.msk.msra.mxu1 %vm1407_vm0, %v13523_v50  ;;  %v14915_v50 = vld [vmem:[#allocation20_spill] sm:$0xff] }
 0x37d   : > { %10835 = vmatprep.mubr.msk.f32.mxu1 %vm212_vm1, %v14914_v25  ;;  %10885 = vmatprep.mubr.msk.f32.mxu0 %vm212_vm1, %v13094_v11  ;;  %v14916_v25 = vld [vmem:[#allocation19_spill] sm:$0xff] }
 0x37f   : > { %v10537_v35 = vpop.f32.mrf.mxu1  ;;  %10836 = vmatmul.mubr.msk.f32.gmra.mxu1 %vm212_vm1, %v13104_v17  ;;  %v14917_v17 = vld [vmem:[#allocation21_spill] sm:$0xff] }
 0x380   : > { %v10587_v24 = vpop.f32.mrf.mxu0  ;;  %10886 = vmatmul.mubr.msk.f32.gmra.mxu0 %vm212_vm1, %v13102_v61  ;;  %10838 = vmatprep.mubr.msk.f32.mxu1 %vm212_vm1, %v14915_v50 }
 0x381   : > { %v13681_v47 = vadd.f32 %v10587_v24, %v10537_v35  ;;  %10888 = vmatprep.mubr.msk.f32.mxu0 %vm212_vm1, %v13110_v3  ;;  %v5257_v54 = vpop.f32.mrf.mxu1 }
 0x382   : > { %v5581_v40 = vpop.f32.mrf.mxu0 }
 0x383   : > { %v13687_v20 = vadd.f32 %v5581_v40, %v5257_v54  ;;  %v10540_v11 = vpop.f32.mrf.mxu1  ;;  %10839 = vmatmul.mubr.msk.f32.gmra.mxu1 %vm212_vm1, %v14916_v25  ;;  %v14918_v40 = vld [vmem:[#allocation58_spill] sm:$0xff] }
 0x384   : > { %v10590_v26 = vpop.f32.mrf.mxu0  ;;  %10889 = vmatmul.mubr.msk.f32.gmra.mxu0 %vm212_vm1, %v13118_v2  ;;  %10841 = vmatprep.mubr.msk.f32.mxu1 %vm212_vm1, %v14917_v17 }
 0x385   : > { %v13693_v61 = vadd.f32 %v10590_v26, %v10540_v11  ;;  %10891 = vmatprep.mubr.msk.f32.mxu0 %vm212_vm1, %v13126_v36  ;;  %v5267_v3 = vpop.f32.mrf.mxu1  ;;  %v14919_v11 = vld [vmem:[#allocation62_spill] sm:$0xff] }
 0x386   : > { %v5591_v35 = vpop.f32.mrf.mxu0 }
 0x387   : > { %v13699_v24 = vadd.f32 %v5591_v35, %v5267_v3  ;;  %v10543_v50 = vpop.f32.mrf.mxu1  ;;  %10842 = vmatmul.mubr.msk.f32.gmra.mxu1 %vm212_vm1, %v14918_v40  ;;  %v14920_v35 = vld [vmem:[#allocation9_spill] sm:$0xff] }
 0x388   : > { %v10593_v54 = vpop.f32.mrf.mxu0  ;;  %10892 = vmatmul.mubr.msk.f32.gmra.mxu0 %vm212_vm1, %v13134_v0  ;;  %10844 = vmatprep.mubr.msk.f32.mxu1 %vm212_vm1, %v14919_v11 }
 0x389   : > { %v13705_v2 = vadd.f32 %v10593_v54, %v10543_v50  ;;  %10894 = vmatprep.mubr.msk.f32.mxu0 %vm212_vm1, %v13142_v22  ;;  %v5277_v36 = vpop.f32.mrf.mxu1  ;;  %v14921_v50 = vld [vmem:[#allocation10_spill] sm:$0xff] }
 0x38a   : > { %v5601_v26 = vpop.f32.mrf.mxu0 }
 0x38b   : > { %v13711_v25 = vadd.f32 %v5601_v26, %v5277_v36  ;;  %v10546_v17 = vpop.f32.mrf.mxu1  ;;  %10845 = vmatmul.mubr.msk.f32.gmra.mxu1 %vm212_vm1, %v14920_v35  ;;  %v14922_v26 = vld [vmem:[#allocation39_spill] sm:$0xff] }
 0x38c   : > { %v10596_v3 = vpop.f32.mrf.mxu0  ;;  %10895 = vmatmul.mubr.msk.f32.gmra.mxu0 %vm212_vm1, %v13150_v44  ;;  %10847 = vmatprep.mubr.msk.f32.mxu1 %vm212_vm1, %v14921_v50 }
 0x38d   : > { %v13717_v0 = vadd.f32 %v10596_v3, %v10546_v17  ;;  %10897 = vmatprep.mubr.msk.f32.mxu0 %vm212_vm1, %v13158_v23  ;;  %v5287_v22 = vpop.f32.mrf.mxu1  ;;  %v14923_v17 = vld [vmem:[#allocation40_spill] sm:$0xff] }
 0x38e   : > { %v5611_v54 = vpop.f32.mrf.mxu0 }
 0x38f   : > { %v13723_v40 = vadd.f32 %v5611_v54, %v5287_v22  ;;  %v10549_v11 = vpop.f32.mrf.mxu1  ;;  %10848 = vmatmul.mubr.msk.f32.gmra.mxu1 %vm212_vm1, %v14922_v26  ;;  %v14924_v54 = vld [vmem:[#allocation22_spill] sm:$0xff] }
 0x390   : > { %v10599_v36 = vpop.f32.mrf.mxu0  ;;  %10898 = vmatmul.mubr.msk.f32.gmra.mxu0 %vm212_vm1, %v13166_v41  ;;  %10850 = vmatprep.mubr.msk.f32.mxu1 %vm212_vm1, %v14923_v17 }
 0x391   : > { %v13729_v44 = vadd.f32 %v10599_v36, %v10549_v11  ;;  %10900 = vmatprep.mubr.msk.f32.mxu0 %vm212_vm1, %v13174_v59  ;;  %v5297_v23 = vpop.f32.mrf.mxu1  ;;  %v14925_v11 = vld [vmem:[#allocation23_spill] sm:$0xff] }
 0x392   : > { %v5621_v3 = vpop.f32.mrf.mxu0 }
 0x393   : > { %v13735_v35 = vadd.f32 %v5621_v3, %v5297_v23  ;;  %v10552_v50 = vpop.f32.mrf.mxu1  ;;  %10851 = vmatmul.mubr.msk.f32.gmra.mxu1 %vm212_vm1, %v14924_v54  ;;  %v14926_v3 = vld [vmem:[#allocation61_spill] sm:$0xff] }
 0x394   : > { %v10602_v22 = vpop.f32.mrf.mxu0  ;;  %10901 = vmatmul.mubr.msk.f32.gmra.mxu0 %vm212_vm1, %v13182_v33  ;;  %10853 = vmatprep.mubr.msk.f32.mxu1 %vm212_vm1, %v14925_v11 }
 0x395   : > { %v13741_v41 = vadd.f32 %v10602_v22, %v10552_v50  ;;  %10903 = vmatprep.mubr.msk.f32.mxu0 %vm212_vm1, %v13190_v46  ;;  %v5307_v59 = vpop.f32.mrf.mxu1  ;;  %v14927_v50 = vld [vmem:[#allocation64_spill] sm:$0xff] }
 0x396   : > { %v5631_v36 = vpop.f32.mrf.mxu0 }
 0x397   : > { %v13747_v26 = vadd.f32 %v5631_v36, %v5307_v59  ;;  %v10555_v17 = vpop.f32.mrf.mxu1  ;;  %10854 = vmatmul.mubr.msk.f32.gmra.mxu1 %vm212_vm1, %v14926_v3  ;;  %v14928_v36 = vld [vmem:[#allocation11_spill] sm:$0xff] }
 0x398   : > { %v10605_v23 = vpop.f32.mrf.mxu0  ;;  %10904 = vmatmul.mubr.msk.f32.gmra.mxu0 %vm212_vm1, %v13198_v6  ;;  %10856 = vmatprep.mubr.msk.f32.mxu1 %vm212_vm1, %v14927_v50 }
 0x399   : > { %v13753_v33 = vadd.f32 %v10605_v23, %v10555_v17  ;;  %10906 = vmatprep.mubr.msk.f32.mxu0 %vm212_vm1, %v13206_v39  ;;  %v5317_v46 = vpop.f32.mrf.mxu1  ;;  %v14929_v17 = vld [vmem:[#allocation12_spill] sm:$0xff] }
 0x39a   : > { %v5641_v22 = vpop.f32.mrf.mxu0 }
 0x39b   : > { %v13759_v54 = vadd.f32 %v5641_v22, %v5317_v46  ;;  %v10558_v11 = vpop.f32.mrf.mxu1  ;;  %10857 = vmatmul.mubr.msk.f32.gmra.mxu1 %vm212_vm1, %v14928_v36  ;;  %v14930_v22 = vld [vmem:[#allocation42_spill] sm:$0xff] }
 0x39c   : > { %v10608_v59 = vpop.f32.mrf.mxu0  ;;  %10907 = vmatmul.mubr.msk.f32.gmra.mxu0 %vm212_vm1, %v13214_v28  ;;  %10859 = vmatprep.mubr.msk.f32.mxu1 %vm212_vm1, %v14929_v17 }
 0x39d   : > { %v13765_v6 = vadd.f32 %v10608_v59, %v10558_v11  ;;  %10909 = vmatprep.mubr.msk.f32.mxu0 %vm212_vm1, %v13222_v16  ;;  %v5327_v39 = vpop.f32.mrf.mxu1  ;;  %v14931_v11 = vld [vmem:[#allocation41_spill] sm:$0xff] }
 0x39e   : > { %v5651_v23 = vpop.f32.mrf.mxu0 }
 0x39f   : > { %v13771_v3 = vadd.f32 %v5651_v23, %v5327_v39  ;;  %v10561_v50 = vpop.f32.mrf.mxu1  ;;  %10860 = vmatmul.mubr.msk.f32.gmra.mxu1 %vm212_vm1, %v14930_v22  ;;  %v14932_v23 = vld [vmem:[#allocation24_spill] sm:$0xff] }
 0x3a0   : > { %v10611_v46 = vpop.f32.mrf.mxu0  ;;  %10910 = vmatmul.mubr.msk.f32.gmra.mxu0 %vm212_vm1, %v13230_v32  ;;  %10862 = vmatprep.mubr.msk.f32.mxu1 %vm212_vm1, %v14931_v11 }
 0x3a1   : > { %v13777_v28 = vadd.f32 %v10611_v46, %v10561_v50  ;;  %10912 = vmatprep.mubr.msk.f32.mxu0 %vm212_vm1, %v13238_v10  ;;  %v5337_v16 = vpop.f32.mrf.mxu1  ;;  %v14933_v50 = vld [vmem:[#allocation25_spill] sm:$0xff] }
 0x3a2   : > { %v5661_v59 = vpop.f32.mrf.mxu0 }
 0x3a3   : > { %v13783_v36 = vadd.f32 %v5661_v59, %v5337_v16  ;;  %v10564_v17 = vpop.f32.mrf.mxu1  ;;  %10863 = vmatmul.mubr.msk.f32.gmra.mxu1 %vm212_vm1, %v14932_v23  ;;  %v14934_v59 = vld [vmem:[#allocation63_spill] sm:$0xff] }
 0x3a4   : > { %v10614_v39 = vpop.f32.mrf.mxu0  ;;  %10913 = vmatmul.mubr.msk.f32.gmra.mxu0 %vm212_vm1, %v13246_v37  ;;  %10865 = vmatprep.mubr.msk.f32.mxu1 %vm212_vm1, %v14933_v50 }
 0x3a5   : > { %v13789_v32 = vadd.f32 %v10614_v39, %v10564_v17  ;;  %10915 = vmatprep.mubr.msk.f32.mxu0 %vm212_vm1, %v13254_v21  ;;  %v5347_v10 = vpop.f32.mrf.mxu1  ;;  %v14935_v17 = vld [vmem:[#allocation66_spill] sm:$0xff] }
 0x3a6   : > { %v5671_v46 = vpop.f32.mrf.mxu0 }
 0x3a7   : > { %v13795_v22 = vadd.f32 %v5671_v46, %v5347_v10  ;;  %v10567_v11 = vpop.f32.mrf.mxu1  ;;  %10866 = vmatmul.mubr.msk.f32.gmra.mxu1 %vm212_vm1, %v14934_v59  ;;  %v14936_v46 = vld [vmem:[#allocation14_spill] sm:$0xff] }
 0x3a8   : > { %v10617_v16 = vpop.f32.mrf.mxu0  ;;  %10916 = vmatmul.mubr.msk.f32.gmra.mxu0 %vm212_vm1, %v13262_v30  ;;  %10868 = vmatprep.mubr.msk.f32.mxu1 %vm212_vm1, %v14935_v17 }
 0x3a9   : > { %v13801_v37 = vadd.f32 %v10617_v16, %v10567_v11  ;;  %10918 = vmatprep.mubr.msk.f32.mxu0 %vm212_vm1, %v13270_v4  ;;  %v5357_v21 = vpop.f32.mrf.mxu1  ;;  %v14937_v11 = vld [vmem:[#allocation44_spill] sm:$0xff] }
 0x3aa   : > { %v5681_v39 = vpop.f32.mrf.mxu0 }
 0x3ab   : > { %v13807_v23 = vadd.f32 %v5681_v39, %v5357_v21  ;;  %v10570_v50 = vpop.f32.mrf.mxu1  ;;  %10869 = vmatmul.mubr.msk.f32.gmra.mxu1 %vm212_vm1, %v14936_v46  ;;  %v14938_v39 = vld [vmem:[#allocation65_spill] sm:$0xff] }
 0x3ac   : > { %v10620_v10 = vpop.f32.mrf.mxu0  ;;  %10919 = vmatmul.mubr.msk.f32.gmra.mxu0 %vm212_vm1, %v14910_v51  ;;  %10871 = vmatprep.mubr.msk.f32.mxu1 %vm212_vm1, %v14937_v11  ;;  %v7710_v46 = vld [vmem:[#allocation2 + $0x199] sm:$0xff] }
 0x3ad   : > { %v13813_v30 = vadd.f32 %v10620_v10, %v10570_v50  ;;  %10921 = vmatprep.mubr.msk.f32.mxu0 %vm212_vm1, %v14911_v63  ;;  %v5367_v4 = vpop.f32.mrf.mxu1  ;;  %v7320_v10 = vld [vmem:[#allocation2 + $0x198] sm:$0xff] }
 0x3ae   : > { %v5691_v16 = vpop.f32.mrf.mxu0 }
 0x3af   : > { %v13819_v59 = vadd.f32 %v5691_v16, %v5367_v4  ;;  %v10573_v17 = vpop.f32.mrf.mxu1  ;;  %10872 = vmatmul.mubr.msk.f32.gmra.mxu1 %vm212_vm1, %v13296_v60 }
 0x3b0   : > { %v10623_v21 = vpop.f32.mrf.mxu0  ;;  %10922 = vmatmul.mubr.msk.f32.gmra.mxu0 %vm212_vm1, %v14912_v53  ;;  %10874 = vmatprep.mubr.msk.f32.mxu1 %vm212_vm1, %v14938_v39  ;;  %v7321_v53 = vld [vmem:[#allocation2 + $0x1a0] sm:$0xff] }
 0x3b1   : > { %v13825_v51 = vadd.f32 %v10623_v21, %v10573_v17  ;;  %10924 = vmatprep.mubr.msk.f32.mxu0 %vm212_vm1, %v13643_v62  ;;  %v5377_v63 = vpop.f32.mrf.mxu1  ;;  %v7711_v62 = vld [vmem:[#allocation2 + $0x1a1] sm:$0xff] }
 0x3b2   : > { %v5701_v50 = vpop.f32.mrf.mxu0 }
 0x3b3   : > { %v13831_v11 = vadd.f32 %v5701_v50, %v5377_v63  ;;  %v10576_v4 = vpop.f32.mrf.mxu1  ;;  %10875 = vmatmul.mubr.msk.f32.gmra.mxu1 %vm212_vm1, %v13506_v45 }
 0x3b4   : > { %v10626_v16 = vpop.f32.mrf.mxu0  ;;  %10925 = vmatmul.mubr.msk.f32.gmra.mxu0 %vm212_vm1, %v13651_v49  ;;  %10877 = vmatprep.mubr.msk.f32.mxu1 %vm212_vm1, %v7320_v10 }
 0x3b5   : > { %v13837_v60 = vadd.f32 %v10626_v16, %v10576_v4  ;;  %10927 = vmatprep.mubr.msk.f32.mxu0 %vm212_vm1, %v7710_v46  ;;  %v5387_v17 = vpop.f32.mrf.mxu1 }
 0x3b6   : > { %v5711_v21 = vpop.f32.mrf.mxu0 }
 0x3b7   : > { %v13841_v39 = vadd.f32 %v5711_v21, %v5387_v17  ;;  %v10579_v63 = vpop.f32.mrf.mxu1  ;;  %10878 = vmatmul.mubr.msk.f32.gmra.mxu1 %vm212_vm1, %v7321_v53  ;;  %v5572_v17 = vadd.f32 %v13673_v12, %v13671_v19  ;;  %v14940_v53 = vld [vmem:[#allocation27_spill] sm:$0xff] }
 0x3b8   : > { %v10629_v50 = vpop.f32.mrf.mxu0  ;;  %10928 = vmatmul.mubr.msk.f32.gmra.mxu0 %vm212_vm1, %v7711_v62  ;;  %10932 = vmatprep.mubr.msk.f32.mxu1 %vm212_vm1, %v13338_v29 }
 0x3b9   : > { %v13845_v45 = vadd.f32 %v10629_v50, %v10579_v63  ;;  %v5397_v49 = vpop.f32.mrf.mxu1 }
 0x3ba   : > { %v5721_v10 = vpop.f32.mrf.mxu0 }
 0x3bb   : > { %v13849_v4 = vadd.f32 %v5721_v10, %v5397_v49  ;;  %v10634_v46 = vpop.f32.mrf.mxu1  ;;  %10933 = vmatmul.mubr.msk.f32.vlgmr.msra.gmra.mxu1 %vm212_vm1, %v13344_v55 }
 0x3bc   : > { %v10684_v16 = vpop.f32.mrf.mxu0  ;;  %v6089_v21 = vadd.f32 %v10634_v46, %v14940_v53  ;;  %10935 = vmatprep.mubr.msk.f32.mxu1 %vm212_vm1, %v13352_v42 }
 0x3bd   : > { %14939 = vst [vmem:[#allocation68_spill] sm:$0xff] %v13849_v4  ;;  %v5929_v62 = vpop.f32.mrf.mxu1 }
 0x3be   : > { %v6319_v63 = vpop.f32.mrf.mxu0  ;;  %v13858_v29 = vadd.f32 %v10684_v16, %v6089_v21  ;;  %v6088_v50 = vadd.f32 %v5929_v62, %v5572_v17 }
 0x3bf   : > { %v10637_v49 = vpop.f32.mrf.mxu1  ;;  %10936 = vmatmul.mubr.msk.f32.gmra.mxu1 %vm212_vm1, %v13358_v5 }
 0x3c0   : > { %v10687_v10 = vpop.f32.mrf.mxu0  ;;  %v13862_v4 = vadd.f32 %v6319_v63, %v6088_v50  ;;  %v6091_v55 = vadd.f32 %v10637_v49, %v13681_v47  ;;  %10938 = vmatprep.mubr.msk.f32.mxu1 %vm212_vm1, %v13364_v13 }
 0x3c1   : > { %v5939_v19 = vpop.f32.mrf.mxu1 }
 0x3c2   : > { %v6329_v12 = vpop.f32.mrf.mxu0  ;;  %v13867_v42 = vadd.f32 %v10687_v10, %v6091_v55  ;;  %v6090_v46 = vadd.f32 %v5939_v19, %v13687_v20 }
 0x3c3   : > { %v10640_v16 = vpop.f32.mrf.mxu1  ;;  %10939 = vmatmul.mubr.msk.f32.gmra.mxu1 %vm212_vm1, %v13370_v48 }
 0x3c4   : > { %v10690_v17 = vpop.f32.mrf.mxu0  ;;  %v13872_v53 = vadd.f32 %v6329_v12, %v6090_v46  ;;  %v6093_v5 = vadd.f32 %v10640_v16, %v13693_v61  ;;  %10941 = vmatprep.mubr.msk.f32.mxu1 %vm212_vm1, %v13376_v7 }
 0x3c5   : > { %v5949_v47 = vpop.f32.mrf.mxu1 }
 0x3c6   : > { %v6339_v13 = vpop.f32.mrf.mxu0  ;;  %v13877_v21 = vadd.f32 %v10690_v17, %v6093_v5  ;;  %v6092_v62 = vadd.f32 %v5949_v47, %v13699_v24 }
 0x3c7   : > { %v10643_v63 = vpop.f32.mrf.mxu1  ;;  %10942 = vmatmul.mubr.msk.f32.gmra.mxu1 %vm212_vm1, %v13382_v56 }
 0x3c8   : > { %v10693_v20 = vpop.f32.mrf.mxu0  ;;  %v13882_v50 = vadd.f32 %v6339_v13, %v6092_v62  ;;  %v6095_v48 = vadd.f32 %v10643_v63, %v13705_v2  ;;  %10944 = vmatprep.mubr.msk.f32.mxu1 %vm212_vm1, %v13388_v57 }
 0x3c9   : > { %v5959_v61 = vpop.f32.mrf.mxu1 }
 0x3ca   : > { %v6349_v7 = vpop.f32.mrf.mxu0  ;;  %v13887_v49 = vadd.f32 %v10693_v20, %v6095_v48  ;;  %v6094_v10 = vadd.f32 %v5959_v61, %v13711_v25 }
 0x3cb   : > { %v10646_v55 = vpop.f32.mrf.mxu1  ;;  %10945 = vmatmul.mubr.msk.f32.gmra.mxu1 %vm212_vm1, %v13394_v31 }
 0x3cc   : > { %v10696_v24 = vpop.f32.mrf.mxu0  ;;  %v13892_v19 = vadd.f32 %v6349_v7, %v6094_v10  ;;  %v6097_v56 = vadd.f32 %v10646_v55, %v13717_v0  ;;  %10947 = vmatprep.mubr.msk.f32.mxu1 %vm212_vm1, %v13400_v8 }
 0x3cd   : > { %v5969_v2 = vpop.f32.mrf.mxu1 }
 0x3ce   : > { %v6359_v57 = vpop.f32.mrf.mxu0  ;;  %v13897_v12 = vadd.f32 %v10696_v24, %v6097_v56  ;;  %v6096_v46 = vadd.f32 %v5969_v2, %v13723_v40 }
 0x3cf   : > { %v10649_v16 = vpop.f32.mrf.mxu1  ;;  %10948 = vmatmul.mubr.msk.f32.gmra.mxu1 %vm212_vm1, %v13406_v52 }
 0x3d0   : > { %v10699_v25 = vpop.f32.mrf.mxu0  ;;  %v13902_v17 = vadd.f32 %v6359_v57, %v6096_v46  ;;  %v6099_v31 = vadd.f32 %v10649_v16, %v13729_v44  ;;  %10950 = vmatprep.mubr.msk.f32.mxu1 %vm212_vm1, %v13412_v18  ;;  %v8089_v57 = vld [vmem:[#allocation2 + $0x112] sm:$0xff] }
 0x3d1   : > { %v5979_v0 = vpop.f32.mrf.mxu1 }
 0x3d2   : > { %v6369_v8 = vpop.f32.mrf.mxu0  ;;  %v13907_v5 = vadd.f32 %v10699_v25, %v6099_v31  ;;  %v6098_v47 = vadd.f32 %v5979_v0, %v13735_v35  ;;  %v8091_v0 = vld [vmem:[#allocation2 + $0x12a] sm:$0xff] }
 0x3d3   : > { %v10652_v13 = vpop.f32.mrf.mxu1  ;;  %10951 = vmatmul.mubr.msk.f32.gmra.mxu1 %vm212_vm1, %v13418_v58 }
 0x3d4   : > { %v10702_v40 = vpop.f32.mrf.mxu0  ;;  %v13912_v62 = vadd.f32 %v6369_v8, %v6098_v47  ;;  %v6101_v52 = vadd.f32 %v10652_v13, %v13741_v41  ;;  %10953 = vmatprep.mubr.msk.f32.mxu1 %vm212_vm1, %v13424_v43  ;;  %v8092_v47 = vld [vmem:[#allocation2 + $0x13a] sm:$0xff] }
 0x3d5   : > { %v5989_v44 = vpop.f32.mrf.mxu1 }
 0x3d6   : > { %v6379_v18 = vpop.f32.mrf.mxu0  ;;  %v13917_v63 = vadd.f32 %v10702_v40, %v6101_v52  ;;  %v6100_v20 = vadd.f32 %v5989_v44, %v13747_v26 }
 0x3d7   : > { %v10655_v48 = vpop.f32.mrf.mxu1  ;;  %10954 = vmatmul.mubr.msk.f32.gmra.mxu1 %vm212_vm1, %v13430_v14 }
 0x3d8   : > { %v10705_v35 = vpop.f32.mrf.mxu0  ;;  %v13922_v61 = vadd.f32 %v6379_v18, %v6100_v20  ;;  %v6103_v58 = vadd.f32 %v10655_v48, %v13753_v33  ;;  %10956 = vmatprep.mubr.msk.f32.mxu1 %vm212_vm1, %v13436_v15  ;;  %v8093_v18 = vld [vmem:[#allocation2 + $0x142] sm:$0xff]  ;;  %v8094_v48 = vld [vmem:[#allocation2 + $0x152] sm:$0xff] }
 0x3d9   : > { %v5999_v41 = vpop.f32.mrf.mxu1 }
 0x3da   : > { %v6389_v43 = vpop.f32.mrf.mxu0  ;;  %v13927_v7 = vadd.f32 %v10705_v35, %v6103_v58  ;;  %v6102_v10 = vadd.f32 %v5999_v41, %v13759_v54 }
 0x3db   : > { %v10658_v55 = vpop.f32.mrf.mxu1  ;;  %10957 = vmatmul.mubr.msk.f32.gmra.mxu1 %vm212_vm1, %v13442_v34 }
 0x3dc   : > { %v10708_v26 = vpop.f32.mrf.mxu0  ;;  %v13932_v24 = vadd.f32 %v6389_v43, %v6102_v10  ;;  %v6105_v14 = vadd.f32 %v10658_v55, %v13765_v6  ;;  %10959 = vmatprep.mubr.msk.f32.mxu1 %vm212_vm1, %v13448_v9  ;;  %v8095_v55 = vld [vmem:[#allocation2 + $0x15a] sm:$0xff] }
 0x3dd   : > { %v6009_v33 = vpop.f32.mrf.mxu1 }
 0x3de   : > { %v6399_v15 = vpop.f32.mrf.mxu0  ;;  %v13937_v56 = vadd.f32 %v10708_v26, %v6105_v14  ;;  %v6104_v2 = vadd.f32 %v6009_v33, %v13771_v3  ;;  %v8096_v14 = vld [vmem:[#allocation2 + $0x16a] sm:$0xff] }
 0x3df   : > { %v10661_v54 = vpop.f32.mrf.mxu1  ;;  %10960 = vmatmul.mubr.msk.f32.gmra.mxu1 %vm212_vm1, %v8089_v57 }
 0x3e0   : > { %v10711_v46 = vpop.f32.mrf.mxu0  ;;  %v13941_v16 = vadd.f32 %v6399_v15, %v6104_v2  ;;  %v6107_v34 = vadd.f32 %v10661_v54, %v13777_v28  ;;  %10962 = vmatprep.mubr.msk.f32.mxu1 %vm212_vm1, %v13460_v27 }
 0x3e1   : > { %v6019_v6 = vpop.f32.mrf.mxu1 }
 0x3e2   : > { %v6409_v9 = vpop.f32.mrf.mxu0  ;;  %v13946_v25 = vadd.f32 %v10711_v46, %v6107_v34  ;;  %v6106_v31 = vadd.f32 %v6019_v6, %v13783_v36  ;;  %v8097_v46 = vld [vmem:[#allocation2 + $0x172] sm:$0xff] }
 0x3e3   : > { %v10664_v3 = vpop.f32.mrf.mxu1  ;;  %10963 = vmatmul.mubr.msk.f32.gmra.mxu1 %vm212_vm1, %v8091_v0  ;;  %v8100_v0 = vld [vmem:[#allocation2 + $0x19a] sm:$0xff] }
 0x3e4   : > { %v10714_v8 = vpop.f32.mrf.mxu0  ;;  %v13950_v13 = vadd.f32 %v6409_v9, %v6106_v31  ;;  %v6109_v40 = vadd.f32 %v10664_v3, %v13789_v32  ;;  %10965 = vmatprep.mubr.msk.f32.mxu1 %vm212_vm1, %v8092_v47 }
 0x3e5   : > { %v6029_v28 = vpop.f32.mrf.mxu1 }
 0x3e6   : > { %v6419_v27 = vpop.f32.mrf.mxu0  ;;  %v13954_v52 = vadd.f32 %v10714_v8, %v6109_v40  ;;  %v6108_v44 = vadd.f32 %v6029_v28, %v13795_v22 }
 0x3e7   : > { %v10667_v36 = vpop.f32.mrf.mxu1  ;;  %10966 = vmatmul.mubr.msk.f32.gmra.mxu1 %vm212_vm1, %v8093_v18 }
 0x3e8   : > { %v10717_v20 = vpop.f32.mrf.mxu0  ;;  %v13958_v35 = vadd.f32 %v6419_v27, %v6108_v44  ;;  %v6111_v58 = vadd.f32 %v10667_v36, %v13801_v37  ;;  %10968 = vmatprep.mubr.msk.f32.mxu1 %vm212_vm1, %v8094_v48 }
 0x3e9   : > { %v6039_v32 = vpop.f32.mrf.mxu1 }
 0x3ea   : > { %v6429_v41 = vpop.f32.mrf.mxu0  ;;  %v13962_v43 = vadd.f32 %v10717_v20, %v6111_v58  ;;  %v6110_v10 = vadd.f32 %v6039_v32, %v13807_v23  ;;  %v14941_v32 = vld [vmem:[#allocation68_spill] sm:$0xff] }
 0x3eb   : > { %v10670_v22 = vpop.f32.mrf.mxu1  ;;  %10969 = vmatmul.mubr.msk.f32.gmra.mxu1 %vm212_vm1, %v8095_v55 }
 0x3ec   : > { %v10720_v26 = vpop.f32.mrf.mxu0  ;;  %v13966_v33 = vadd.f32 %v6429_v41, %v6110_v10  ;;  %v6113_v15 = vadd.f32 %v10670_v22, %v13813_v30  ;;  %10971 = vmatprep.mubr.msk.f32.mxu1 %vm212_vm1, %v8096_v14 }
 0x3ed   : > { %v6049_v37 = vpop.f32.mrf.mxu1 }
 0x3ee   : > { %v6439_v2 = vpop.f32.mrf.mxu0  ;;  %v13970_v57 = vadd.f32 %v10720_v26, %v6113_v15  ;;  %v6112_v54 = vadd.f32 %v6049_v37, %v13819_v59 }
 0x3ef   : > { %v10673_v23 = vpop.f32.mrf.mxu1  ;;  %10972 = vmatmul.mubr.msk.f32.gmra.mxu1 %vm212_vm1, %v8097_v46 }
 0x3f0   : > { %v10723_v34 = vpop.f32.mrf.mxu0  ;;  %v13974_v6 = vadd.f32 %v6439_v2, %v6112_v54  ;;  %v6115_v9 = vadd.f32 %v10673_v23, %v13825_v51  ;;  %10974 = vmatprep.mubr.msk.f32.mxu1 %vm212_vm1, %v13645_v1  ;;  %v8101_v51 = vld [vmem:[#allocation2 + $0x1a2] sm:$0xff] }
 0x3f1   : > { %v6059_v30 = vpop.f32.mrf.mxu1 }
 0x3f2   : > { %v6449_v31 = vpop.f32.mrf.mxu0  ;;  %v13979_v3 = vadd.f32 %v10723_v34, %v6115_v9  ;;  %v6114_v8 = vadd.f32 %v6059_v30, %v13831_v11 }
 0x3f3   : > { %v10676_v59 = vpop.f32.mrf.mxu1  ;;  %10975 = vmatmul.mubr.msk.f32.gmra.mxu1 %vm212_vm1, %v13653_v38 }
 0x3f4   : > { %v10726_v47 = vpop.f32.mrf.mxu0  ;;  %v13984_v40 = vadd.f32 %v6449_v31, %v6114_v8  ;;  %v6117_v28 = vadd.f32 %v10676_v59, %v13837_v60  ;;  %10977 = vmatprep.mubr.msk.f32.mxu1 %vm212_vm1, %v8100_v0 }
 0x3f5   : > { %v6069_v1 = vpop.f32.mrf.mxu1 }
 0x3f6   : > { %v6459_v27 = vpop.f32.mrf.mxu0  ;;  %v13988_v44 = vadd.f32 %v10726_v47, %v6117_v28  ;;  %v6116_v18 = vadd.f32 %v6069_v1, %v13841_v39 }
 0x3f7   : > { %v10679_v36 = vpop.f32.mrf.mxu1  ;;  %10978 = vmatmul.mubr.msk.f32.gmra.mxu1 %vm212_vm1, %v8101_v51 }
 0x3f8   : > { %v10729_v11 = vpop.f32.mrf.mxu0  ;;  %v13992_v20 = vadd.f32 %v6459_v27, %v6116_v18  ;;  %v6119_v38 = vadd.f32 %v10679_v36, %v13845_v45 }
 0x3f9   : > { %v6079_v48 = vpop.f32.mrf.mxu1 }
 0x3fa   : > { %v6469_v58 = vpop.f32.mrf.mxu0  ;;  %v13995_v60 = vadd.f32 %v10729_v11, %v6119_v38  ;;  %v6118_v41 = vadd.f32 %v6079_v48, %v14941_v32 }
 0x3fb   : > { %v10734_v10 = vpop.f32.mrf.mxu1 }
 0x3fc   : > { %v10784_v55 = vpop.f32.mrf.mxu0  ;;  %v13998_v22 = vadd.f32 %v6469_v58, %v6118_v41  ;;  %v6869_v39 = vadd.f32 %v10734_v10, %v13858_v29 }
 0x3fd   : > { %v6709_v26 = vpop.f32.mrf.mxu1 }
 0x3fe   : > { %v14001_v14 = vpop.f32.mrf.mxu0  ;;  %v14003_v15 = vadd.f32 %v10784_v55, %v6869_v39  ;;  %v14006_v37 = vadd.f32 %v6709_v26, %v13862_v4 }
 0x3ff   : > { %v10737_v45 = vpop.f32.mrf.mxu1 }
 0x400   : > { %v10787_v2 = vpop.f32.mrf.mxu0  ;;  %v6871_v54 = vadd.f32 %v10737_v45, %v13867_v42 }
 0x401   : > { %v6719_v46 = vpop.f32.mrf.mxu1 }
 0x402   : > { %v14009_v23 = vpop.f32.mrf.mxu0  ;;  %v14011_v34 = vadd.f32 %v10787_v2, %v6871_v54  ;;  %v14014_v9 = vadd.f32 %v6719_v46, %v13872_v53 }
 0x403   : > { %v10740_v29 = vpop.f32.mrf.mxu1 }
 0x404   : > { %v10790_v30 = vpop.f32.mrf.mxu0  ;;  %v6873_v31 = vadd.f32 %v10740_v29, %v13877_v21 }
 0x405   : > { %v6729_v0 = vpop.f32.mrf.mxu1 }
 0x406   : > { %v14017_v8 = vpop.f32.mrf.mxu0  ;;  %v14019_v4 = vadd.f32 %v10790_v30, %v6873_v31  ;;  %v14022_v59 = vadd.f32 %v6729_v0, %v13882_v50 }
 0x407   : > { %v10743_v42 = vpop.f32.mrf.mxu1 }
 0x408   : > { %v10793_v47 = vpop.f32.mrf.mxu0  ;;  %v6875_v28 = vadd.f32 %v10743_v42, %v13887_v49 }
 0x409   : > { %v6739_v51 = vpop.f32.mrf.mxu1 }
 0x40a   : > { %v14025_v1 = vpop.f32.mrf.mxu0  ;;  %v14027_v53 = vadd.f32 %v10793_v47, %v6875_v28  ;;  %v14030_v27 = vadd.f32 %v6739_v51, %v13892_v19 }
 0x40b   : > { %v10746_v21 = vpop.f32.mrf.mxu1 }
 0x40c   : > { %v10796_v18 = vpop.f32.mrf.mxu0  ;;  %v6877_v36 = vadd.f32 %v10746_v21, %v13897_v12 }
 0x40d   : > { %v6749_v11 = vpop.f32.mrf.mxu1 }
 0x40e   : > { %v14033_v38 = vpop.f32.mrf.mxu0  ;;  %v14035_v50 = vadd.f32 %v10796_v18, %v6877_v36  ;;  %v14038_v48 = vadd.f32 %v6749_v11, %v13902_v17 }
 0x40f   : > { %v10749_v49 = vpop.f32.mrf.mxu1 }
 0x410   : > { %v10799_v58 = vpop.f32.mrf.mxu0  ;;  %v6879_v32 = vadd.f32 %v10749_v49, %v13907_v5 }
 0x411   : > { %v6759_v41 = vpop.f32.mrf.mxu1 }
 0x412   : > { %v14041_v10 = vpop.f32.mrf.mxu0  ;;  %v14043_v19 = vadd.f32 %v10799_v58, %v6879_v32  ;;  %v14046_v55 = vadd.f32 %v6759_v41, %v13912_v62 }
 0x413   : > { %v10752_v12 = vpop.f32.mrf.mxu1 }
 0x414   : > { %v10802_v39 = vpop.f32.mrf.mxu0  ;;  %v6881_v26 = vadd.f32 %v10752_v12, %v13917_v63 }
 0x415   : > { %v6769_v45 = vpop.f32.mrf.mxu1 }
 0x416   : > { %v14049_v2 = vpop.f32.mrf.mxu0  ;;  %v14051_v17 = vadd.f32 %v10802_v39, %v6881_v26  ;;  %v14054_v54 = vadd.f32 %v6769_v45, %v13922_v61 }
 0x417   : > { %v10755_v5 = vpop.f32.mrf.mxu1 }
 0x418   : > { %v10805_v46 = vpop.f32.mrf.mxu0  ;;  %v6883_v29 = vadd.f32 %v10755_v5, %v13927_v7 }
 0x419   : > { %v6779_v30 = vpop.f32.mrf.mxu1 }
 0x41a   : > { %v14057_v31 = vpop.f32.mrf.mxu0  ;;  %v14059_v62 = vadd.f32 %v10805_v46, %v6883_v29  ;;  %v14062_v0 = vadd.f32 %v6779_v30, %v13932_v24 }
 0x41b   : > { %v10758_v63 = vpop.f32.mrf.mxu1 }
 0x41c   : > { %v10808_v42 = vpop.f32.mrf.mxu0  ;;  %v6885_v47 = vadd.f32 %v10758_v63, %v13937_v56 }
 0x41d   : > { %v6789_v28 = vpop.f32.mrf.mxu1 }
 0x41e   : > { %v14065_v51 = vpop.f32.mrf.mxu0  ;;  %v14067_v61 = vadd.f32 %v10808_v42, %v6885_v47  ;;  %v14070_v21 = vadd.f32 %v6789_v28, %v13941_v16 }
 0x41f   : > { %v10761_v7 = vpop.f32.mrf.mxu1 }
 0x420   : > { %v10811_v18 = vpop.f32.mrf.mxu0  ;;  %v6887_v36 = vadd.f32 %v10761_v7, %v13946_v25 }
 0x421   : > { %v6799_v11 = vpop.f32.mrf.mxu1 }
 0x422   : > { %v14073_v49 = vpop.f32.mrf.mxu0  ;;  %v14075_v24 = vadd.f32 %v10811_v18, %v6887_v36  ;;  %v14078_v58 = vadd.f32 %v6799_v11, %v13950_v13 }
 0x423   : > { %14942 = vst [vmem:[#allocation5_spill] sm:$0xff] %v14073_v49  ;;  %v10764_v56 = vpop.f32.mrf.mxu1 }
 0x424   : > { %v10814_v32 = vpop.f32.mrf.mxu0  ;;  %v6889_v41 = vadd.f32 %v10764_v56, %v13954_v52 }
 0x425   : > { %v6809_v12 = vpop.f32.mrf.mxu1 }
 0x426   : > { %v14081_v39 = vpop.f32.mrf.mxu0  ;;  %v14083_v16 = vadd.f32 %v10814_v32, %v6889_v41  ;;  %v14086_v26 = vadd.f32 %v6809_v12, %v13958_v35 }
 0x427   : > { %14943 = vst [vmem:[#allocation15_spill] sm:$0xff] %v14081_v39  ;;  %v10767_v25 = vpop.f32.mrf.mxu1 }
 0x428   : > { %14944 = vst [vmem:[#allocation46_spill] sm:$0xff] %v14086_v26  ;;  %v10817_v45 = vpop.f32.mrf.mxu0  ;;  %v6891_v5 = vadd.f32 %v10767_v25, %v13962_v43 }
 0x429   : > { %v6819_v46 = vpop.f32.mrf.mxu1 }
 0x42a   : > { %v14089_v29 = vpop.f32.mrf.mxu0  ;;  %v14091_v13 = vadd.f32 %v10817_v45, %v6891_v5  ;;  %v14094_v30 = vadd.f32 %v6819_v46, %v13966_v33 }
 0x42b   : > { %14945 = vst [vmem:[#allocation45_spill] sm:$0xff] %v14089_v29  ;;  %v10770_v52 = vpop.f32.mrf.mxu1  ;;  %v14956_v29 = vld [vmem:[#allocation60_spill] sm:$0xff] }
 0x42c   : > { %14946 = vst [vmem:[#allocation28_spill] sm:$0xff] %v14094_v30  ;;  %v10820_v63 = vpop.f32.mrf.mxu0  ;;  %v6893_v42 = vadd.f32 %v10770_v52, %v13970_v57  ;;  %8667 = vrot.lane.b32.xlu0 %v14956_v29, %s11012_s12 }
 0x42d   : > { %v6829_v47 = vpop.f32.mrf.mxu1 }
 0x42e   : > { %v14097_v28 = vpop.f32.mrf.mxu0  ;;  %v14099_v35 = vadd.f32 %v10820_v63, %v6893_v42  ;;  %v14102_v7 = vadd.f32 %v6829_v47, %v13974_v6 }
 0x42f   : > { %14947 = vst [vmem:[#allocation29_spill] sm:$0xff] %v14097_v28  ;;  %v10773_v43 = vpop.f32.mrf.mxu1 }
 0x430   : > { %14948 = vst [vmem:[#allocation67_spill] sm:$0xff] %v14102_v7  ;;  %v10823_v18 = vpop.f32.mrf.mxu0  ;;  %v6895_v36 = vadd.f32 %v10773_v43, %v13979_v3 }
 0x431   : > { %v6839_v11 = vpop.f32.mrf.mxu1 }
 0x432   : > { %v14105_v56 = vpop.f32.mrf.mxu0  ;;  %v14107_v33 = vadd.f32 %v10823_v18, %v6895_v36  ;;  %v14110_v32 = vadd.f32 %v6839_v11, %v13984_v40 }
 0x433   : > { %14949 = vst [vmem:[#allocation70_spill] sm:$0xff] %v14105_v56  ;;  %v10776_v57 = vpop.f32.mrf.mxu1 }
 0x434   : > { %14950 = vst [vmem:[#allocation6_spill] sm:$0xff] %v14110_v32  ;;  %v10826_v41 = vpop.f32.mrf.mxu0  ;;  %v6897_v12 = vadd.f32 %v10776_v57, %v13988_v44 }
 0x435   : > { %v6849_v25 = vpop.f32.mrf.mxu1 }
 0x436   : > { %v14113_v45 = vpop.f32.mrf.mxu0  ;;  %v14115_v6 = vadd.f32 %v10826_v41, %v6897_v12  ;;  %v14118_v5 = vadd.f32 %v6849_v25, %v13992_v20 }
 0x437   : > { %14951 = vst [vmem:[#allocation7_spill] sm:$0xff] %v14113_v45  ;;  %v10779_v3 = vpop.f32.mrf.mxu1 }
 0x438   : > { %14952 = vst [vmem:[#allocation47_spill] sm:$0xff] %v14118_v5  ;;  %v10829_v46 = vpop.f32.mrf.mxu0  ;;  %v6899_v52 = vadd.f32 %v10779_v3, %v13995_v60 }
 0x439   : > { %v6859_v63 = vpop.f32.mrf.mxu1 }
 0x43a   : > { %v14121_v42 = vpop.f32.mrf.mxu0  ;;  %v14123_v40 = vadd.f32 %v10829_v46, %v6899_v52  ;;  %v14126_v47 = vadd.f32 %v6859_v63, %v13998_v22 }
 0x43b   : > { %14953 = vst [vmem:[#allocation48_spill] sm:$0xff] %v14121_v42  ;;  %v10834_v44 = vpop.f32.mrf.mxu1 }
 0x43c   : > { %14954 = vst [vmem:[#allocation30_spill] sm:$0xff] %v14126_v47  ;;  %v14128_v43 = vpop.f32.mrf.mxu0  ;;  %v14131_v18 = vadd.f32 %v10834_v44, %v14003_v15 }
 0x43d   : > { %v7489_v20 = vpop.f32.mrf.mxu1 }
 0x43e   : > { %v14133_v36 = vpop.f32.mrf.mxu0 }
 0x43f   : > { %v10837_v11 = vpop.f32.mrf.mxu1 }
 0x440   : > { %v14136_v60 = vadd.f32 %v10837_v11, %v14011_v34  ;;  %v14140_v41 = vpop.f32.mrf.mxu0 }
 0x441   : > { %v14138_v57 = vpop.f32.mrf.mxu1 }
 0x442   : > { %v14147_v3 = vpop.f32.mrf.mxu0 }
 0x443   : > { %v10840_v12 = vpop.f32.mrf.mxu1 }
 0x444   : > { %v14143_v22 = vadd.f32 %v10840_v12, %v14019_v4  ;;  %v14154_v34 = vpop.f32.mrf.mxu0 }
 0x445   : > { %v14145_v25 = vpop.f32.mrf.mxu1 }
 0x446   : > { %v14161_v4 = vpop.f32.mrf.mxu0 }
 0x447   : > { %v10843_v15 = vpop.f32.mrf.mxu1 }
 0x448   : > { %v14150_v46 = vadd.f32 %v10843_v15, %v14027_v53  ;;  %v14168_v53 = vpop.f32.mrf.mxu0 }
 0x449   : > { %v14152_v52 = vpop.f32.mrf.mxu1 }
 0x44b   : > { %v10846_v63 = vpop.f32.mrf.mxu1 }
 0x44c   : > { %v14157_v44 = vadd.f32 %v10846_v63, %v14035_v50  ;;  %v14175_v50 = vpop.f32.mrf.mxu0 }
 0x44d   : > { %v14159_v11 = vpop.f32.mrf.mxu1 }
 0x44f   : > { %v10849_v12 = vpop.f32.mrf.mxu1 }
 0x450   : > { %v14164_v42 = vadd.f32 %v10849_v12, %v14043_v19  ;;  %v14182_v19 = vpop.f32.mrf.mxu0 }
 0x451   : > { %v14166_v47 = vpop.f32.mrf.mxu1 }
 0x453   : > { %v10852_v15 = vpop.f32.mrf.mxu1 }
 0x454   : > { %v14171_v45 = vadd.f32 %v10852_v15, %v14051_v17  ;;  %v14189_v17 = vpop.f32.mrf.mxu0 }
 0x455   : > { %v14173_v5 = vpop.f32.mrf.mxu1 }
 0x457   : > { %v10855_v63 = vpop.f32.mrf.mxu1 }
 0x458   : > { %v14178_v56 = vadd.f32 %v10855_v63, %v14059_v62  ;;  %v14197_v63 = vpop.f32.mrf.mxu0 }
 0x459   : > { %v14180_v32 = vpop.f32.mrf.mxu1 }
 0x45b   : > { %v10858_v12 = vpop.f32.mrf.mxu1 }
 0x45c   : > { %v14185_v28 = vadd.f32 %v10858_v12, %v14067_v61  ;;  %v14204_v12 = vpop.f32.mrf.mxu0 }
 0x45d   : > { %v14187_v7 = vpop.f32.mrf.mxu1 }
 0x45e   : > { %14955 = vst [vmem:[#allocation31_spill] sm:$0xff] %v14185_v28 }
 0x45f   : > { %v10861_v15 = vpop.f32.mrf.mxu1 }
 0x460   : > { %v14193_v30 = vadd.f32 %v10861_v15, %v14075_v24  ;;  %v14211_v24 = vpop.f32.mrf.mxu0 }
 0x461   : > { %v14195_v62 = vpop.f32.mrf.mxu1 }
 0x462   : > { %14957 = vst [vmem:[#allocation69_spill] sm:$0xff] %v14193_v30  ;;  %14958 = vst [vmem:[#allocation72_spill] sm:$0xff] %v14195_v62 }
 0x463   : > { %v10864_v39 = vpop.f32.mrf.mxu1 }
 0x464   : > { %v14200_v26 = vadd.f32 %v10864_v39, %v14083_v16  ;;  %v14218_v39 = vpop.f32.mrf.mxu0 }
 0x465   : > { %v14202_v61 = vpop.f32.mrf.mxu1 }
 0x466   : > { %14959 = vst [vmem:[#allocation8_spill] sm:$0xff] %v14200_v26  ;;  %14960 = vst [vmem:[#allocation16_spill] sm:$0xff] %v14202_v61 }
 0x467   : > { %v10867_v28 = vpop.f32.mrf.mxu1 }
 0x468   : > { %v14207_v49 = vadd.f32 %v10867_v28, %v14091_v13  ;;  %v14225_v13 = vpop.f32.mrf.mxu0 }
 0x469   : > { %v14209_v29 = vpop.f32.mrf.mxu1 }
 0x46a   : > { %14961 = vst [vmem:[#allocation50_spill] sm:$0xff] %v14207_v49  ;;  %14962 = vst [vmem:[#allocation49_spill] sm:$0xff] %v14209_v29 }
 0x46b   : > { %v10870_v15 = vpop.f32.mrf.mxu1 }
 0x46c   : > { %v14214_v30 = vadd.f32 %v10870_v15, %v14099_v35  ;;  %v7258_v35 = vadd.f32 %v14001_v14, %v14006_v37  ;;  %v14234_v15 = vpop.f32.mrf.mxu0 }
 0x46d   : > { %v14216_v62 = vpop.f32.mrf.mxu1 }
 0x46e   : > { %14963 = vst [vmem:[#allocation32_spill] sm:$0xff] %v14214_v30  ;;  %14964 = vst [vmem:[#allocation33_spill] sm:$0xff] %v14216_v62  ;;  %v7648_v62 = vadd.f32 %v7489_v20, %v7258_v35 }
 0x46f   : > { %v10873_v16 = vpop.f32.mrf.mxu1 }
 0x470   : > { %v14221_v26 = vadd.f32 %v10873_v16, %v14107_v33  ;;  %v8038_v14 = vadd.f32 %v14133_v36, %v7648_v62 }
 0x471   : > { %v14223_v61 = vpop.f32.mrf.mxu1 }
 0x472   : > { %14965 = vst [vmem:[#allocation71_spill] sm:$0xff] %v14221_v26  ;;  %14966 = vst [vmem:[#allocation74_spill] sm:$0xff] %v14223_v61  ;;  %v7260_v26 = vadd.f32 %v14009_v23, %v14014_v9  ;;  %v14243_v61 = vpop.f32.mrf.mxu0  ;;  %v8041_v9 = vadd.f32 %v14140_v41, %v14136_v60 }
 0x473   : > { %v10876_v28 = vpop.f32.mrf.mxu1 }
 0x474   : > { %v14228_v49 = vadd.f32 %v10876_v28, %v14115_v6  ;;  %v8039_v28 = vadd.f32 %v14128_v43, %v14131_v18  ;;  %v7650_v37 = vadd.f32 %v14138_v57, %v7260_v26  ;;  %v14255_v35 = vpop.f32.mrf.mxu0 }
 0x475   : > { %v14230_v29 = vpop.f32.mrf.mxu1 }
 0x476   : > { %14967 = vst [vmem:[#allocation17_spill] sm:$0xff] %v14228_v49  ;;  %v8040_v43 = vadd.f32 %v14147_v3, %v7650_v37  ;;  %v14271_v62 = vpop.f32.mrf.mxu0 }
 0x477   : > { %v10879_v30 = vpop.f32.mrf.mxu1 }
 0x478   : > { %v14237_v33 = vadd.f32 %v10879_v30, %v14123_v40  ;;  %v7262_v30 = vadd.f32 %v14017_v8, %v14022_v59  ;;  %v7264_v8 = vadd.f32 %v14025_v1, %v14030_v27 }
 0x479   : > { %v14239_v16 = vpop.f32.mrf.mxu1 }
 0x47a   : > { %v7652_v18 = vadd.f32 %v14145_v25, %v7262_v30  ;;  %v8043_v25 = vadd.f32 %v14154_v34, %v14143_v22  ;;  %v14287_v22 = vpop.f32.mrf.mxu0 }
 0x47b   : > { %v10934_v6 = vpop.f32.mrf.mxu1 }
 0x47c   : > { %v14251_v40 = vadd.f32 %v10934_v6, %v8039_v28  ;;  %v8042_v3 = vadd.f32 %v14161_v4, %v7652_v18  ;;  %v7654_v6 = vadd.f32 %v14152_v52, %v7264_v8  ;;  %v8045_v52 = vadd.f32 %v14168_v53, %v14150_v46  ;;  %v14303_v46 = vpop.f32.mrf.mxu0 }
 0x47d   : > { %v8269_v49 = vpop.f32.mrf.mxu1 }
 0x47e   : > { %v14253_v20 = vadd.f32 %v8269_v49, %v8038_v14  ;;  %v8462_v59 = vsel %vm8460_vm4, %v14251_v40, 0.0  ;;  %v7266_v14 = vadd.f32 %v14033_v38, %v14038_v48 }
 0x47f   : > { %v10937_v23 = vpop.f32.mrf.mxu1 }
 0x480   : > { %v8461_v26 = vsel %vm8460_vm4, %v14253_v20, 0.0  ;;  %v14267_v49 = vadd.f32 %v10937_v23, %v8041_v9  ;;  %v8044_v9 = vadd.f32 %v14175_v50, %v7654_v6 }
 0x481   : > { %v8279_v36 = vpop.f32.mrf.mxu1  ;;  %v8463_v60 = vadd.f32 %v8462_v59, %v8461_v26  ;;  %v7268_v26 = vadd.f32 %v14041_v10, %v14046_v55 }
 0x482   : > { %v14269_v57 = vadd.f32 %v8279_v36, %v8040_v43  ;;  %v8466_v37 = vsel %vm8460_vm4, %v14267_v49, 0.0  ;;  %v7656_v43 = vadd.f32 %v14159_v11, %v7266_v14  ;;  %v8047_v11 = vadd.f32 %v14182_v19, %v14157_v44  ;;  %v14319_v44 = vpop.f32.mrf.mxu0 }
 0x483   : > { %v10940_v41 = vpop.f32.mrf.mxu1 }
 0x484   : > { %v8464_v1 = vsel %vm8460_vm4, %v14269_v57, 0.0  ;;  %v14283_v30 = vadd.f32 %v10940_v41, %v8043_v25  ;;  %v7658_v41 = vadd.f32 %v14166_v47, %v7268_v26  ;;  %v8049_v47 = vadd.f32 %v14197_v63, %v14164_v42  ;;  %v14335_v42 = vpop.f32.mrf.mxu0 }
 0x485   : > { %v8465_v27 = vadd.f32 %v8464_v1, %v8463_v60  ;;  %v8289_v28 = vpop.f32.mrf.mxu1  ;;  %v8046_v60 = vadd.f32 %v14189_v17, %v7656_v43 }
 0x486   : > { %v14285_v23 = vadd.f32 %v8289_v28, %v8042_v3  ;;  %v8470_v36 = vsel %vm8460_vm4, %v14283_v30, 0.0  ;;  %v7270_v3 = vadd.f32 %v14049_v2, %v14054_v54  ;;  %v8048_v28 = vadd.f32 %v14204_v12, %v7658_v41  ;;  %v14968_v41 = vld [vmem:[#allocation5_spill] sm:$0xff] }
 0x487   : > { %v8467_v34 = vadd.f32 %v8466_v37, %v8465_v27  ;;  %v10943_v4 = vpop.f32.mrf.mxu1 }
 0x488   : > { %v8468_v38 = vsel %vm8460_vm4, %v14285_v23, 0.0  ;;  %v14299_v8 = vadd.f32 %v10943_v4, %v8045_v52  ;;  %v7660_v14 = vadd.f32 %v14173_v5, %v7270_v3  ;;  %v8051_v5 = vadd.f32 %v14211_v24, %v14171_v45  ;;  %v7989_v45 = vpop.f32.mrf.mxu0 }
 0x489   : > { %v8469_v48 = vadd.f32 %v8468_v38, %v8467_v34  ;;  %v8299_v18 = vpop.f32.mrf.mxu1  ;;  %v7272_v34 = vadd.f32 %v14057_v31, %v14062_v0 }
 0x48a   : > { %v14301_v59 = vadd.f32 %v8299_v18, %v8044_v9  ;;  %v8474_v6 = vsel %vm8460_vm4, %v14299_v8, 0.0  ;;  %v8050_v43 = vadd.f32 %v14218_v39, %v7660_v14  ;;  %v7274_v18 = vadd.f32 %v14065_v51, %v14070_v21 }
 0x48b   : > { %v8471_v53 = vadd.f32 %v8470_v36, %v8469_v48  ;;  %v10946_v50 = vpop.f32.mrf.mxu1  ;;  %v7662_v38 = vadd.f32 %v14180_v32, %v7272_v34  ;;  %v8053_v32 = vadd.f32 %v14225_v13, %v14178_v56  ;;  %v10920_v56 = vpop.f32.mrf.mxu0 }
 0x48c   : > { %v8472_v10 = vsel %vm8460_vm4, %v14301_v59, 0.0  ;;  %v14315_v1 = vadd.f32 %v10946_v50, %v8047_v11  ;;  %v7664_v11 = vadd.f32 %v14187_v7, %v7274_v18 }
 0x48d   : > { %v8473_v55 = vadd.f32 %v8472_v10, %v8471_v53  ;;  %v8309_v25 = vpop.f32.mrf.mxu1  ;;  %v8052_v50 = vadd.f32 %v14234_v15, %v7662_v38  ;;  %v7276_v10 = vadd.f32 %v14968_v41, %v14078_v58 }
 0x48e   : > { %v14317_v27 = vadd.f32 %v8309_v25, %v8046_v60  ;;  %v8478_v4 = vsel %vm8460_vm4, %v14315_v1, 0.0 }
 0x48f   : > { %v8475_v19 = vadd.f32 %v8474_v6, %v8473_v55  ;;  %v10949_v17 = vpop.f32.mrf.mxu1  ;;  %v14969_v6 = vld [vmem:[#allocation31_spill] sm:$0xff] }
 0x490   : > { %v8476_v2 = vsel %vm8460_vm4, %v14317_v27, 0.0  ;;  %v14331_v52 = vadd.f32 %v10949_v17, %v8049_v47  ;;  %v8055_v7 = vadd.f32 %v14243_v61, %v14969_v6  ;;  %v14970_v17 = vld [vmem:[#allocation72_spill] sm:$0xff]  ;;  %v7999_v61 = vpop.f32.mrf.mxu0 }
 0x491   : > { %v8477_v54 = vadd.f32 %v8476_v2, %v8475_v19  ;;  %v8319_v37 = vpop.f32.mrf.mxu1  ;;  %v8054_v19 = vadd.f32 %v14255_v35, %v7664_v11  ;;  %v7666_v47 = vadd.f32 %v14970_v17, %v7276_v10  ;;  %v14971_v2 = vld [vmem:[#allocation46_spill] sm:$0xff]  ;;  %v14980_v17 = vld [vmem:[#allocation29_spill] sm:$0xff] }
 0x492   : > { %v14333_v9 = vadd.f32 %v8319_v37, %v8048_v28  ;;  %v8482_v26 = vsel %vm8460_vm4, %v14331_v52, 0.0 }
 0x493   : > { %v8479_v63 = vadd.f32 %v8478_v4, %v8477_v54  ;;  %v10952_v12 = vpop.f32.mrf.mxu1  ;;  %v14972_v54 = vld [vmem:[#allocation15_spill] sm:$0xff]  ;;  %v8056_v38 = vadd.f32 %v14287_v22, %v7666_v47 }
 0x494   : > { %v8480_v31 = vsel %vm8460_vm4, %v14333_v9, 0.0  ;;  %v14347_v36 = vadd.f32 %v10952_v12, %v8051_v5  ;;  %v7278_v37 = vadd.f32 %v14972_v54, %v14971_v2  ;;  %v14973_v5 = vld [vmem:[#allocation69_spill] sm:$0xff]  ;;  %v14981_v54 = vld [vmem:[#allocation50_spill] sm:$0xff] }
 0x495   : > { %v8481_v0 = vadd.f32 %v8480_v31, %v8479_v63  ;;  %v8329_v48 = vpop.f32.mrf.mxu1  ;;  %v14974_v31 = vld [vmem:[#allocation16_spill] sm:$0xff] }
 0x496   : > { %v14349_v53 = vadd.f32 %v8329_v48, %v8050_v43  ;;  %v8486_v55 = vsel %vm8460_vm4, %v14347_v36, 0.0  ;;  %v8057_v43 = vadd.f32 %v14271_v62, %v14973_v5  ;;  %v10923_v62 = vpop.f32.mrf.mxu0 }
 0x497   : > { %v8483_v24 = vadd.f32 %v8482_v26, %v8481_v0  ;;  %v10955_v39 = vpop.f32.mrf.mxu1  ;;  %v7668_v0 = vadd.f32 %v14974_v31, %v7278_v37  ;;  %v8061_v37 = vadd.f32 %v14335_v42, %v14981_v54  ;;  %v14983_v31 = vld [vmem:[#allocation6_spill] sm:$0xff] }
 0x498   : > { %v8484_v51 = vsel %vm8460_vm4, %v14349_v53, 0.0  ;;  %v14361_v25 = vadd.f32 %v10955_v39, %v8053_v32  ;;  %v14976_v39 = vld [vmem:[#allocation45_spill] sm:$0xff] }
 0x499   : > { %v8485_v21 = vadd.f32 %v8484_v51, %v8483_v24  ;;  %v8339_v60 = vpop.f32.mrf.mxu1  ;;  %v14975_v24 = vld [vmem:[#allocation28_spill] sm:$0xff]  ;;  %v8058_v10 = vadd.f32 %v14319_v44, %v7668_v0  ;;  %v14984_v0 = vld [vmem:[#allocation70_spill] sm:$0xff] }
 0x49a   : > { %v14363_v3 = vadd.f32 %v8339_v60, %v8052_v50  ;;  %v8490_v34 = vsel %vm8460_vm4, %v14361_v25, 0.0  ;;  %v7280_v32 = vadd.f32 %v14976_v39, %v14975_v24  ;;  %v14977_v60 = vld [vmem:[#allocation8_spill] sm:$0xff] }
 0x49b   : > { %v8487_v13 = vadd.f32 %v8486_v55, %v8485_v21  ;;  %v10958_v15 = vpop.f32.mrf.mxu1  ;;  %v8059_v41 = vadd.f32 %v14303_v46, %v14977_v60  ;;  %v14978_v55 = vld [vmem:[#allocation49_spill] sm:$0xff]  ;;  %v8009_v46 = vpop.f32.mrf.mxu0 }
 0x49c   : > { %v8488_v58 = vsel %vm8460_vm4, %v14363_v3, 0.0  ;;  %v14375_v4 = vadd.f32 %v10958_v15, %v8055_v7 }
 0x49d   : > { %v8489_v28 = vadd.f32 %v8488_v58, %v8487_v13  ;;  %v8349_v14 = vpop.f32.mrf.mxu1  ;;  %v7670_v13 = vadd.f32 %v14978_v55, %v7280_v32  ;;  %v10926_v39 = vpop.f32.mrf.mxu0  ;;  %v14985_v32 = vld [vmem:[#allocation32_spill] sm:$0xff] }
 0x49e   : > { %v14377_v63 = vadd.f32 %v8349_v14, %v8054_v19  ;;  %v8494_v50 = vsel %vm8460_vm4, %v14375_v4, 0.0  ;;  %v14979_v19 = vld [vmem:[#allocation67_spill] sm:$0xff] }
 0x49f   : > { %v8491_v12 = vadd.f32 %v8490_v34, %v8489_v28  ;;  %v10961_v35 = vpop.f32.mrf.mxu1  ;;  %v7282_v47 = vadd.f32 %v14980_v17, %v14979_v19  ;;  %v8060_v34 = vadd.f32 %v7989_v45, %v7670_v13  ;;  %v14987_v13 = vld [vmem:[#allocation47_spill] sm:$0xff] }
 0x4a0   : > { %v8492_v48 = vsel %vm8460_vm4, %v14377_v63, 0.0  ;;  %v14389_v11 = vadd.f32 %v10961_v35, %v8057_v43 }
 0x4a1   : > { %v8493_v18 = vadd.f32 %v8492_v48, %v8491_v12  ;;  %v8359_v26 = vpop.f32.mrf.mxu1  ;;  %v14982_v12 = vld [vmem:[#allocation33_spill] sm:$0xff]  ;;  %v7284_v48 = vadd.f32 %v14984_v0, %v14983_v31 }
 0x4a2   : > { %v14391_v51 = vadd.f32 %v8359_v26, %v8056_v38  ;;  %v8498_v58 = vsel %vm8460_vm4, %v14389_v11, 0.0  ;;  %v7672_v35 = vadd.f32 %v14982_v12, %v7282_v47  ;;  %v8019_v47 = vpop.f32.mrf.mxu0 }
 0x4a3   : > { %v8495_v21 = vadd.f32 %v8494_v50, %v8493_v18  ;;  %v10964_v22 = vpop.f32.mrf.mxu1  ;;  %v8063_v50 = vadd.f32 %v10920_v56, %v14985_v32 }
 0x4a4   : > { %v8496_v15 = vsel %vm8460_vm4, %v14391_v51, 0.0  ;;  %v14403_v28 = vadd.f32 %v10964_v22, %v8059_v41  ;;  %v14986_v22 = vld [vmem:[#allocation74_spill] sm:$0xff] }
 0x4a5   : > { %v8497_v6 = vadd.f32 %v8496_v15, %v8495_v21  ;;  %v8369_v7 = vpop.f32.mrf.mxu1  ;;  %v8062_v21 = vadd.f32 %v7999_v61, %v7672_v35  ;;  %v7674_v60 = vadd.f32 %v14986_v22, %v7284_v48  ;;  %v14988_v15 = vld [vmem:[#allocation7_spill] sm:$0xff] }
 0x4a6   : > { %v14405_v14 = vadd.f32 %v8369_v7, %v8058_v10  ;;  %v8502_v18 = vsel %vm8460_vm4, %v14403_v28, 0.0 }
 0x4a7   : > { %v8499_v2 = vadd.f32 %v8498_v58, %v8497_v6  ;;  %v10967_v44 = vpop.f32.mrf.mxu1  ;;  %v7286_v6 = vadd.f32 %v14988_v15, %v14987_v13  ;;  %v14989_v58 = vld [vmem:[#allocation71_spill] sm:$0xff] }
 0x4a8   : > { %v8500_v5 = vsel %vm8460_vm4, %v14405_v14, 0.0  ;;  %v14416_v26 = vadd.f32 %v10967_v44, %v8061_v37  ;;  %v8064_v44 = vadd.f32 %v8009_v46, %v7674_v60 }
 0x4a9   : > { %v8501_v43 = vadd.f32 %v8500_v5, %v8499_v2  ;;  %v8379_v38 = vpop.f32.mrf.mxu1  ;;  %v8065_v2 = vadd.f32 %v10923_v62, %v14989_v58  ;;  %v7676_v54 = vadd.f32 %v14230_v29, %v7286_v6  ;;  %v14990_v5 = vld [vmem:[#allocation30_spill] sm:$0xff] }
 0x4aa   : > { %v14418_v24 = vadd.f32 %v8379_v38, %v8060_v34  ;;  %v8506_v7 = vsel %vm8460_vm4, %v14416_v26, 0.0  ;;  %v10929_v34 = vpop.f32.mrf.mxu0 }
 0x4ab   : > { %v8503_v42 = vadd.f32 %v8502_v18, %v8501_v43  ;;  %v10970_v45 = vpop.f32.mrf.mxu1  ;;  %v14991_v43 = vld [vmem:[#allocation48_spill] sm:$0xff]  ;;  %v14992_v18 = vld [vmem:[#allocation17_spill] sm:$0xff] }
 0x4ac   : > { %v8504_v41 = vsel %vm8460_vm4, %v14418_v24, 0.0  ;;  %v14428_v19 = vadd.f32 %v10970_v45, %v8063_v50  ;;  %v7288_v38 = vadd.f32 %v14991_v43, %v14990_v5  ;;  %v8067_v29 = vadd.f32 %v10926_v39, %v14992_v18  ;;  %v8029_v50 = vpop.f32.mrf.mxu0 }
 0x4ad   : > { %v8505_v10 = vadd.f32 %v8504_v41, %v8503_v42  ;;  %v8389_v55 = vpop.f32.mrf.mxu1  ;;  %v8066_v42 = vadd.f32 %v8019_v47, %v7676_v54  ;;  %v8069_v39 = vadd.f32 %v10929_v34, %v14237_v33 }
 0x4ae   : > { %v14430_v17 = vadd.f32 %v8389_v55, %v8062_v21  ;;  %v8510_v31 = vsel %vm8460_vm4, %v14428_v19, 0.0  ;;  %v7678_v45 = vadd.f32 %v14239_v16, %v7288_v38 }
 0x4af   : > { %v8507_v56 = vadd.f32 %v8506_v7, %v8505_v10  ;;  %v10973_v61 = vpop.f32.mrf.mxu1 }
 0x4b0   : > { %v8508_v37 = vsel %vm8460_vm4, %v14430_v17, 0.0  ;;  %v14440_v0 = vadd.f32 %v10973_v61, %v8065_v2  ;;  %v8068_v15 = vadd.f32 %v8029_v50, %v7678_v45 }
 0x4b1   : > { %v8509_v12 = vadd.f32 %v8508_v37, %v8507_v56  ;;  %v8399_v35 = vpop.f32.mrf.mxu1 }
 0x4b2   : > { %v14442_v48 = vadd.f32 %v8399_v35, %v8064_v44  ;;  %v8514_v60 = vsel %vm8460_vm4, %v14440_v0, 0.0 }
 0x4b3   : > { %v8511_v62 = vadd.f32 %v8510_v31, %v8509_v12  ;;  %v10976_v46 = vpop.f32.mrf.mxu1 }
 0x4b4   : > { %v8512_v32 = vsel %vm8460_vm4, %v14442_v48, 0.0  ;;  %v14450_v41 = vadd.f32 %v10976_v46, %v8067_v29 }
 0x4b5   : > { %v8513_v21 = vadd.f32 %v8512_v32, %v8511_v62  ;;  %v8409_v22 = vpop.f32.mrf.mxu1 }
 0x4b6   : > { %v14452_v10 = vadd.f32 %v8409_v22, %v8066_v42  ;;  %v8518_v47 = vsel %vm8460_vm4, %v14450_v41, 0.0 }
 0x4b7   : > { %v8515_v55 = vadd.f32 %v8514_v60, %v8513_v21  ;;  %v10979_v13 = vpop.f32.mrf.mxu1 }
 0x4b8   : > { %v8516_v16 = vsel %vm8460_vm4, %v14452_v10, 0.0  ;;  %v14459_v56 = vadd.f32 %v10979_v13, %v8069_v39 }
 0x4b9   : > { %v8517_v6 = vadd.f32 %v8516_v16, %v8515_v55  ;;  %v8419_v7 = vpop.f32.mrf.mxu1 }
 0x4ba   : > { %v14461_v61 = vadd.f32 %v8419_v7, %v8068_v15  ;;  %v8522_v33 = vsel %vm8460_vm4, %v14459_v56, 0.0 }
 0x4bb   : > { %v8519_v58 = vadd.f32 %v8518_v47, %v8517_v6 }
 0x4bc   : > { %v8520_v2 = vsel %vm8460_vm4, %v14461_v61, 0.0 }
 0x4bd   : > { %v8521_v44 = vadd.f32 %v8520_v2, %v8519_v58 }
 0x4bf   : > { %v8523_v54 = vadd.f32 %v8522_v33, %v8521_v44 }
 0x4c1   : > { %v8524_v37 = vrot.slane %v8523_v54, 4 }
 0x4c3   : > { %v8525_v34 = vadd.f32 %v8524_v37, %v8523_v54 }
 0x4c5   : > { %v8526_v12 = vrot.slane %v8525_v34, 2 }
 0x4c7   : > { %v8527_v35 = vadd.f32 %v8526_v12, %v8525_v34 }
 0x4c9   : > { %v8528_v5 = vrot.slane %v8527_v35, 1 }
 0x4cb   : > { %v8529_v43 = vadd.f32 %v8528_v5, %v8527_v35 }
 0x4cd   : > { %v14467_v38 = vmul.f32 0.00390625, %v8529_v43 }
 0x4cf   : > { %v8531_v31 = vsub.f32 %v14253_v20, %v14467_v38  ;;  %v8532_v62 = vsub.f32 %v14251_v40, %v14467_v38  ;;  %v8533_v46 = vsub.f32 %v14269_v57, %v14467_v38  ;;  %v8534_v18 = vsub.f32 %v14267_v49, %v14467_v38 }
 0x4d0   : > { %v8535_v45 = vsub.f32 %v14285_v23, %v14467_v38  ;;  %v8536_v50 = vsub.f32 %v14283_v30, %v14467_v38  ;;  %v8537_v13 = vsub.f32 %v14301_v59, %v14467_v38  ;;  %v8538_v6 = vsub.f32 %v14299_v8, %v14467_v38 }
 0x4d1   : > { %v8563_v29 = vmul.f32 %v8531_v31, %v8531_v31  ;;  %v8564_v42 = vmul.f32 %v8532_v62, %v8532_v62  ;;  %v8565_v32 = vmul.f32 %v8533_v46, %v8533_v46  ;;  %v8566_v21 = vmul.f32 %v8534_v18, %v8534_v18 }
 0x4d2   : > { %v8567_v39 = vmul.f32 %v8535_v45, %v8535_v45  ;;  %v8568_v7 = vmul.f32 %v8536_v50, %v8536_v50  ;;  %v8539_v2 = vsub.f32 %v14317_v27, %v14467_v38  ;;  %v8569_v44 = vmul.f32 %v8537_v13, %v8537_v13 }
 0x4d3   : > { %v8595_v22 = vsel %vm8460_vm4, %v8563_v29, 0.0  ;;  %v8596_v60 = vsel %vm8460_vm4, %v8564_v42, 0.0  ;;  %v8598_v15 = vsel %vm8460_vm4, %v8565_v32, 0.0  ;;  %v8600_v47 = vsel %vm8460_vm4, %v8566_v21, 0.0 }
 0x4d4   : > { %v8597_v55 = vadd.f32 %v8596_v60, %v8595_v22  ;;  %v8602_v33 = vsel %vm8460_vm4, %v8567_v39, 0.0  ;;  %v8540_v37 = vsub.f32 %v14315_v1, %v14467_v38  ;;  %v8570_v34 = vmul.f32 %v8538_v6, %v8538_v6 }
 0x4d5   : > { %v8604_v12 = vsel %vm8460_vm4, %v8568_v7, 0.0  ;;  %v8541_v5 = vsub.f32 %v14333_v9, %v14467_v38  ;;  %v8571_v43 = vmul.f32 %v8539_v2, %v8539_v2  ;;  %v8606_v31 = vsel %vm8460_vm4, %v8569_v44, 0.0 }
 0x4d6   : > { %v8599_v16 = vadd.f32 %v8598_v15, %v8597_v55  ;;  %v8542_v46 = vsub.f32 %v14331_v52, %v14467_v38  ;;  %v8572_v18 = vmul.f32 %v8540_v37, %v8540_v37  ;;  %v8608_v29 = vsel %vm8460_vm4, %v8570_v34, 0.0 }
 0x4d7   : > { %v8543_v45 = vsub.f32 %v14349_v53, %v14467_v38  ;;  %v8573_v32 = vmul.f32 %v8541_v5, %v8541_v5  ;;  %v8610_v50 = vsel %vm8460_vm4, %v8571_v43, 0.0  ;;  %v8544_v22 = vsub.f32 %v14347_v36, %v14467_v38 }
 0x4d8   : > { %v8601_v58 = vadd.f32 %v8600_v47, %v8599_v16  ;;  %v8574_v60 = vmul.f32 %v8542_v46, %v8542_v46  ;;  %v8612_v55 = vsel %vm8460_vm4, %v8572_v18, 0.0  ;;  %v8545_v39 = vsub.f32 %v14363_v3, %v14467_v38 }
 0x4d9   : > { %v8575_v15 = vmul.f32 %v8543_v45, %v8543_v45  ;;  %v8614_v16 = vsel %vm8460_vm4, %v8573_v32, 0.0  ;;  %v8546_v7 = vsub.f32 %v14361_v25, %v14467_v38  ;;  %v8576_v47 = vmul.f32 %v8544_v22, %v8544_v22 }
 0x4da   : > { %v8603_v54 = vadd.f32 %v8602_v33, %v8601_v58  ;;  %v8616_v58 = vsel %vm8460_vm4, %v8574_v60, 0.0  ;;  %v8547_v44 = vsub.f32 %v14377_v63, %v14467_v38  ;;  %v8577_v33 = vmul.f32 %v8545_v39, %v8545_v39 }
 0x4db   : > { %v8548_v34 = vsub.f32 %v14375_v4, %v14467_v38  ;;  %v8549_v43 = vsub.f32 %v14391_v51, %v14467_v38  ;;  %v8550_v18 = vsub.f32 %v14389_v11, %v14467_v38  ;;  %v8551_v32 = vsub.f32 %v14405_v14, %v14467_v38 }
 0x4dc   : > { %v8605_v35 = vadd.f32 %v8604_v12, %v8603_v54  ;;  %v8618_v54 = vsel %vm8460_vm4, %v8575_v15, 0.0  ;;  %v8578_v12 = vmul.f32 %v8546_v7, %v8546_v7  ;;  %v8552_v60 = vsub.f32 %v14403_v28, %v14467_v38 }
 0x4dd   : > { %v8553_v15 = vsub.f32 %v14418_v24, %v14467_v38 }
 0x4de   : > { %v8607_v62 = vadd.f32 %v8606_v31, %v8605_v35  ;;  %v8620_v35 = vsel %vm8460_vm4, %v8576_v47, 0.0  ;;  %v8579_v31 = vmul.f32 %v8547_v44, %v8547_v44  ;;  %v8554_v47 = vsub.f32 %v14416_v26, %v14467_v38 }
 0x4e0   : > { %v8609_v42 = vadd.f32 %v8608_v29, %v8607_v62  ;;  %v8622_v62 = vsel %vm8460_vm4, %v8577_v33, 0.0  ;;  %v8580_v29 = vmul.f32 %v8548_v34, %v8548_v34  ;;  %v8555_v33 = vsub.f32 %v14430_v17, %v14467_v38 }
 0x4e2   : > { %v8611_v21 = vadd.f32 %v8610_v50, %v8609_v42  ;;  %v8624_v42 = vsel %vm8460_vm4, %v8578_v12, 0.0  ;;  %v8581_v50 = vmul.f32 %v8549_v43, %v8549_v43  ;;  %v8556_v12 = vsub.f32 %v14428_v19, %v14467_v38 }
 0x4e4   : > { %v8613_v13 = vadd.f32 %v8612_v55, %v8611_v21  ;;  %v8626_v21 = vsel %vm8460_vm4, %v8579_v31, 0.0  ;;  %v8582_v55 = vmul.f32 %v8550_v18, %v8550_v18  ;;  %v8557_v31 = vsub.f32 %v14442_v48, %v14467_v38 }
 0x4e6   : > { %v8615_v6 = vadd.f32 %v8614_v16, %v8613_v13  ;;  %v8628_v13 = vsel %vm8460_vm4, %v8580_v29, 0.0  ;;  %v8583_v16 = vmul.f32 %v8551_v32, %v8551_v32  ;;  %v8558_v29 = vsub.f32 %v14440_v0, %v14467_v38 }
 0x4e8   : > { %v8617_v2 = vadd.f32 %v8616_v58, %v8615_v6  ;;  %v8630_v6 = vsel %vm8460_vm4, %v8581_v50, 0.0  ;;  %v8584_v58 = vmul.f32 %v8552_v60, %v8552_v60  ;;  %v8559_v50 = vsub.f32 %v14452_v10, %v14467_v38 }
 0x4ea   : > { %v8619_v37 = vadd.f32 %v8618_v54, %v8617_v2  ;;  %v8632_v2 = vsel %vm8460_vm4, %v8582_v55, 0.0  ;;  %v8585_v54 = vmul.f32 %v8553_v15, %v8553_v15  ;;  %v8560_v55 = vsub.f32 %v14450_v41, %v14467_v38 }
 0x4ec   : > { %v8621_v5 = vadd.f32 %v8620_v35, %v8619_v37  ;;  %v8634_v37 = vsel %vm8460_vm4, %v8583_v16, 0.0  ;;  %v8586_v35 = vmul.f32 %v8554_v47, %v8554_v47  ;;  %v8561_v16 = vsub.f32 %v14461_v61, %v14467_v38 }
 0x4ee   : > { %v8623_v46 = vadd.f32 %v8622_v62, %v8621_v5  ;;  %v8636_v5 = vsel %vm8460_vm4, %v8584_v58, 0.0  ;;  %v8587_v62 = vmul.f32 %v8555_v33, %v8555_v33  ;;  %v8562_v58 = vsub.f32 %v14459_v56, %v14467_v38 }
 0x4f0   : > { %v8625_v45 = vadd.f32 %v8624_v42, %v8623_v46  ;;  %v8638_v46 = vsel %vm8460_vm4, %v8585_v54, 0.0  ;;  %v8588_v42 = vmul.f32 %v8556_v12, %v8556_v12  ;;  %v8593_v54 = vmul.f32 %v8561_v16, %v8561_v16 }
 0x4f1   : > { %v8594_v12 = vmul.f32 %v8562_v58, %v8562_v58 }
 0x4f2   : > { %v8627_v22 = vadd.f32 %v8626_v21, %v8625_v45  ;;  %v8640_v45 = vsel %vm8460_vm4, %v8586_v35, 0.0  ;;  %v8589_v21 = vmul.f32 %v8557_v31, %v8557_v31 }
 0x4f4   : > { %v8629_v39 = vadd.f32 %v8628_v13, %v8627_v22  ;;  %v8642_v22 = vsel %vm8460_vm4, %v8587_v62, 0.0  ;;  %v8590_v13 = vmul.f32 %v8558_v29, %v8558_v29  ;;  %v8656_v62 = vsel %vm8460_vm4, %v8594_v12, 0.0 }
 0x4f6   : > { %v8631_v7 = vadd.f32 %v8630_v6, %v8629_v39  ;;  %v8644_v39 = vsel %vm8460_vm4, %v8588_v42, 0.0  ;;  %v8591_v6 = vmul.f32 %v8559_v50, %v8559_v50 }
 0x4f8   : > { %v8633_v44 = vadd.f32 %v8632_v2, %v8631_v7  ;;  %v8646_v7 = vsel %vm8460_vm4, %v8589_v21, 0.0  ;;  %v8592_v2 = vmul.f32 %v8560_v55, %v8560_v55 }
 0x4fa   : > { %v8635_v34 = vadd.f32 %v8634_v37, %v8633_v44  ;;  %v8648_v44 = vsel %vm8460_vm4, %v8590_v13, 0.0  ;;  %v8650_v37 = vsel %vm8460_vm4, %v8591_v6, 0.0  ;;  %v8652_v35 = vsel %vm8460_vm4, %v8592_v2, 0.0  ;;  %v14994_v2 = vld [vmem:[#allocation4_spill] sm:$0xff] }
 0x4fc   : > { %v8637_v43 = vadd.f32 %v8636_v5, %v8635_v34 }
 0x4fe   : > { %v8639_v18 = vadd.f32 %v8638_v46, %v8637_v43  ;;  %v8654_v43 = vsel %vm8460_vm4, %v8593_v54, 0.0 }
 0x500   : > { %v8641_v32 = vadd.f32 %v8640_v45, %v8639_v18 }
 0x502   : > { %v8643_v60 = vadd.f32 %v8642_v22, %v8641_v32 }
 0x504   : > { %v8645_v15 = vadd.f32 %v8644_v39, %v8643_v60  ;;  %v8668_v60 = vpop.permute.xlu0 %8667 }
 0x506   : > { %v8647_v47 = vadd.f32 %v8646_v7, %v8645_v15  ;;  %v14993_v15 = vld [vmem:[#allocation3_spill] sm:$0xff] }
 0x508   : > { %v8649_v33 = vadd.f32 %v8648_v44, %v8647_v47  ;;  %v10999_v47 = vld [vmem:[%s12453_s18] sm:$0x1] }
 0x50a   : > { %v8651_v34 = vadd.f32 %v8650_v37, %v8649_v33 }
 0x50c   : > { %v8653_v5 = vadd.f32 %v8652_v35, %v8651_v34 }
 0x50e   : > { %v8655_v31 = vadd.f32 %v8654_v43, %v8653_v5 }
 0x510   : > { %v8657_v46 = vadd.f32 %v8656_v62, %v8655_v31 }
 0x512   : > { %v8658_v18 = vrot.slane %v8657_v46, 4 }
 0x514   : > { %v8659_v29 = vadd.f32 %v8658_v18, %v8657_v46 }
 0x516   : > { %v8660_v42 = vrot.slane %v8659_v29, 2 }
 0x518   : > { %v8661_v45 = vadd.f32 %v8660_v42, %v8659_v29 }
 0x51a   : > { %v8662_v32 = vrot.slane %v8661_v45, 1 }
 0x51c   : > { %v8663_v50 = vadd.f32 %v8662_v32, %v8661_v45 }
 0x51e   : > { %v8664_v21 = vmul.f32 0.003921569, %v8663_v50 }
 0x520   : > { %v8665_v22 = vadd.f32 1e-05, %v8664_v21 }
 0x522   : > { %10997 = vrsqrt.f32 %v8665_v22 }
 0x52f   : > { %v10998_v55 = vpop.eup %10997 }
 0x530   : > { %v8670_v13 = vmul.f32 %v10998_v55, %v8668_v60 }
 0x532   : > { %v8671_v39 = vmul.f32 %v8670_v13, %v14467_v38  ;;  %v8694_v33 = vrot.slane %v8670_v13, %v14994_v2 }
 0x534   : > { %v8679_v16 = vrot.slane %v8671_v39, %v14993_v15  ;;  %v8695_v54 = vmul.f32 %v8694_v33, %v14253_v20  ;;  %v8696_v38 = vmul.f32 %v8694_v33, %v14251_v40  ;;  %v8697_v37 = vmul.f32 %v8694_v33, %v14269_v57 }
 0x535   : > { %v8698_v34 = vmul.f32 %v8694_v33, %v14267_v49  ;;  %v8699_v12 = vmul.f32 %v8694_v33, %v14285_v23  ;;  %v8700_v35 = vmul.f32 %v8694_v33, %v14283_v30  ;;  %v8701_v5 = vmul.f32 %v8694_v33, %v14301_v59 }
 0x536   : > { %v8686_v6 = vrot.slane %v8679_v16, %v14993_v15  ;;  %v8702_v43 = vmul.f32 %v8694_v33, %v14299_v8  ;;  %v8703_v31 = vmul.f32 %v8694_v33, %v14317_v27  ;;  %v8704_v62 = vmul.f32 %v8694_v33, %v14315_v1 }
 0x537   : > { %v8705_v20 = vmul.f32 %v8694_v33, %v14333_v9  ;;  %v8706_v40 = vmul.f32 %v8694_v33, %v14331_v52  ;;  %v8707_v57 = vmul.f32 %v8694_v33, %v14349_v53  ;;  %v8708_v49 = vmul.f32 %v8694_v33, %v14347_v36 }
 0x538   : > { %8687 = vrot.lane.b32.xlu1 %v8686_v6, %s11013_s13  ;;  %v8709_v23 = vmul.f32 %v8694_v33, %v14363_v3  ;;  %v8710_v30 = vmul.f32 %v8694_v33, %v14361_v25  ;;  %v8711_v59 = vmul.f32 %v8694_v33, %v14377_v63  ;;  %v8712_v8 = vmul.f32 %v8694_v33, %v14375_v4 }
 0x539   : > { %v8713_v27 = vmul.f32 %v8694_v33, %v14391_v51  ;;  %v8714_v1 = vmul.f32 %v8694_v33, %v14389_v11  ;;  %v8715_v9 = vmul.f32 %v8694_v33, %v14405_v14  ;;  %v8716_v52 = vmul.f32 %v8694_v33, %v14403_v28 }
 0x53a   : > { %v8717_v53 = vmul.f32 %v8694_v33, %v14418_v24  ;;  %v8718_v36 = vmul.f32 %v8694_v33, %v14416_v26  ;;  %v8719_v3 = vmul.f32 %v8694_v33, %v14430_v17  ;;  %v8720_v25 = vmul.f32 %v8694_v33, %v14428_v19 }
 0x53b   : > { %v8721_v63 = vmul.f32 %v8694_v33, %v14442_v48  ;;  %v8722_v4 = vmul.f32 %v8694_v33, %v14440_v0  ;;  %v8723_v11 = vmul.f32 %v8694_v33, %v14452_v10  ;;  %v8724_v51 = vmul.f32 %v8694_v33, %v14450_v41 }
 0x53c   : > { %v8725_v28 = vmul.f32 %v8694_v33, %v14461_v61  ;;  %v8726_v14 = vmul.f32 %v8694_v33, %v14459_v56 }
 0x5aa   : > { %v8688_v7 = vpop.permute.xlu1 %8687 }
 0x5ab   : > { %v8690_v58 = vsub.f32 %v10999_v47, %v8688_v7 }
 0x5ad   : > { %v8731_v44 = vrot.slane %v8690_v58, %v14994_v2 }
 0x5af   : > { %8732 = vrot.lane.b32.xlu1 %v8731_v44, %s11014_s14 }
 0x621   : > { %v8733_v26 = vpop.permute.xlu1 %8732 }
 0x622   : > { %v8735_v24 = vadd.f32 %v8733_v26, %v8695_v54  ;;  %v8736_v19 = vadd.f32 %v8733_v26, %v8696_v38  ;;  %v8737_v17 = vadd.f32 %v8733_v26, %v8697_v37  ;;  %v8738_v0 = vadd.f32 %v8733_v26, %v8698_v34 }
 0x623   : > { %v8739_v48 = vadd.f32 %v8733_v26, %v8699_v12  ;;  %v8740_v46 = vadd.f32 %v8733_v26, %v8700_v35  ;;  %v8741_v10 = vadd.f32 %v8733_v26, %v8701_v5  ;;  %v8742_v41 = vadd.f32 %v8733_v26, %v8702_v43 }
 0x624   : > { %v8743_v18 = vadd.f32 %v8733_v26, %v8703_v31  ;;  %v8744_v61 = vadd.f32 %v8733_v26, %v8704_v62  ;;  %v8745_v29 = vadd.f32 %v8733_v26, %v8705_v20  ;;  %v8746_v42 = vadd.f32 %v8733_v26, %v8706_v40  ;;  %8767 = vst.msk [vmem:[%s14603_s19] sm:$0xff] %vm8460_vm4, %v8735_v24 }
 0x625   : > { %8768 = vst.msk [vmem:[%s14603_s19 + $0x8] sm:$0xff] %vm8460_vm4, %v8736_v19  ;;  %8769 = vst.msk [vmem:[%s14603_s19 + $0x10] sm:$0xff] %vm8460_vm4, %v8737_v17  ;;  %v8747_v56 = vadd.f32 %v8733_v26, %v8707_v57  ;;  %v8748_v45 = vadd.f32 %v8733_v26, %v8708_v49  ;;  %v8749_v32 = vadd.f32 %v8733_v26, %v8709_v23 }
 0x626   : > { %8770 = vst.msk [vmem:[%s14603_s19 + $0x18] sm:$0xff] %vm8460_vm4, %v8738_v0  ;;  %v8750_v50 = vadd.f32 %v8733_v26, %v8710_v30  ;;  %8771 = vst.msk [vmem:[%s14603_s19 + $0x20] sm:$0xff] %vm8460_vm4, %v8739_v48  ;;  %v8751_v21 = vadd.f32 %v8733_v26, %v8711_v59  ;;  %v8752_v22 = vadd.f32 %v8733_v26, %v8712_v8 }
 0x627   : > { %8772 = vst.msk [vmem:[%s14603_s19 + $0x28] sm:$0xff] %vm8460_vm4, %v8740_v46  ;;  %8773 = vst.msk [vmem:[%s14603_s19 + $0x30] sm:$0xff] %vm8460_vm4, %v8741_v10  ;;  %v8753_v60 = vadd.f32 %v8733_v26, %v8713_v27  ;;  %v8754_v55 = vadd.f32 %v8733_v26, %v8714_v1  ;;  %v8755_v13 = vadd.f32 %v8733_v26, %v8715_v9 }
 0x628   : > { %8774 = vst.msk [vmem:[%s14603_s19 + $0x38] sm:$0xff] %vm8460_vm4, %v8742_v41  ;;  %8775 = vst.msk [vmem:[%s14603_s19 + $0x40] sm:$0xff] %vm8460_vm4, %v8743_v18  ;;  %v8756_v39 = vadd.f32 %v8733_v26, %v8716_v52  ;;  %v8757_v15 = vadd.f32 %v8733_v26, %v8717_v53  ;;  %v8758_v16 = vadd.f32 %v8733_v26, %v8718_v36 }
 0x629   : > { %8776 = vst.msk [vmem:[%s14603_s19 + $0x48] sm:$0xff] %vm8460_vm4, %v8744_v61  ;;  %8777 = vst.msk [vmem:[%s14603_s19 + $0x50] sm:$0xff] %vm8460_vm4, %v8745_v29  ;;  %v8759_v6 = vadd.f32 %v8733_v26, %v8719_v3  ;;  %v8760_v7 = vadd.f32 %v8733_v26, %v8720_v25  ;;  %v8761_v47 = vadd.f32 %v8733_v26, %v8721_v63 }
 0x62a   : > { %8778 = vst.msk [vmem:[%s14603_s19 + $0x58] sm:$0xff] %vm8460_vm4, %v8746_v42  ;;  %8779 = vst.msk [vmem:[%s14603_s19 + $0x60] sm:$0xff] %vm8460_vm4, %v8747_v56  ;;  %v8762_v58 = vadd.f32 %v8733_v26, %v8722_v4  ;;  %v8763_v2 = vadd.f32 %v8733_v26, %v8723_v11  ;;  %v8764_v44 = vadd.f32 %v8733_v26, %v8724_v51 }
 0x62b   : > { %8780 = vst.msk [vmem:[%s14603_s19 + $0x68] sm:$0xff] %vm8460_vm4, %v8748_v45  ;;  %8781 = vst.msk [vmem:[%s14603_s19 + $0x70] sm:$0xff] %vm8460_vm4, %v8749_v32  ;;  %v8765_v33 = vadd.f32 %v8733_v26, %v8725_v28  ;;  %v8766_v54 = vadd.f32 %v8733_v26, %v8726_v14 }
 0x62c   : > { %8782 = vst.msk [vmem:[%s14603_s19 + $0x78] sm:$0xff] %vm8460_vm4, %v8750_v50  ;;  %8783 = vst.msk [vmem:[%s14603_s19 + $0x80] sm:$0xff] %vm8460_vm4, %v8751_v21 }
 0x62d   : > { %8784 = vst.msk [vmem:[%s14603_s19 + $0x88] sm:$0xff] %vm8460_vm4, %v8752_v22  ;;  %8785 = vst.msk [vmem:[%s14603_s19 + $0x90] sm:$0xff] %vm8460_vm4, %v8753_v60 }
 0x62e   : > { %8786 = vst.msk [vmem:[%s14603_s19 + $0x98] sm:$0xff] %vm8460_vm4, %v8754_v55  ;;  %8787 = vst.msk [vmem:[%s14603_s19 + $0xa0] sm:$0xff] %vm8460_vm4, %v8755_v13 }
 0x62f   : > { %8788 = vst.msk [vmem:[%s14603_s19 + $0xa8] sm:$0xff] %vm8460_vm4, %v8756_v39  ;;  %8789 = vst.msk [vmem:[%s14603_s19 + $0xb0] sm:$0xff] %vm8460_vm4, %v8757_v15 }
 0x630   : > { %8790 = vst.msk [vmem:[%s14603_s19 + $0xb8] sm:$0xff] %vm8460_vm4, %v8758_v16  ;;  %8791 = vst.msk [vmem:[%s14603_s19 + $0xc0] sm:$0xff] %vm8460_vm4, %v8759_v6 }
 0x631   : > { %8792 = vst.msk [vmem:[%s14603_s19 + $0xc8] sm:$0xff] %vm8460_vm4, %v8760_v7  ;;  %8793 = vst.msk [vmem:[%s14603_s19 + $0xd0] sm:$0xff] %vm8460_vm4, %v8761_v47 }
 0x632   : > { %8794 = vst.msk [vmem:[%s14603_s19 + $0xd8] sm:$0xff] %vm8460_vm4, %v8762_v58  ;;  %8795 = vst.msk [vmem:[%s14603_s19 + $0xe0] sm:$0xff] %vm8460_vm4, %v8763_v2 }
 0x633   : > { %8796 = vst.msk [vmem:[%s14603_s19 + $0xe8] sm:$0xff] %vm8460_vm4, %v8764_v44  ;;  %8797 = vst.msk [vmem:[%s14603_s19 + $0xf0] sm:$0xff] %vm8460_vm4, %v8765_v33 }
 0x634   : > { %8798 = vst.msk [vmem:[%s14603_s19 + $0xf8] sm:$0xff] %vm8460_vm4, %v8766_v54 }
 0x635 PF: > { %s14_s15 = sadd.s32 1, %s11006_s15  }
 0x636   : > { %p11_p4 = scmp.ge.s32.totalorder %s14_s15, 4  }
 0x638   :  { %13 = sbr.rel (!%p11_p4) target bundleno = 1 (0x1), region = 88 }

</bundles_post_ra>
